<compile_context>
chip_gen: v6e
topology: v6e:2x2x1
jax: 0.10.0
libtpu: 0.0.40
codegen_flags: <defaults>
</compile_context>

<pallas_src>
import functools
import math

import jax
import jax.numpy as jnp
from jax.experimental import pallas as pl
from jax.experimental.pallas import tpu as pltpu


_ROW_TILE = 512  # rows per grid step for row-tiled kernels


def _ln(x, g, b, eps):
    mu = jnp.mean(x, axis=-1, keepdims=True)
    var = jnp.mean(jnp.square(x - mu), axis=-1, keepdims=True)
    return (x - mu) * jax.lax.rsqrt(var + eps) * g + b


# --------------------------------------------------------------------------------------
# Row-tiled pallas_call helper: tiles the row (sublane) axis, pins 2-D "fixed" operands.
# Ragged last block is left to Pallas (all kernels here are row-independent).
# --------------------------------------------------------------------------------------

def _row_tiled_call(kernel, row_inputs, fixed_inputs, out_feats, n_rows,
                    tm=_ROW_TILE, cost=None):
    TM = n_rows if n_rows <= tm else tm
    grid = pl.cdiv(n_rows, TM)
    in_specs = ([pl.BlockSpec((TM, a.shape[1]), lambda i: (i, 0)) for a in row_inputs]
                + [pl.BlockSpec(f.shape, lambda i, nd=f.ndim: (0,) * nd)
                   for f in fixed_inputs])
    out_shape = tuple(jax.ShapeDtypeStruct((n_rows, f), d) for f, d in out_feats)
    out_specs = tuple(pl.BlockSpec((TM, f), lambda i: (i, 0)) for f, _ in out_feats)
    single = len(out_feats) == 1
    res = pl.pallas_call(
        kernel,
        out_shape=out_shape[0] if single else out_shape,
        grid=(grid,),
        in_specs=in_specs,
        out_specs=out_specs[0] if single else out_specs,
        compiler_params=pltpu.CompilerParams(dimension_semantics=("parallel",)),
        cost_estimate=cost,
    )(*row_inputs, *fixed_inputs)
    return res if single else tuple(res)


# --------------------------------------------------------------------------------------
# Pallas kernels
# --------------------------------------------------------------------------------------

def _mm_kernel(x_ref, w_ref, b_ref, o_ref, *, act):
    y = (jnp.dot(x_ref[...].astype(jnp.bfloat16), w_ref[...],
                 preferred_element_type=jnp.float32) + b_ref[...])
    if act == "relu":
        y = jnp.maximum(y, 0.0)
    o_ref[...] = y.astype(o_ref.dtype)


def pallas_matmul(x, w, b, act="none", out_dtype=jnp.float32):
    """y = act(x @ w + b).  x:(M,K) any dtype (cast to bf16 in-kernel), w:(K,N) bf16."""
    M, Kin = x.shape
    N = w.shape[1]
    cost = pl.CostEstimate(flops=2 * M * Kin * N, transcendentals=0,
                           bytes_accessed=int(M * Kin * x.dtype.itemsize
                                              + Kin * N * 2 + M * N * 4))
    return _row_tiled_call(
        functools.partial(_mm_kernel, act=act),
        [x], [w, b.reshape(1, N).astype(jnp.float32)],
        [(N, out_dtype)], M, cost=cost)


def _mm_res_ln_kernel(x_ref, res_ref, w_ref, b_ref, g_ref, beta_ref, o_ref, *, eps):
    y = (jnp.dot(x_ref[...].astype(jnp.bfloat16), w_ref[...],
                 preferred_element_type=jnp.float32)
         + b_ref[...] + res_ref[...].astype(jnp.float32))
    o_ref[...] = _ln(y, g_ref[...], beta_ref[...], eps)


def pallas_mm_res_ln(x, w, b, res, gamma, beta, eps=1e-5):
    """LayerNorm(x @ w + b + res) — fused projection + residual + LN."""
    M, _ = x.shape
    N = w.shape[1]
    return _row_tiled_call(
        functools.partial(_mm_res_ln_kernel, eps=eps),
        [x, res],
        [w, b.reshape(1, N), gamma.reshape(1, N), beta.reshape(1, N)],
        [(N, jnp.float32)], M)


def _ln_mm_kernel(x_ref, g_ref, bln_ref, w_ref, b_ref, o_ref, *, eps):
    xn = _ln(x_ref[...], g_ref[...], bln_ref[...], eps)
    o_ref[...] = (jnp.dot(xn.astype(jnp.bfloat16), w_ref[...],
                          preferred_element_type=jnp.float32) + b_ref[...])


def pallas_ln_mm(x, gamma, beta, w, b, eps=1e-5):
    """LayerNorm(x) @ w + b — fused LN + projection (separation front)."""
    M, Cin = x.shape
    N = w.shape[1]
    return _row_tiled_call(
        functools.partial(_ln_mm_kernel, eps=eps),
        [x],
        [gamma.reshape(1, Cin), beta.reshape(1, Cin), w, b.reshape(1, N)],
        [(N, jnp.float32)], M)


# ---------------------- fused Globally-Attentive block (one kernel per segment) --------

def _ga_kernel(x_ref, pe_ref, g1_ref, b1_ref, wqkv_ref, bqkv_ref,
               wo_ref, bo_ref, g2_ref, b2_ref, o_ref, *, heads, eps):
    x = x_ref[0]                                                   # (L, N) f32
    L, N = x.shape
    dh = N // heads
    scale = 1.0 / math.sqrt(dh)

    # LN1 + residual + positional encoding (pe broadcast lives only in VMEM)
    xn = _ln(x, g1_ref[...], b1_ref[...], eps) + x + pe_ref[...]

    # QKV projection (bf16 MXU, f32 accumulate)
    qkv = (jnp.dot(xn.astype(jnp.bfloat16), wqkv_ref[...],
                   preferred_element_type=jnp.float32) + bqkv_ref[...])

    # all heads of this segment in one grid step (static unroll, 2-D dots only)
    # TODO(synk): flash-style KV tiling for very long L (= B*K) sequences.
    outs = []
    for h in range(heads):
        qh = qkv[:, h * dh:(h + 1) * dh].astype(jnp.bfloat16)
        kh = qkv[:, N + h * dh:N + (h + 1) * dh].astype(jnp.bfloat16)
        vh = qkv[:, 2 * N + h * dh:2 * N + (h + 1) * dh].astype(jnp.bfloat16)
        s = jax.lax.dot_general(qh, kh, (((1,), (1,)), ((), ())),
                                preferred_element_type=jnp.float32) * scale
        s = s - jnp.max(s, axis=-1, keepdims=True)
        p = jnp.exp(s)
        p = p * pl.reciprocal(jnp.sum(p, axis=-1, keepdims=True), approx=True)
        outs.append(jnp.dot(p.astype(jnp.bfloat16), vh,
                            preferred_element_type=jnp.float32))
    attn = jnp.concatenate(outs, axis=-1)                          # (L, N)

    # out_proj + residual (xn) + LN2 + outer residual (x)
    y = (jnp.dot(attn.astype(jnp.bfloat16), wo_ref[...],
                 preferred_element_type=jnp.float32) + bo_ref[...] + xn)
    o_ref[0] = _ln(y, g2_ref[...], b2_ref[...], eps) + x


def globally_attentive(x, p, pe, num_heads, eps=1e-5):
    """x:(B, N, K, S) -> same shape.  Whole GA block fused, grid over segments S."""
    B, N, K, S = x.shape
    L = B * K
    xr = x.transpose(3, 0, 2, 1).reshape(S, L, N)                  # (S, L, N)
    pe2 = pe[:L]                                                   # (L, N), indexed by seq
    y = pl.pallas_call(
        functools.partial(_ga_kernel, heads=num_heads, eps=eps),
        out_shape=jax.ShapeDtypeStruct((S, L, N), jnp.float32),
        grid=(S,),
        in_specs=[pl.BlockSpec((1, L, N), lambda s: (s, 0, 0)),
                  pl.BlockSpec((L, N), lambda s: (0, 0)),
                  pl.BlockSpec((1, N), lambda s: (0, 0)),
                  pl.BlockSpec((1, N), lambda s: (0, 0)),
                  pl.BlockSpec((N, 3 * N), lambda s: (0, 0)),
                  pl.BlockSpec((1, 3 * N), lambda s: (0, 0)),
                  pl.BlockSpec((N, N), lambda s: (0, 0)),
                  pl.BlockSpec((1, N), lambda s: (0, 0)),
                  pl.BlockSpec((1, N), lambda s: (0, 0)),
                  pl.BlockSpec((1, N), lambda s: (0, 0))],
        out_specs=pl.BlockSpec((1, L, N), lambda s: (s, 0, 0)),
        compiler_params=pltpu.CompilerParams(
            dimension_semantics=("parallel",),
            vmem_limit_bytes=48 * 1024 * 1024),
    )(xr, pe2,
      p['ln1_g'].reshape(1, N), p['ln1_b'].reshape(1, N),
      p['in_proj_wT'], p['in_proj_b'].reshape(1, 3 * N),
      p['out_proj_wT'], p['out_proj_b'].reshape(1, N),
      p['ln2_g'].reshape(1, N), p['ln2_b'].reshape(1, N))
    return y.reshape(S, B, K, N).transpose(1, 3, 2, 0)             # (B, N, K, S)


# ---------------------- fused mask-multiply + decoder matmul ---------------------------

def _mask_mm_kernel(s_ref, e_ref, w_ref, o_ref):
    masked = (s_ref[0] * e_ref[...]).astype(jnp.bfloat16)
    o_ref[0] = jnp.dot(masked, w_ref[...], preferred_element_type=jnp.float32)


def decoder_masked(s_all, e, w_mat, b):
    """mask-multiply + ConvTranspose1d(E->M, kernel k, stride k//2) for ALL speakers.

    s_all:(C,B,E,T) masks, e:(B,E,T) encoder output, w_mat:(E, M*k) bf16, b:(M,)
    -> (C*B, M, Lout).  Mask multiply fused into the matmul kernel; overlap-add via
    two shifted concats."""
    C, B, E, T = s_all.shape
    O = b.shape[0]
    Ok = w_mat.shape[1]
    k = Ok // O
    rows = B * T
    s_rows = s_all.transpose(0, 1, 3, 2).reshape(C, rows, E)
    e_rows = e.transpose(0, 2, 1).reshape(rows, E)
    TM = rows if rows <= _ROW_TILE else _ROW_TILE
    contrib = pl.pallas_call(
        _mask_mm_kernel,
        out_shape=jax.ShapeDtypeStruct((C, rows, Ok), jnp.float32),
        grid=(C, pl.cdiv(rows, TM)),
        in_specs=[pl.BlockSpec((1, TM, E), lambda c, i: (c, i, 0)),
                  pl.BlockSpec((TM, E), lambda c, i: (i, 0)),
                  pl.BlockSpec((E, Ok), lambda c, i: (0, 0))],
        out_specs=pl.BlockSpec((1, TM, Ok), lambda c, i: (c, i, 0)),
        compiler_params=pltpu.CompilerParams(
            dimension_semantics=("parallel", "parallel")),
    )(s_rows, e_rows, w_mat)
    if k == 1:
        y = contrib + b[None, None, :]
        return y.reshape(C * B, T, O).transpose(0, 2, 1)
    assert k % 2 == 0  # TODO(synk): odd kernel_size with stride k//2 not implemented
    st = k // 2
    contrib = contrib.reshape(C * B, T, O, 2, st)
    z = jnp.zeros((C * B, 1, O, st), jnp.float32)
    frames = (jnp.concatenate([contrib[:, :, :, 0, :], z], axis=1)
              + jnp.concatenate([z, contrib[:, :, :, 1, :]], axis=1))      # (CB,T+1,O,st)
    out = frames.transpose(0, 2, 1, 3).reshape(C * B, O, (T + 1) * st)
    return out + b[None, :, None]


# ---------------------- BiLSTM (both directions, bf16 gates/outputs) -------------------

def _bilstm_kernel(xp_ref, whf_ref, whb_ref, o_ref, *, hidden):
    """xp_ref:(K, TBS, 8H) bf16 = [fwd gates | bwd gates]; o_ref:(K, TBS, 2H) bf16."""
    K, TBS, _ = xp_ref.shape
    H = hidden
    whf = whf_ref[...]                 # (H, 4H) bf16
    whb = whb_ref[...]

    def cell(gates, c):
        i = jax.nn.sigmoid(gates[:, 0:H])
        f = jax.nn.sigmoid(gates[:, H:2 * H])
        g = jnp.tanh(gates[:, 2 * H:3 * H])
        o = jax.nn.sigmoid(gates[:, 3 * H:4 * H])
        c = f * c + i * g
        return o * jnp.tanh(c), c

    def step(t, carry):
        hf, cf, hb, cb = carry
        tb = K - 1 - t
        gf = (xp_ref[t, :, pl.ds(0, 4 * H)].astype(jnp.float32)
              + jnp.dot(hf.astype(jnp.bfloat16), whf, preferred_element_type=jnp.float32))
        hf, cf = cell(gf, cf)
        o_ref[t, :, pl.ds(0, H)] = hf.astype(o_ref.dtype)
        gb = (xp_ref[tb, :, pl.ds(4 * H, 4 * H)].astype(jnp.float32)
              + jnp.dot(hb.astype(jnp.bfloat16), whb, preferred_element_type=jnp.float32))
        hb, cb = cell(gb, cb)
        o_ref[tb, :, pl.ds(H, H)] = hb.astype(o_ref.dtype)
        return hf, cf, hb, cb

    z = jnp.zeros((TBS, H), jnp.float32)
    jax.lax.fori_loop(0, K, step, (z, z, z, z), unroll=(K if K <= 16 else 4))


def pallas_bilstm_time_major(xp, w_hh_f_T, w_hh_b_T, hidden):
    """xp:(K, BS, 8H) bf16 pre-projected gates.  Returns (K, BS, 2H) bf16 = [fwd | bwd]."""
    K, BS, _ = xp.shape
    H = hidden
    TBS = BS if BS <= 128 else 128     # feed the MXU a full 128-row tile where possible
    grid = pl.cdiv(BS, TBS)
    # TODO(synk): stream the time axis via emit_pipeline for very long K on v7x (64 MiB VMEM).
    return pl.pallas_call(
        functools.partial(_bilstm_kernel, hidden=H),
        out_shape=jax.ShapeDtypeStruct((K, BS, 2 * H), jnp.bfloat16),
        grid=(grid,),
        in_specs=[pl.BlockSpec((K, TBS, 8 * H), lambda i: (0, i, 0)),
                  pl.BlockSpec((H, 4 * H), lambda i: (0, 0)),
                  pl.BlockSpec((H, 4 * H), lambda i: (0, 0))],
        out_specs=pl.BlockSpec((K, TBS, 2 * H), lambda i: (0, i, 0)),
        compiler_params=pltpu.CompilerParams(
            dimension_semantics=("parallel",),
            vmem_limit_bytes=48 * 1024 * 1024),
    )(xp, w_hh_f_T, w_hh_b_T)


# --------------------------------------------------------------------------------------
# Glue: framing / segmentation / overlap-add, conv <-> matmul plumbing, module structure
# --------------------------------------------------------------------------------------

def framing(x, length):
    B, L = x.shape
    P = length // 2
    gap = length - (P + L % length) % length
    if gap > 0:
        x = jnp.concatenate([x, jnp.zeros((B, gap), x.dtype)], axis=1)
    pad = jnp.zeros((B, P), x.dtype)
    x = jnp.concatenate([pad, x, pad], axis=1)
    x1 = x[:, :-P].reshape(B, -1, length)
    x2 = x[:, P:].reshape(B, -1, length)
    x = jnp.concatenate([x1, x2], axis=2).reshape(B, -1, length).transpose(0, 2, 1)
    return x, gap


def segmentation(x, length):
    B, C, L = x.shape
    P = length // 2
    gap = length - (P + L % length) % length
    if gap > 0:
        x = jnp.concatenate([x, jnp.zeros((B, C, gap), x.dtype)], axis=2)
    pad = jnp.zeros((B, C, P), x.dtype)
    x = jnp.concatenate([pad, x, pad], axis=2)
    x1 = x[:, :, :-P].reshape(B, C, -1, length)
    x2 = x[:, :, P:].reshape(B, C, -1, length)
    x = jnp.concatenate([x1, x2], axis=3).reshape(B, C, -1, length).transpose(0, 1, 3, 2)
    return x, gap


def over_add_3d(x, gap):
    B, N, K, S = x.shape
    P = K // 2
    x = x.transpose(0, 1, 3, 2).reshape(B, N, -1, K * 2)
    x1 = x[:, :, :, :K].reshape(B, N, -1)[:, :, P:]
    x2 = x[:, :, :, K:].reshape(B, N, -1)[:, :, :-P]
    x = x1 + x2
    if gap > 0:
        x = x[:, :, :-gap]
    return x


def over_add_2d(x, gap):
    B, K, S = x.shape
    P = K // 2
    x = x.transpose(0, 2, 1).reshape(B, -1, K * 2)
    x1 = x[:, :, :K].reshape(B, -1)[:, P:]
    x2 = x[:, :, K:].reshape(B, -1)[:, :-P]
    x = x1 + x2
    if gap > 0:
        x = x[:, :-gap]
    return x


def encoder(x, w_mat, b):
    """Conv1d(M->E, kernel k, stride k//2) + ReLU.  w_mat:(Cin*k, Cout) bf16."""
    B, Cin, Lin = x.shape
    Cout = w_mat.shape[1]
    k = w_mat.shape[0] // Cin
    if k == 1:
        y = pallas_matmul(x.transpose(0, 2, 1).reshape(B * Lin, Cin), w_mat, b, act="relu")
        return y.reshape(B, Lin, Cout).transpose(0, 2, 1)
    assert k % 2 == 0  # TODO(synk): odd kernel_size with stride k//2 not implemented
    st = k // 2
    Lf = Lin // st
    xf = x[:, :, :Lf * st].reshape(B, Cin, Lf, st)
    cols = jnp.concatenate([xf[:, :, :-1, :], xf[:, :, 1:, :]], axis=-1)   # (B,Cin,T,k)
    T = Lf - 1
    cols = cols.transpose(0, 2, 1, 3).reshape(B * T, Cin * k)
    y = pallas_matmul(cols, w_mat, b, act="relu")
    return y.reshape(B, T, Cout).transpose(0, 2, 1)


def conv1d_block(x, w_mat, b):
    """Conv1d with kernel==stride, no padding.  w_mat:(C*k, O) bf16."""
    Bn, C, Kl = x.shape
    O = w_mat.shape[1]
    k = w_mat.shape[0] // C
    if k == 1:
        y = pallas_matmul(x.transpose(0, 2, 1).reshape(Bn * Kl, C), w_mat, b)
        return y.reshape(Bn, Kl, O).transpose(0, 2, 1)
    T = Kl // k
    xp = x[:, :, :T * k].reshape(Bn, C, T, k).transpose(0, 2, 1, 3).reshape(Bn * T, C * k)
    y = pallas_matmul(xp, w_mat, b)
    return y.reshape(Bn, T, O).transpose(0, 2, 1)


def convtrans1d_block(x, w_mat, b):
    """ConvTranspose1d with kernel==stride.  w_mat:(C, O*k) bf16."""
    Bn, C, T = x.shape
    Ok = w_mat.shape[1]
    O = b.shape[0]
    if Ok == O:                        # kernel == 1
        y = pallas_matmul(x.transpose(0, 2, 1).reshape(Bn * T, C), w_mat, b)
        return y.reshape(Bn, T, O).transpose(0, 2, 1)
    k = Ok // O
    y = pallas_matmul(x.transpose(0, 2, 1).reshape(Bn * T, C), w_mat, jnp.repeat(b, k))
    return y.reshape(Bn, T, O, k).transpose(0, 2, 1, 3).reshape(Bn, O, T * k)


def build_pe(max_len, d_model):
    position = jnp.arange(max_len, dtype=jnp.float32)[:, None]
    div_term = jnp.exp(jnp.arange(0, d_model, 2, dtype=jnp.float32)
                       * (-math.log(10000.0) / d_model))
    pe = jnp.zeros((max_len, d_model), jnp.float32)
    pe = pe.at[:, 0::2].set(jnp.sin(position * div_term))
    pe = pe.at[:, 1::2].set(jnp.cos(position * div_term))
    return pe


def locally_recurrent(x, p):
    B, N, K, S = x.shape
    H = p['w_hh_f_T'].shape[0]
    # time-major layout (K, B*S, N): dynamic timestep index hits the untiled leading axis.
    xr = x.transpose(2, 0, 3, 1).reshape(K, B * S, N)
    # single fused input projection for both directions, bf16 gates (TODO(synk): torch
    # LSTM's separate b_ih/b_hh are modelled as one combined bias per direction)
    xp = pallas_matmul(xr.reshape(K * B * S, N), p['w_ih_cat'], p['b_cat'],
                       out_dtype=jnp.bfloat16).reshape(K, B * S, 8 * H)
    h = pallas_bilstm_time_major(xp, p['w_hh_f_T'], p['w_hh_b_T'], H)      # (K, BS, 2H) bf16
    # fused Linear + residual + LayerNorm
    y = pallas_mm_res_ln(h.reshape(K * B * S, 2 * H), p['lin_wT'], p['lin_b'],
                         xr.reshape(K * B * S, N), p['ln_g'], p['ln_b'])
    return y.reshape(K, B, S, N).transpose(1, 3, 0, 2)


def sandglasset_block(x, p, pe, num_heads):
    B, N, K, S = x.shape
    x = locally_recurrent(x, p['lr'])
    xr = x.transpose(0, 3, 1, 2).reshape(B * S, N, K)
    xr = conv1d_block(xr, p['conv_w_mat'], p['conv_b'])
    Kp = xr.shape[-1]
    x = xr.reshape(B, S, N, Kp).transpose(0, 2, 3, 1)            # (B, N, Kp, S)
    x = globally_attentive(x, p['ga'], pe, num_heads)
    xr = x.transpose(0, 3, 1, 2).reshape(B * S, N, Kp)
    xr = convtrans1d_block(xr, p['convt_w_mat'], p['convt_b'])
    Kb = xr.shape[-1]
    return xr.reshape(B, S, N, Kb).transpose(0, 2, 3, 1)


def separation(x, p, pe, spk, cycle, Kseg, num_heads):
    B, Ein, T = x.shape
    # fused LayerNorm + Linear
    xr = pallas_ln_mm(x.transpose(0, 2, 1).reshape(B * T, Ein),
                      p['ln_g'], p['ln_b'], p['lin_wT'], p['lin_b'])
    D = xr.shape[-1]
    xs = xr.reshape(B, T, D).transpose(0, 2, 1)
    xs, gap = segmentation(xs, Kseg)                             # (B, D, K, S)
    residual = []
    for i in range(cycle):
        xs = sandglasset_block(xs, p['blocks'][i], pe, num_heads)
        if i < cycle // 2:
            residual.append(xs)
        else:
            xs = xs + residual[cycle - i - 1]
    a = p['prelu_a']
    xs = jnp.where(xs > 0, xs, a * xs)                           # PReLU (shared slope)
    Bx, Dx, Kx, Sx = xs.shape
    y = pallas_matmul(xs.transpose(0, 2, 3, 1).reshape(Bx * Kx * Sx, Dx),
                      p['conv2d_wT'], p['conv2d_b'])             # 1x1 Conv2d D -> spk*E
    y = y.reshape(Bx, Kx, Sx, -1).transpose(0, 3, 1, 2)          # (B, spk*E, K, S)
    y = y.reshape(Bx * spk, Ein, Kx, Sx)
    y = over_add_3d(y, gap)                                      # (B*spk, E, T)
    y = y.reshape(Bx, spk, Ein, -1)
    y = jnp.maximum(y, 0.0)
    return y.transpose(1, 0, 2, 3)                               # (spk, B, E, T)


def sandglasset_forward(x, params, cfg):
    Mwin, Kseg, Ncyc, J, C = cfg['M'], cfg['K'], cfg['N'], cfg['J'], cfg['C']
    pe = params['pe']
    B = x.shape[0]
    xf, gap_f = framing(x, Mwin)                                 # (B, M, S_f)
    e = encoder(xf, params['enc_w_mat'], params['enc_b'])        # (B, E, T)
    s = separation(e, params['sep'], pe, C, Ncyc, Kseg, J)       # (C, B, E, T)
    # mask application + decode for all speakers in one fused batched matmul
    dec = decoder_masked(s, e, params['dec_w_mat'], params['dec_b'])   # (C*B, M, Ldec)
    audio = over_add_2d(dec, gap_f)                              # (C*B, L)
    return audio.reshape(C, B, -1).transpose(1, 0, 2)            # (B, C, L)


# --------------------------------------------------------------------------------------
# Deterministic parameter initialization.  Weights are stored once in the compute layout
# (pre-transposed, bf16 for MXU operands); a torch checkpoint would be mapped the same way.
# --------------------------------------------------------------------------------------

def init_params(key, cfg):
    M, E, ks, D, Ncyc, H, J, C = (cfg['M'], cfg['E'], cfg['kernel_size'], cfg['D'],
                                  cfg['N'], cfg['H'], cfg['J'], cfg['C'])
    keys = iter(jax.random.split(key, 512))

    def nrm(shape, scale=0.1):
        return jax.random.normal(next(keys), shape, dtype=jnp.float32) * scale

    bf16 = lambda a: a.astype(jnp.bfloat16)
    ones = lambda s: jnp.ones(s, jnp.float32)
    zeros = lambda s: jnp.zeros(s, jnp.float32)

    def lr_params():
        w_ih_f, w_ih_b = nrm((4 * H, D)), nrm((4 * H, D))
        return dict(
            w_ih_cat=bf16(jnp.concatenate([w_ih_f, w_ih_b], axis=0).T),       # (D, 8H)
            b_cat=jnp.concatenate([nrm((4 * H,), 0.02), nrm((4 * H,), 0.02)]),
            w_hh_f_T=bf16(nrm((4 * H, H)).T),                                  # (H, 4H)
            w_hh_b_T=bf16(nrm((4 * H, H)).T),
            lin_wT=bf16(nrm((D, 2 * H)).T), lin_b=nrm((D,), 0.02),             # (2H, D)
            ln_g=ones((D,)), ln_b=zeros((D,)))

    def ga_params():
        return dict(ln1_g=ones((D,)), ln1_b=zeros((D,)),
                    in_proj_wT=bf16(nrm((3 * D, D)).T), in_proj_b=nrm((3 * D,), 0.02),
                    out_proj_wT=bf16(nrm((D, D)).T), out_proj_b=nrm((D,), 0.02),
                    ln2_g=ones((D,)), ln2_b=zeros((D,)))

    kernel_sizes = [4 ** i if i < Ncyc // 2 else 4 ** (Ncyc - i - 1) for i in range(Ncyc)]
    blocks = []
    for k in kernel_sizes:
        blocks.append(dict(
            lr=lr_params(),
            conv_w_mat=bf16(nrm((D, D, k)).reshape(D, D * k).T), conv_b=nrm((D,), 0.02),
            ga=ga_params(),
            convt_w_mat=bf16(nrm((D, D, k)).reshape(D, D * k)), convt_b=nrm((D,), 0.02)))

    sep = dict(ln_g=ones((E,)), ln_b=zeros((E,)),
               lin_wT=bf16(nrm((D, E)).T), lin_b=nrm((D,), 0.02),
               blocks=blocks,
               prelu_a=jnp.float32(0.25),
               conv2d_wT=bf16(nrm((C * E, D)).T), conv2d_b=nrm((C * E,), 0.02))

    return dict(enc_w_mat=bf16(nrm((E, M, ks)).reshape(E, M * ks).T), enc_b=nrm((E,), 0.02),
                dec_w_mat=bf16(nrm((E, M, ks)).reshape(E, M * ks)), dec_b=nrm((M,), 0.02),
                sep=sep,
                pe=build_pe(8000, D))


# --------------------------------------------------------------------------------------

if __name__ == "__main__":
    # Small but structurally faithful config: M=4, E=16, D=16, chunk K=8, N(cycle)=4,
    # H=8, J=4 heads, C=2 speakers.  Blocks get kernel/stride = [1, 4, 4, 1].
    cfg = dict(M=4, E=16, kernel_size=4, D=16, K=8, N=4, H=8, J=4, C=2)
    key = jax.random.PRNGKey(0)
    k_in, k_par = jax.random.split(key)

    B, L = 2, 32
    x = jax.random.normal(k_in, (B, L), dtype=jnp.float32)
    params = init_params(k_par, cfg)

    fwd = jax.jit(functools.partial(sandglasset_forward, cfg=cfg))
    audio = jax.block_until_ready(fwd(x, params))

    assert audio.shape == (B, cfg['C'], L), audio.shape
    assert bool(jnp.all(jnp.isfinite(audio)))
    print("KERNEL_OK")
</pallas_src>

<mosaic_0001>
module attributes {stable_mosaic.version = 11 : i64} {
  func.func @_mm_kernel(%arg0: i32, %arg1: memref<16x16xf32, #tpu.memory_space<vmem>>, %arg2: memref<16x16xbf16, #tpu.memory_space<vmem>>, %arg3: memref<1x16xf32, #tpu.memory_space<vmem>>, %arg4: memref<16x16xf32, #tpu.memory_space<vmem>>) attributes {dimension_semantics = [#tpu.dimension_semantics<parallel>], iteration_bounds = array<i64: 1>, scalar_prefetch = 0 : i64, scratch_operands = 0 : i64, tpu.core_type = #tpu.core_type<tc>, window_params = [{transform_indices = @transform_0, window_bounds = array<i64: 16, 16>}, {pipeline_mode = #tpu.pipeline_mode<synchronous>, transform_indices = @transform_1, window_bounds = array<i64: 16, 16>}, {pipeline_mode = #tpu.pipeline_mode<synchronous>, transform_indices = @transform_2, window_bounds = array<i64: 1, 16>}, {transform_indices = @transform_3, window_bounds = array<i64: 16, 16>}]} {
    %c0 = arith.constant 0 : index
    %c0_0 = arith.constant 0 : index
    %0 = vector.load %arg1[%c0, %c0_0] : memref<16x16xf32, #tpu.memory_space<vmem>>, vector<16x16xf32>
    %1 = arith.truncf %0 : vector<16x16xf32> to vector<16x16xbf16>
    %c0_1 = arith.constant 0 : index
    %c0_2 = arith.constant 0 : index
    %2 = vector.load %arg2[%c0_1, %c0_2] : memref<16x16xbf16, #tpu.memory_space<vmem>>, vector<16x16xbf16>
    %cst = arith.constant dense<0.000000e+00> : vector<16x16xf32>
    %3 = tpu.matmul %1, %2, %cst {dimension_numbers = #tpu.dot_dimension_numbers<[1], [0], [0], [1], [0, 0, 1, 1], [], []>} : vector<16x16xbf16>, vector<16x16xbf16>, vector<16x16xf32> -> vector<16x16xf32>
    %c0_3 = arith.constant 0 : index
    %c0_4 = arith.constant 0 : index
    %4 = vector.load %arg3[%c0_3, %c0_4] : memref<1x16xf32, #tpu.memory_space<vmem>>, vector<1x16xf32>
    %5 = vector.broadcast %4 : vector<1x16xf32> to vector<16x16xf32>
    %6 = arith.addf %3, %5 : vector<16x16xf32>
    %cst_5 = arith.constant 0.000000e+00 : f32
    %7 = vector.broadcast %cst_5 : f32 to vector<16x16xf32>
    %8 = arith.maximumf %6, %7 : vector<16x16xf32>
    %c0_6 = arith.constant 0 : index
    %c0_7 = arith.constant 0 : index
    %9 = vector.load %arg4[%c0_6, %c0_7] : memref<16x16xf32, #tpu.memory_space<vmem>>, vector<16x16xf32>
    tpu.vector_store %arg4[%c0_6, %c0_7], %8 {strides = array<i32>} : memref<16x16xf32, #tpu.memory_space<vmem>>, vector<16x16xf32>,
    return
  }
  func.func @transform_0(%arg0: i32) -> (i32, i32) {
    %c0_i32 = arith.constant 0 : i32
    %c0_i32_0 = arith.constant 0 : i32
    return %arg0, %c0_i32 : i32, i32
  }
  func.func @transform_1(%arg0: i32) -> (i32, i32) {
    %c0_i32 = arith.constant 0 : i32
    %c0_i32_0 = arith.constant 0 : i32
    %c0_i32_1 = arith.constant 0 : i32
    return %c0_i32, %c0_i32_0 : i32, i32
  }
  func.func @transform_2(%arg0: i32) -> (i32, i32) {
    %c0_i32 = arith.constant 0 : i32
    %c0_i32_0 = arith.constant 0 : i32
    %c0_i32_1 = arith.constant 0 : i32
    return %c0_i32, %c0_i32_0 : i32, i32
  }
  func.func @transform_3(%arg0: i32) -> (i32, i32) {
    %c0_i32 = arith.constant 0 : i32
    %c0_i32_0 = arith.constant 0 : i32
    return %arg0, %c0_i32 : i32, i32
  }
}

module attributes {stable_mosaic.version = 11 : i64} {
  func.func @_ln_mm_kernel(%arg0: i32, %arg1: memref<16x16xf32, #tpu.memory_space<vmem>>, %arg2: memref<1x16xf32, #tpu.memory_space<vmem>>, %arg3: memref<1x16xf32, #tpu.memory_space<vmem>>, %arg4: memref<16x16xbf16, #tpu.memory_space<vmem>>, %arg5: memref<1x16xf32, #tpu.memory_space<vmem>>, %arg6: memref<16x16xf32, #tpu.memory_space<vmem>>) attributes {dimension_semantics = [#tpu.dimension_semantics<parallel>], iteration_bounds = array<i64: 1>, scalar_prefetch = 0 : i64, scratch_operands = 0 : i64, tpu.core_type = #tpu.core_type<tc>, window_params = [{transform_indices = @transform_0, window_bounds = array<i64: 16, 16>}, {pipeline_mode = #tpu.pipeline_mode<synchronous>, transform_indices = @transform_1, window_bounds = array<i64: 1, 16>}, {pipeline_mode = #tpu.pipeline_mode<synchronous>, transform_indices = @transform_2, window_bounds = array<i64: 1, 16>}, {pipeline_mode = #tpu.pipeline_mode<synchronous>, transform_indices = @transform_3, window_bounds = array<i64: 16, 16>}, {pipeline_mode = #tpu.pipeline_mode<synchronous>, transform_indices = @transform_4, window_bounds = array<i64: 1, 16>}, {transform_indices = @transform_5, window_bounds = array<i64: 16, 16>}]} {
    %c0 = arith.constant 0 : index
    %c0_0 = arith.constant 0 : index
    %0 = vector.load %arg1[%c0, %c0_0] : memref<16x16xf32, #tpu.memory_space<vmem>>, vector<16x16xf32>
    %c0_1 = arith.constant 0 : index
    %c0_2 = arith.constant 0 : index
    %1 = vector.load %arg2[%c0_1, %c0_2] : memref<1x16xf32, #tpu.memory_space<vmem>>, vector<1x16xf32>
    %c0_3 = arith.constant 0 : index
    %c0_4 = arith.constant 0 : index
    %2 = vector.load %arg3[%c0_3, %c0_4] : memref<1x16xf32, #tpu.memory_space<vmem>>, vector<1x16xf32>
    %cst = arith.constant dense<0.000000e+00> : vector<16xf32>
    %3 = vector.multi_reduction <add>, %0, %cst [1] : vector<16x16xf32> to vector<16xf32>
    %4 = vector.shape_cast %3 : vector<16xf32> to vector<16x1xf32>
    %cst_5 = arith.constant 1.600000e+01 : f32
    %5 = vector.broadcast %cst_5 : f32 to vector<16x1xf32>
    %6 = arith.divf %4, %5 : vector<16x1xf32>
    %7 = vector.broadcast %6 : vector<16x1xf32> to vector<16x16xf32>
    %8 = arith.subf %0, %7 : vector<16x16xf32>
    %9 = arith.mulf %8, %8 : vector<16x16xf32>
    %cst_6 = arith.constant dense<0.000000e+00> : vector<16xf32>
    %10 = vector.multi_reduction <add>, %9, %cst_6 [1] : vector<16x16xf32> to vector<16xf32>
    %11 = vector.shape_cast %10 : vector<16xf32> to vector<16x1xf32>
    %cst_7 = arith.constant 1.600000e+01 : f32
    %12 = vector.broadcast %cst_7 : f32 to vector<16x1xf32>
    %13 = arith.divf %11, %12 : vector<16x1xf32>
    %14 = vector.broadcast %6 : vector<16x1xf32> to vector<16x16xf32>
    %15 = arith.subf %0, %14 : vector<16x16xf32>
    %cst_8 = arith.constant 9.99999974E-6 : f32
    %16 = vector.broadcast %cst_8 : f32 to vector<16x1xf32>
    %17 = arith.addf %13, %16 : vector<16x1xf32>
    %18 = math.rsqrt %17 : vector<16x1xf32>
    %19 = vector.broadcast %18 : vector<16x1xf32> to vector<16x16xf32>
    %20 = arith.mulf %15, %19 : vector<16x16xf32>
    %21 = vector.broadcast %1 : vector<1x16xf32> to vector<16x16xf32>
    %22 = arith.mulf %20, %21 : vector<16x16xf32>
    %23 = vector.broadcast %2 : vector<1x16xf32> to vector<16x16xf32>
    %24 = arith.addf %22, %23 : vector<16x16xf32>
    %25 = arith.truncf %24 : vector<16x16xf32> to vector<16x16xbf16>
    %c0_9 = arith.constant 0 : index
    %c0_10 = arith.constant 0 : index
    %26 = vector.load %arg4[%c0_9, %c0_10] : memref<16x16xbf16, #tpu.memory_space<vmem>>, vector<16x16xbf16>
    %cst_11 = arith.constant dense<0.000000e+00> : vector<16x16xf32>
    %27 = tpu.matmul %25, %26, %cst_11 {dimension_numbers = #tpu.dot_dimension_numbers<[1], [0], [0], [1], [0, 0, 1, 1], [], []>} : vector<16x16xbf16>, vector<16x16xbf16>, vector<16x16xf32> -> vector<16x16xf32>
    %c0_12 = arith.constant 0 : index
    %c0_13 = arith.constant 0 : index
    %28 = vector.load %arg5[%c0_12, %c0_13] : memref<1x16xf32, #tpu.memory_space<vmem>>, vector<1x16xf32>
    %29 = vector.broadcast %28 : vector<1x16xf32> to vector<16x16xf32>
    %30 = arith.addf %27, %29 : vector<16x16xf32>
    %c0_14 = arith.constant 0 : index
    %c0_15 = arith.constant 0 : index
    %31 = vector.load %arg6[%c0_14, %c0_15] : memref<16x16xf32, #tpu.memory_space<vmem>>, vector<16x16xf32>
    tpu.vector_store %arg6[%c0_14, %c0_15], %30 {strides = array<i32>} : memref<16x16xf32, #tpu.memory_space<vmem>>, vector<16x16xf32>,
    return
  }
  func.func @transform_0(%arg0: i32) -> (i32, i32) {
    %c0_i32 = arith.constant 0 : i32
    %c0_i32_0 = arith.constant 0 : i32
    return %arg0, %c0_i32 : i32, i32
  }
  func.func @transform_1(%arg0: i32) -> (i32, i32) {
    %c0_i32 = arith.constant 0 : i32
    %c0_i32_0 = arith.constant 0 : i32
    %c0_i32_1 = arith.constant 0 : i32
    return %c0_i32, %c0_i32_0 : i32, i32
  }
  func.func @transform_2(%arg0: i32) -> (i32, i32) {
    %c0_i32 = arith.constant 0 : i32
    %c0_i32_0 = arith.constant 0 : i32
    %c0_i32_1 = arith.constant 0 : i32
    return %c0_i32, %c0_i32_0 : i32, i32
  }
  func.func @transform_3(%arg0: i32) -> (i32, i32) {
    %c0_i32 = arith.constant 0 : i32
    %c0_i32_0 = arith.constant 0 : i32
    %c0_i32_1 = arith.constant 0 : i32
    return %c0_i32, %c0_i32_0 : i32, i32
  }
  func.func @transform_4(%arg0: i32) -> (i32, i32) {
    %c0_i32 = arith.constant 0 : i32
    %c0_i32_0 = arith.constant 0 : i32
    %c0_i32_1 = arith.constant 0 : i32
    return %c0_i32, %c0_i32_0 : i32, i32
  }
  func.func @transform_5(%arg0: i32) -> (i32, i32) {
    %c0_i32 = arith.constant 0 : i32
    %c0_i32_0 = arith.constant 0 : i32
    return %arg0, %c0_i32 : i32, i32
  }
}

module attributes {stable_mosaic.version = 11 : i64} {
  func.func @_mm_kernel(%arg0: i32, %arg1: memref<64x16xf32, #tpu.memory_space<vmem>>, %arg2: memref<16x64xbf16, #tpu.memory_space<vmem>>, %arg3: memref<1x64xf32, #tpu.memory_space<vmem>>, %arg4: memref<64x64xbf16, #tpu.memory_space<vmem>>) attributes {dimension_semantics = [#tpu.dimension_semantics<parallel>], iteration_bounds = array<i64: 1>, scalar_prefetch = 0 : i64, scratch_operands = 0 : i64, tpu.core_type = #tpu.core_type<tc>, window_params = [{transform_indices = @transform_0, window_bounds = array<i64: 64, 16>}, {pipeline_mode = #tpu.pipeline_mode<synchronous>, transform_indices = @transform_1, window_bounds = array<i64: 16, 64>}, {pipeline_mode = #tpu.pipeline_mode<synchronous>, transform_indices = @transform_2, window_bounds = array<i64: 1, 64>}, {transform_indices = @transform_3, window_bounds = array<i64: 64, 64>}]} {
    %c0 = arith.constant 0 : index
    %c0_0 = arith.constant 0 : index
    %0 = vector.load %arg1[%c0, %c0_0] : memref<64x16xf32, #tpu.memory_space<vmem>>, vector<64x16xf32>
    %1 = arith.truncf %0 : vector<64x16xf32> to vector<64x16xbf16>
    %c0_1 = arith.constant 0 : index
    %c0_2 = arith.constant 0 : index
    %2 = vector.load %arg2[%c0_1, %c0_2] : memref<16x64xbf16, #tpu.memory_space<vmem>>, vector<16x64xbf16>
    %cst = arith.constant dense<0.000000e+00> : vector<64x64xf32>
    %3 = tpu.matmul %1, %2, %cst {dimension_numbers = #tpu.dot_dimension_numbers<[1], [0], [0], [1], [0, 0, 1, 1], [], []>} : vector<64x16xbf16>, vector<16x64xbf16>, vector<64x64xf32> -> vector<64x64xf32>
    %c0_3 = arith.constant 0 : index
    %c0_4 = arith.constant 0 : index
    %4 = vector.load %arg3[%c0_3, %c0_4] : memref<1x64xf32, #tpu.memory_space<vmem>>, vector<1x64xf32>
    %5 = vector.broadcast %4 : vector<1x64xf32> to vector<64x64xf32>
    %6 = arith.addf %3, %5 : vector<64x64xf32>
    %7 = arith.truncf %6 : vector<64x64xf32> to vector<64x64xbf16>
    %c0_5 = arith.constant 0 : index
    %c0_6 = arith.constant 0 : index
    %8 = vector.load %arg4[%c0_5, %c0_6] : memref<64x64xbf16, #tpu.memory_space<vmem>>, vector<64x64xbf16>
    tpu.vector_store %arg4[%c0_5, %c0_6], %7 {strides = array<i32>} : memref<64x64xbf16, #tpu.memory_space<vmem>>, vector<64x64xbf16>,
    return
  }
  func.func @transform_0(%arg0: i32) -> (i32, i32) {
    %c0_i32 = arith.constant 0 : i32
    %c0_i32_0 = arith.constant 0 : i32
    return %arg0, %c0_i32 : i32, i32
  }
  func.func @transform_1(%arg0: i32) -> (i32, i32) {
    %c0_i32 = arith.constant 0 : i32
    %c0_i32_0 = arith.constant 0 : i32
    %c0_i32_1 = arith.constant 0 : i32
    return %c0_i32, %c0_i32_0 : i32, i32
  }
  func.func @transform_2(%arg0: i32) -> (i32, i32) {
    %c0_i32 = arith.constant 0 : i32
    %c0_i32_0 = arith.constant 0 : i32
    %c0_i32_1 = arith.constant 0 : i32
    return %c0_i32, %c0_i32_0 : i32, i32
  }
  func.func @transform_3(%arg0: i32) -> (i32, i32) {
    %c0_i32 = arith.constant 0 : i32
    %c0_i32_0 = arith.constant 0 : i32
    return %arg0, %c0_i32 : i32, i32
  }
}

module attributes {stable_mosaic.version = 11 : i64} {
  func.func @_bilstm_kernel(%arg0: i32, %arg1: memref<8x8x64xbf16, #tpu.memory_space<vmem>>, %arg2: memref<8x32xbf16, #tpu.memory_space<vmem>>, %arg3: memref<8x32xbf16, #tpu.memory_space<vmem>>, %arg4: memref<8x8x16xbf16, #tpu.memory_space<vmem>>) attributes {dimension_semantics = [#tpu.dimension_semantics<parallel>], iteration_bounds = array<i64: 1>, scalar_prefetch = 0 : i64, scratch_operands = 0 : i64, tpu.core_type = #tpu.core_type<tc>, window_params = [{transform_indices = @transform_0, window_bounds = array<i64: 8, 8, 64>}, {pipeline_mode = #tpu.pipeline_mode<synchronous>, transform_indices = @transform_1, window_bounds = array<i64: 8, 32>}, {pipeline_mode = #tpu.pipeline_mode<synchronous>, transform_indices = @transform_2, window_bounds = array<i64: 8, 32>}, {transform_indices = @transform_3, window_bounds = array<i64: 8, 8, 16>}]} {
    %c0 = arith.constant 0 : index
    %c0_0 = arith.constant 0 : index
    %0 = vector.load %arg2[%c0, %c0_0] : memref<8x32xbf16, #tpu.memory_space<vmem>>, vector<8x32xbf16>
    %c0_1 = arith.constant 0 : index
    %c0_2 = arith.constant 0 : index
    %1 = vector.load %arg3[%c0_1, %c0_2] : memref<8x32xbf16, #tpu.memory_space<vmem>>, vector<8x32xbf16>
    %cst = arith.constant 0.000000e+00 : f32
    %2 = vector.broadcast %cst : f32 to vector<8x8xf32>
    %c0_i32 = arith.constant 0 : i32
    %c7_i32 = arith.constant 7 : i32
    %3 = arith.subi %c7_i32, %c0_i32 : i32
    %4 = arith.index_cast %c0_i32 : i32 to index
    %c0_3 = arith.constant 0 : index
    %c0_4 = arith.constant 0 : index
    %5 = vector.load %arg1[%4, %c0_3, %c0_4] : memref<8x8x64xbf16, #tpu.memory_space<vmem>>, vector<1x8x32xbf16>
    %6 = vector.shape_cast %5 : vector<1x8x32xbf16> to vector<8x32xbf16>
    %7 = arith.extf %6 : vector<8x32xbf16> to vector<8x32xf32>
    %8 = arith.truncf %2 : vector<8x8xf32> to vector<8x8xbf16>
    %cst_5 = arith.constant dense<0.000000e+00> : vector<8x32xf32>
    %9 = tpu.matmul %8, %0, %cst_5 {dimension_numbers = #tpu.dot_dimension_numbers<[1], [0], [0], [1], [0, 0, 1, 1], [], []>} : vector<8x8xbf16>, vector<8x32xbf16>, vector<8x32xf32> -> vector<8x32xf32>
    %10 = arith.addf %7, %9 : vector<8x32xf32>
    %11 = vector.extract_strided_slice %10 {offsets = [0, 0], sizes = [8, 8], strides = [1, 1]} : vector<8x32xf32> to vector<8x8xf32>
    %12 = arith.negf %11 : vector<8x8xf32>
    %13 = math.exp %12 : vector<8x8xf32>
    %cst_6 = arith.constant 1.000000e+00 : f32
    %14 = vector.broadcast %cst_6 : f32 to vector<8x8xf32>
    %15 = arith.addf %14, %13 : vector<8x8xf32>
    %16 = arith.divf %14, %15 : vector<8x8xf32>
    %17 = vector.extract_strided_slice %10 {offsets = [0, 8], sizes = [8, 8], strides = [1, 1]} : vector<8x32xf32> to vector<8x8xf32>
    %18 = arith.negf %17 : vector<8x8xf32>
    %19 = math.exp %18 : vector<8x8xf32>
    %cst_7 = arith.constant 1.000000e+00 : f32
    %20 = vector.broadcast %cst_7 : f32 to vector<8x8xf32>
    %21 = arith.addf %20, %19 : vector<8x8xf32>
    %22 = arith.divf %20, %21 : vector<8x8xf32>
    %23 = vector.extract_strided_slice %10 {offsets = [0, 16], sizes = [8, 8], strides = [1, 1]} : vector<8x32xf32> to vector<8x8xf32>
    %24 = math.tanh %23 : vector<8x8xf32>
    %25 = vector.extract_strided_slice %10 {offsets = [0, 24], sizes = [8, 8], strides = [1, 1]} : vector<8x32xf32> to vector<8x8xf32>
    %26 = arith.negf %25 : vector<8x8xf32>
    %27 = math.exp %26 : vector<8x8xf32>
    %cst_8 = arith.constant 1.000000e+00 : f32
    %28 = vector.broadcast %cst_8 : f32 to vector<8x8xf32>
    %29 = arith.addf %28, %27 : vector<8x8xf32>
    %30 = arith.divf %28, %29 : vector<8x8xf32>
    %31 = arith.mulf %22, %2 : vector<8x8xf32>
    %32 = arith.mulf %16, %24 : vector<8x8xf32>
    %33 = arith.addf %31, %32 : vector<8x8xf32>
    %34 = math.tanh %33 : vector<8x8xf32>
    %35 = arith.mulf %30, %34 : vector<8x8xf32>
    %36 = arith.truncf %35 : vector<8x8xf32> to vector<8x8xbf16>
    %37 = arith.index_cast %c0_i32 : i32 to index
    %c0_9 = arith.constant 0 : index
    %c0_10 = arith.constant 0 : index
    %38 = vector.load %arg4[%37, %c0_9, %c0_10] : memref<8x8x16xbf16, #tpu.memory_space<vmem>>, vector<1x8x8xbf16>
    %39 = vector.shape_cast %38 : vector<1x8x8xbf16> to vector<8x8xbf16>
    %40 = vector.shape_cast %36 : vector<8x8xbf16> to vector<1x8x8xbf16>
    tpu.vector_store %arg4[%37, %c0_9, %c0_10], %40 {strides = array<i32>} : memref<8x8x16xbf16, #tpu.memory_space<vmem>>, vector<1x8x8xbf16>,
    %41 = arith.index_cast %3 : i32 to index
    %c0_11 = arith.constant 0 : index
    %c32 = arith.constant 32 : index
    %42 = vector.load %arg1[%41, %c0_11, %c32] : memref<8x8x64xbf16, #tpu.memory_space<vmem>>, vector<1x8x32xbf16>
    %43 = vector.shape_cast %42 : vector<1x8x32xbf16> to vector<8x32xbf16>
    %44 = arith.extf %43 : vector<8x32xbf16> to vector<8x32xf32>
    %45 = arith.truncf %2 : vector<8x8xf32> to vector<8x8xbf16>
    %cst_12 = arith.constant dense<0.000000e+00> : vector<8x32xf32>
    %46 = tpu.matmul %45, %1, %cst_12 {dimension_numbers = #tpu.dot_dimension_numbers<[1], [0], [0], [1], [0, 0, 1, 1], [], []>} : vector<8x8xbf16>, vector<8x32xbf16>, vector<8x32xf32> -> vector<8x32xf32>
    %47 = arith.addf %44, %46 : vector<8x32xf32>
    %48 = vector.extract_strided_slice %47 {offsets = [0, 0], sizes = [8, 8], strides = [1, 1]} : vector<8x32xf32> to vector<8x8xf32>
    %49 = arith.negf %48 : vector<8x8xf32>
    %50 = math.exp %49 : vector<8x8xf32>
    %cst_13 = arith.constant 1.000000e+00 : f32
    %51 = vector.broadcast %cst_13 : f32 to vector<8x8xf32>
    %52 = arith.addf %51, %50 : vector<8x8xf32>
    %53 = arith.divf %51, %52 : vector<8x8xf32>
    %54 = vector.extract_strided_slice %47 {offsets = [0, 8], sizes = [8, 8], strides = [1, 1]} : vector<8x32xf32> to vector<8x8xf32>
    %55 = arith.negf %54 : vector<8x8xf32>
    %56 = math.exp %55 : vector<8x8xf32>
    %cst_14 = arith.constant 1.000000e+00 : f32
    %57 = vector.broadcast %cst_14 : f32 to vector<8x8xf32>
    %58 = arith.addf %57, %56 : vector<8x8xf32>
    %59 = arith.divf %57, %58 : vector<8x8xf32>
    %60 = vector.extract_strided_slice %47 {offsets = [0, 16], sizes = [8, 8], strides = [1, 1]} : vector<8x32xf32> to vector<8x8xf32>
    %61 = math.tanh %60 : vector<8x8xf32>
    %62 = vector.extract_strided_slice %47 {offsets = [0, 24], sizes = [8, 8], strides = [1, 1]} : vector<8x32xf32> to vector<8x8xf32>
    %63 = arith.negf %62 : vector<8x8xf32>
    %64 = math.exp %63 : vector<8x8xf32>
    %cst_15 = arith.constant 1.000000e+00 : f32
    %65 = vector.broadcast %cst_15 : f32 to vector<8x8xf32>
    %66 = arith.addf %65, %64 : vector<8x8xf32>
    %67 = arith.divf %65, %66 : vector<8x8xf32>
    %68 = arith.mulf %59, %2 : vector<8x8xf32>
    %69 = arith.mulf %53, %61 : vector<8x8xf32>
    %70 = arith.addf %68, %69 : vector<8x8xf32>
    %71 = math.tanh %70 : vector<8x8xf32>
    %72 = arith.mulf %67, %71 : vector<8x8xf32>
    %73 = arith.truncf %72 : vector<8x8xf32> to vector<8x8xbf16>
    %74 = arith.index_cast %3 : i32 to index
    %c0_16 = arith.constant 0 : index
    %c8 = arith.constant 8 : index
    %75 = vector.load %arg4[%74, %c0_16, %c8] : memref<8x8x16xbf16, #tpu.memory_space<vmem>>, vector<1x8x8xbf16>
    %76 = vector.shape_cast %75 : vector<1x8x8xbf16> to vector<8x8xbf16>
    %77 = vector.shape_cast %73 : vector<8x8xbf16> to vector<1x8x8xbf16>
    tpu.vector_store %arg4[%74, %c0_16, %c8], %77 {strides = array<i32>} : memref<8x8x16xbf16, #tpu.memory_space<vmem>>, vector<1x8x8xbf16>,
    %c1_i32 = arith.constant 1 : i32
    %c7_i32_17 = arith.constant 7 : i32
    %78 = arith.subi %c7_i32_17, %c1_i32 : i32
    %79 = arith.index_cast %c1_i32 : i32 to index
    %c0_18 = arith.constant 0 : index
    %c0_19 = arith.constant 0 : index
    %80 = vector.load %arg1[%79, %c0_18, %c0_19] : memref<8x8x64xbf16, #tpu.memory_space<vmem>>, vector<1x8x32xbf16>
    %81 = vector.shape_cast %80 : vector<1x8x32xbf16> to vector<8x32xbf16>
    %82 = arith.extf %81 : vector<8x32xbf16> to vector<8x32xf32>
    %83 = arith.truncf %35 : vector<8x8xf32> to vector<8x8xbf16>
    %cst_20 = arith.constant dense<0.000000e+00> : vector<8x32xf32>
    %84 = tpu.matmul %83, %0, %cst_20 {dimension_numbers = #tpu.dot_dimension_numbers<[1], [0], [0], [1], [0, 0, 1, 1], [], []>} : vector<8x8xbf16>, vector<8x32xbf16>, vector<8x32xf32> -> vector<8x32xf32>
    %85 = arith.addf %82, %84 : vector<8x32xf32>
    %86 = vector.extract_strided_slice %85 {offsets = [0, 0], sizes = [8, 8], strides = [1, 1]} : vector<8x32xf32> to vector<8x8xf32>
    %87 = arith.negf %86 : vector<8x8xf32>
    %88 = math.exp %87 : vector<8x8xf32>
    %cst_21 = arith.constant 1.000000e+00 : f32
    %89 = vector.broadcast %cst_21 : f32 to vector<8x8xf32>
    %90 = arith.addf %89, %88 : vector<8x8xf32>
    %91 = arith.divf %89, %90 : vector<8x8xf32>
    %92 = vector.extract_strided_slice %85 {offsets = [0, 8], sizes = [8, 8], strides = [1, 1]} : vector<8x32xf32> to vector<8x8xf32>
    %93 = arith.negf %92 : vector<8x8xf32>
    %94 = math.exp %93 : vector<8x8xf32>
    %cst_22 = arith.constant 1.000000e+00 : f32
    %95 = vector.broadcast %cst_22 : f32 to vector<8x8xf32>
    %96 = arith.addf %95, %94 : vector<8x8xf32>
    %97 = arith.divf %95, %96 : vector<8x8xf32>
    %98 = vector.extract_strided_slice %85 {offsets = [0, 16], sizes = [8, 8], strides = [1, 1]} : vector<8x32xf32> to vector<8x8xf32>
    %99 = math.tanh %98 : vector<8x8xf32>
    %100 = vector.extract_strided_slice %85 {offsets = [0, 24], sizes = [8, 8], strides = [1, 1]} : vector<8x32xf32> to vector<8x8xf32>
    %101 = arith.negf %100 : vector<8x8xf32>
    %102 = math.exp %101 : vector<8x8xf32>
    %cst_23 = arith.constant 1.000000e+00 : f32
    %103 = vector.broadcast %cst_23 : f32 to vector<8x8xf32>
    %104 = arith.addf %103, %102 : vector<8x8xf32>
    %105 = arith.divf %103, %104 : vector<8x8xf32>
    %106 = arith.mulf %97, %33 : vector<8x8xf32>
    %107 = arith.mulf %91, %99 : vector<8x8xf32>
    %108 = arith.addf %106, %107 : vector<8x8xf32>
    %109 = math.tanh %108 : vector<8x8xf32>
    %110 = arith.mulf %105, %109 : vector<8x8xf32>
    %111 = arith.truncf %110 : vector<8x8xf32> to vector<8x8xbf16>
    %112 = arith.index_cast %c1_i32 : i32 to index
    %c0_24 = arith.constant 0 : index
    %c0_25 = arith.constant 0 : index
    %113 = vector.load %arg4[%112, %c0_24, %c0_25] : memref<8x8x16xbf16, #tpu.memory_space<vmem>>, vector<1x8x8xbf16>
    %114 = vector.shape_cast %113 : vector<1x8x8xbf16> to vector<8x8xbf16>
    %115 = vector.shape_cast %111 : vector<8x8xbf16> to vector<1x8x8xbf16>
    tpu.vector_store %arg4[%112, %c0_24, %c0_25], %115 {strides = array<i32>} : memref<8x8x16xbf16, #tpu.memory_space<vmem>>, vector<1x8x8xbf16>,
    %116 = arith.index_cast %78 : i32 to index
    %c0_26 = arith.constant 0 : index
    %c32_27 = arith.constant 32 : index
    %117 = vector.load %arg1[%116, %c0_26, %c32_27] : memref<8x8x64xbf16, #tpu.memory_space<vmem>>, vector<1x8x32xbf16>
    %118 = vector.shape_cast %117 : vector<1x8x32xbf16> to vector<8x32xbf16>
    %119 = arith.extf %118 : vector<8x32xbf16> to vector<8x32xf32>
    %120 = arith.truncf %72 : vector<8x8xf32> to vector<8x8xbf16>
    %cst_28 = arith.constant dense<0.000000e+00> : vector<8x32xf32>
    %121 = tpu.matmul %120, %1, %cst_28 {dimension_numbers = #tpu.dot_dimension_numbers<[1], [0], [0], [1], [0, 0, 1, 1], [], []>} : vector<8x8xbf16>, vector<8x32xbf16>, vector<8x32xf32> -> vector<8x32xf32>
    %122 = arith.addf %119, %121 : vector<8x32xf32>
    %123 = vector.extract_strided_slice %122 {offsets = [0, 0], sizes = [8, 8], strides = [1, 1]} : vector<8x32xf32> to vector<8x8xf32>
    %124 = arith.negf %123 : vector<8x8xf32>
    %125 = math.exp %124 : vector<8x8xf32>
    %cst_29 = arith.constant 1.000000e+00 : f32
    %126 = vector.broadcast %cst_29 : f32 to vector<8x8xf32>
    %127 = arith.addf %126, %125 : vector<8x8xf32>
    %128 = arith.divf %126, %127 : vector<8x8xf32>
    %129 = vector.extract_strided_slice %122 {offsets = [0, 8], sizes = [8, 8], strides = [1, 1]} : vector<8x32xf32> to vector<8x8xf32>
    %130 = arith.negf %129 : vector<8x8xf32>
    %131 = math.exp %130 : vector<8x8xf32>
    %cst_30 = arith.constant 1.000000e+00 : f32
    %132 = vector.broadcast %cst_30 : f32 to vector<8x8xf32>
    %133 = arith.addf %132, %131 : vector<8x8xf32>
    %134 = arith.divf %132, %133 : vector<8x8xf32>
    %135 = vector.extract_strided_slice %122 {offsets = [0, 16], sizes = [8, 8], strides = [1, 1]} : vector<8x32xf32> to vector<8x8xf32>
    %136 = math.tanh %135 : vector<8x8xf32>
    %137 = vector.extract_strided_slice %122 {offsets = [0, 24], sizes = [8, 8], strides = [1, 1]} : vector<8x32xf32> to vector<8x8xf32>
    %138 = arith.negf %137 : vector<8x8xf32>
    %139 = math.exp %138 : vector<8x8xf32>
    %cst_31 = arith.constant 1.000000e+00 : f32
    %140 = vector.broadcast %cst_31 : f32 to vector<8x8xf32>
    %141 = arith.addf %140, %139 : vector<8x8xf32>
    %142 = arith.divf %140, %141 : vector<8x8xf32>
    %143 = arith.mulf %134, %70 : vector<8x8xf32>
    %144 = arith.mulf %128, %136 : vector<8x8xf32>
    %145 = arith.addf %143, %144 : vector<8x8xf32>
    %146 = math.tanh %145 : vector<8x8xf32>
    %147 = arith.mulf %142, %146 : vector<8x8xf32>
    %148 = arith.truncf %147 : vector<8x8xf32> to vector<8x8xbf16>
    %149 = arith.index_cast %78 : i32 to index
    %c0_32 = arith.constant 0 : index
    %c8_33 = arith.constant 8 : index
    %150 = vector.load %arg4[%149, %c0_32, %c8_33] : memref<8x8x16xbf16, #tpu.memory_space<vmem>>, vector<1x8x8xbf16>
    %151 = vector.shape_cast %150 : vector<1x8x8xbf16> to vector<8x8xbf16>
    %152 = vector.shape_cast %148 : vector<8x8xbf16> to vector<1x8x8xbf16>
    tpu.vector_store %arg4[%149, %c0_32, %c8_33], %152 {strides = array<i32>} : memref<8x8x16xbf16, #tpu.memory_space<vmem>>, vector<1x8x8xbf16>,
    %c2_i32 = arith.constant 2 : i32
    %c7_i32_34 = arith.constant 7 : i32
    %153 = arith.subi %c7_i32_34, %c2_i32 : i32
    %154 = arith.index_cast %c2_i32 : i32 to index
    %c0_35 = arith.constant 0 : index
    %c0_36 = arith.constant 0 : index
    %155 = vector.load %arg1[%154, %c0_35, %c0_36] : memref<8x8x64xbf16, #tpu.memory_space<vmem>>, vector<1x8x32xbf16>
    %156 = vector.shape_cast %155 : vector<1x8x32xbf16> to vector<8x32xbf16>
    %157 = arith.extf %156 : vector<8x32xbf16> to vector<8x32xf32>
    %158 = arith.truncf %110 : vector<8x8xf32> to vector<8x8xbf16>
    %cst_37 = arith.constant dense<0.000000e+00> : vector<8x32xf32>
    %159 = tpu.matmul %158, %0, %cst_37 {dimension_numbers = #tpu.dot_dimension_numbers<[1], [0], [0], [1], [0, 0, 1, 1], [], []>} : vector<8x8xbf16>, vector<8x32xbf16>, vector<8x32xf32> -> vector<8x32xf32>
    %160 = arith.addf %157, %159 : vector<8x32xf32>
    %161 = vector.extract_strided_slice %160 {offsets = [0, 0], sizes = [8, 8], strides = [1, 1]} : vector<8x32xf32> to vector<8x8xf32>
    %162 = arith.negf %161 : vector<8x8xf32>
    %163 = math.exp %162 : vector<8x8xf32>
    %cst_38 = arith.constant 1.000000e+00 : f32
    %164 = vector.broadcast %cst_38 : f32 to vector<8x8xf32>
    %165 = arith.addf %164, %163 : vector<8x8xf32>
    %166 = arith.divf %164, %165 : vector<8x8xf32>
    %167 = vector.extract_strided_slice %160 {offsets = [0, 8], sizes = [8, 8], strides = [1, 1]} : vector<8x32xf32> to vector<8x8xf32>
    %168 = arith.negf %167 : vector<8x8xf32>
    %169 = math.exp %168 : vector<8x8xf32>
    %cst_39 = arith.constant 1.000000e+00 : f32
    %170 = vector.broadcast %cst_39 : f32 to vector<8x8xf32>
    %171 = arith.addf %170, %169 : vector<8x8xf32>
    %172 = arith.divf %170, %171 : vector<8x8xf32>
    %173 = vector.extract_strided_slice %160 {offsets = [0, 16], sizes = [8, 8], strides = [1, 1]} : vector<8x32xf32> to vector<8x8xf32>
    %174 = math.tanh %173 : vector<8x8xf32>
    %175 = vector.extract_strided_slice %160 {offsets = [0, 24], sizes = [8, 8], strides = [1, 1]} : vector<8x32xf32> to vector<8x8xf32>
    %176 = arith.negf %175 : vector<8x8xf32>
    %177 = math.exp %176 : vector<8x8xf32>
    %cst_40 = arith.constant 1.000000e+00 : f32
    %178 = vector.broadcast %cst_40 : f32 to vector<8x8xf32>
    %179 = arith.addf %178, %177 : vector<8x8xf32>
    %180 = arith.divf %178, %179 : vector<8x8xf32>
    %181 = arith.mulf %172, %108 : vector<8x8xf32>
    %182 = arith.mulf %166, %174 : vector<8x8xf32>
    %183 = arith.addf %181, %182 : vector<8x8xf32>
    %184 = math.tanh %183 : vector<8x8xf32>
    %185 = arith.mulf %180, %184 : vector<8x8xf32>
    %186 = arith.truncf %185 : vector<8x8xf32> to vector<8x8xbf16>
    %187 = arith.index_cast %c2_i32 : i32 to index
    %c0_41 = arith.constant 0 : index
    %c0_42 = arith.constant 0 : index
    %188 = vector.load %arg4[%187, %c0_41, %c0_42] : memref<8x8x16xbf16, #tpu.memory_space<vmem>>, vector<1x8x8xbf16>
    %189 = vector.shape_cast %188 : vector<1x8x8xbf16> to vector<8x8xbf16>
    %190 = vector.shape_cast %186 : vector<8x8xbf16> to vector<1x8x8xbf16>
    tpu.vector_store %arg4[%187, %c0_41, %c0_42], %190 {strides = array<i32>} : memref<8x8x16xbf16, #tpu.memory_space<vmem>>, vector<1x8x8xbf16>,
    %191 = arith.index_cast %153 : i32 to index
    %c0_43 = arith.constant 0 : index
    %c32_44 = arith.constant 32 : index
    %192 = vector.load %arg1[%191, %c0_43, %c32_44] : memref<8x8x64xbf16, #tpu.memory_space<vmem>>, vector<1x8x32xbf16>
    %193 = vector.shape_cast %192 : vector<1x8x32xbf16> to vector<8x32xbf16>
    %194 = arith.extf %193 : vector<8x32xbf16> to vector<8x32xf32>
    %195 = arith.truncf %147 : vector<8x8xf32> to vector<8x8xbf16>
    %cst_45 = arith.constant dense<0.000000e+00> : vector<8x32xf32>
    %196 = tpu.matmul %195, %1, %cst_45 {dimension_numbers = #tpu.dot_dimension_numbers<[1], [0], [0], [1], [0, 0, 1, 1], [], []>} : vector<8x8xbf16>, vector<8x32xbf16>, vector<8x32xf32> -> vector<8x32xf32>
    %197 = arith.addf %194, %196 : vector<8x32xf32>
    %198 = vector.extract_strided_slice %197 {offsets = [0, 0], sizes = [8, 8], strides = [1, 1]} : vector<8x32xf32> to vector<8x8xf32>
    %199 = arith.negf %198 : vector<8x8xf32>
    %200 = math.exp %199 : vector<8x8xf32>
    %cst_46 = arith.constant 1.000000e+00 : f32
    %201 = vector.broadcast %cst_46 : f32 to vector<8x8xf32>
    %202 = arith.addf %201, %200 : vector<8x8xf32>
    %203 = arith.divf %201, %202 : vector<8x8xf32>
    %204 = vector.extract_strided_slice %197 {offsets = [0, 8], sizes = [8, 8], strides = [1, 1]} : vector<8x32xf32> to vector<8x8xf32>
    %205 = arith.negf %204 : vector<8x8xf32>
    %206 = math.exp %205 : vector<8x8xf32>
    %cst_47 = arith.constant 1.000000e+00 : f32
    %207 = vector.broadcast %cst_47 : f32 to vector<8x8xf32>
    %208 = arith.addf %207, %206 : vector<8x8xf32>
    %209 = arith.divf %207, %208 : vector<8x8xf32>
    %210 = vector.extract_strided_slice %197 {offsets = [0, 16], sizes = [8, 8], strides = [1, 1]} : vector<8x32xf32> to vector<8x8xf32>
    %211 = math.tanh %210 : vector<8x8xf32>
    %212 = vector.extract_strided_slice %197 {offsets = [0, 24], sizes = [8, 8], strides = [1, 1]} : vector<8x32xf32> to vector<8x8xf32>
    %213 = arith.negf %212 : vector<8x8xf32>
    %214 = math.exp %213 : vector<8x8xf32>
    %cst_48 = arith.constant 1.000000e+00 : f32
    %215 = vector.broadcast %cst_48 : f32 to vector<8x8xf32>
    %216 = arith.addf %215, %214 : vector<8x8xf32>
    %217 = arith.divf %215, %216 : vector<8x8xf32>
    %218 = arith.mulf %209, %145 : vector<8x8xf32>
    %219 = arith.mulf %203, %211 : vector<8x8xf32>
    %220 = arith.addf %218, %219 : vector<8x8xf32>
    %221 = math.tanh %220 : vector<8x8xf32>
    %222 = arith.mulf %217, %221 : vector<8x8xf32>
    %223 = arith.truncf %222 : vector<8x8xf32> to vector<8x8xbf16>
    %224 = arith.index_cast %153 : i32 to index
    %c0_49 = arith.constant 0 : index
    %c8_50 = arith.constant 8 : index
    %225 = vector.load %arg4[%224, %c0_49, %c8_50] : memref<8x8x16xbf16, #tpu.memory_space<vmem>>, vector<1x8x8xbf16>
    %226 = vector.shape_cast %225 : vector<1x8x8xbf16> to vector<8x8xbf16>
    %227 = vector.shape_cast %223 : vector<8x8xbf16> to vector<1x8x8xbf16>
    tpu.vector_store %arg4[%224, %c0_49, %c8_50], %227 {strides = array<i32>} : memref<8x8x16xbf16, #tpu.memory_space<vmem>>, vector<1x8x8xbf16>,
    %c3_i32 = arith.constant 3 : i32
    %c7_i32_51 = arith.constant 7 : i32
    %228 = arith.subi %c7_i32_51, %c3_i32 : i32
    %229 = arith.index_cast %c3_i32 : i32 to index
    %c0_52 = arith.constant 0 : index
    %c0_53 = arith.constant 0 : index
    %230 = vector.load %arg1[%229, %c0_52, %c0_53] : memref<8x8x64xbf16, #tpu.memory_space<vmem>>, vector<1x8x32xbf16>
    %231 = vector.shape_cast %230 : vector<1x8x32xbf16> to vector<8x32xbf16>
    %232 = arith.extf %231 : vector<8x32xbf16> to vector<8x32xf32>
    %233 = arith.truncf %185 : vector<8x8xf32> to vector<8x8xbf16>
    %cst_54 = arith.constant dense<0.000000e+00> : vector<8x32xf32>
    %234 = tpu.matmul %233, %0, %cst_54 {dimension_numbers = #tpu.dot_dimension_numbers<[1], [0], [0], [1], [0, 0, 1, 1], [], []>} : vector<8x8xbf16>, vector<8x32xbf16>, vector<8x32xf32> -> vector<8x32xf32>
    %235 = arith.addf %232, %234 : vector<8x32xf32>
    %236 = vector.extract_strided_slice %235 {offsets = [0, 0], sizes = [8, 8], strides = [1, 1]} : vector<8x32xf32> to vector<8x8xf32>
    %237 = arith.negf %236 : vector<8x8xf32>
    %238 = math.exp %237 : vector<8x8xf32>
    %cst_55 = arith.constant 1.000000e+00 : f32
    %239 = vector.broadcast %cst_55 : f32 to vector<8x8xf32>
    %240 = arith.addf %239, %238 : vector<8x8xf32>
    %241 = arith.divf %239, %240 : vector<8x8xf32>
    %242 = vector.extract_strided_slice %235 {offsets = [0, 8], sizes = [8, 8], strides = [1, 1]} : vector<8x32xf32> to vector<8x8xf32>
    %243 = arith.negf %242 : vector<8x8xf32>
    %244 = math.exp %243 : vector<8x8xf32>
    %cst_56 = arith.constant 1.000000e+00 : f32
    %245 = vector.broadcast %cst_56 : f32 to vector<8x8xf32>
    %246 = arith.addf %245, %244 : vector<8x8xf32>
    %247 = arith.divf %245, %246 : vector<8x8xf32>
    %248 = vector.extract_strided_slice %235 {offsets = [0, 16], sizes = [8, 8], strides = [1, 1]} : vector<8x32xf32> to vector<8x8xf32>
    %249 = math.tanh %248 : vector<8x8xf32>
    %250 = vector.extract_strided_slice %235 {offsets = [0, 24], sizes = [8, 8], strides = [1, 1]} : vector<8x32xf32> to vector<8x8xf32>
    %251 = arith.negf %250 : vector<8x8xf32>
    %252 = math.exp %251 : vector<8x8xf32>
    %cst_57 = arith.constant 1.000000e+00 : f32
    %253 = vector.broadcast %cst_57 : f32 to vector<8x8xf32>
    %254 = arith.addf %253, %252 : vector<8x8xf32>
    %255 = arith.divf %253, %254 : vector<8x8xf32>
    %256 = arith.mulf %247, %183 : vector<8x8xf32>
    %257 = arith.mulf %241, %249 : vector<8x8xf32>
    %258 = arith.addf %256, %257 : vector<8x8xf32>
    %259 = math.tanh %258 : vector<8x8xf32>
    %260 = arith.mulf %255, %259 : vector<8x8xf32>
    %261 = arith.truncf %260 : vector<8x8xf32> to vector<8x8xbf16>
    %262 = arith.index_cast %c3_i32 : i32 to index
    %c0_58 = arith.constant 0 : index
    %c0_59 = arith.constant 0 : index
    %263 = vector.load %arg4[%262, %c0_58, %c0_59] : memref<8x8x16xbf16, #tpu.memory_space<vmem>>, vector<1x8x8xbf16>
    %264 = vector.shape_cast %263 : vector<1x8x8xbf16> to vector<8x8xbf16>
    %265 = vector.shape_cast %261 : vector<8x8xbf16> to vector<1x8x8xbf16>
    tpu.vector_store %arg4[%262, %c0_58, %c0_59], %265 {strides = array<i32>} : memref<8x8x16xbf16, #tpu.memory_space<vmem>>, vector<1x8x8xbf16>,
    %266 = arith.index_cast %228 : i32 to index
    %c0_60 = arith.constant 0 : index
    %c32_61 = arith.constant 32 : index
    %267 = vector.load %arg1[%266, %c0_60, %c32_61] : memref<8x8x64xbf16, #tpu.memory_space<vmem>>, vector<1x8x32xbf16>
    %268 = vector.shape_cast %267 : vector<1x8x32xbf16> to vector<8x32xbf16>
    %269 = arith.extf %268 : vector<8x32xbf16> to vector<8x32xf32>
    %270 = arith.truncf %222 : vector<8x8xf32> to vector<8x8xbf16>
    %cst_62 = arith.constant dense<0.000000e+00> : vector<8x32xf32>
    %271 = tpu.matmul %270, %1, %cst_62 {dimension_numbers = #tpu.dot_dimension_numbers<[1], [0], [0], [1], [0, 0, 1, 1], [], []>} : vector<8x8xbf16>, vector<8x32xbf16>, vector<8x32xf32> -> vector<8x32xf32>
    %272 = arith.addf %269, %271 : vector<8x32xf32>
    %273 = vector.extract_strided_slice %272 {offsets = [0, 0], sizes = [8, 8], strides = [1, 1]} : vector<8x32xf32> to vector<8x8xf32>
    %274 = arith.negf %273 : vector<8x8xf32>
    %275 = math.exp %274 : vector<8x8xf32>
    %cst_63 = arith.constant 1.000000e+00 : f32
    %276 = vector.broadcast %cst_63 : f32 to vector<8x8xf32>
    %277 = arith.addf %276, %275 : vector<8x8xf32>
    %278 = arith.divf %276, %277 : vector<8x8xf32>
    %279 = vector.extract_strided_slice %272 {offsets = [0, 8], sizes = [8, 8], strides = [1, 1]} : vector<8x32xf32> to vector<8x8xf32>
    %280 = arith.negf %279 : vector<8x8xf32>
    %281 = math.exp %280 : vector<8x8xf32>
    %cst_64 = arith.constant 1.000000e+00 : f32
    %282 = vector.broadcast %cst_64 : f32 to vector<8x8xf32>
    %283 = arith.addf %282, %281 : vector<8x8xf32>
    %284 = arith.divf %282, %283 : vector<8x8xf32>
    %285 = vector.extract_strided_slice %272 {offsets = [0, 16], sizes = [8, 8], strides = [1, 1]} : vector<8x32xf32> to vector<8x8xf32>
    %286 = math.tanh %285 : vector<8x8xf32>
    %287 = vector.extract_strided_slice %272 {offsets = [0, 24], sizes = [8, 8], strides = [1, 1]} : vector<8x32xf32> to vector<8x8xf32>
    %288 = arith.negf %287 : vector<8x8xf32>
    %289 = math.exp %288 : vector<8x8xf32>
    %cst_65 = arith.constant 1.000000e+00 : f32
    %290 = vector.broadcast %cst_65 : f32 to vector<8x8xf32>
    %291 = arith.addf %290, %289 : vector<8x8xf32>
    %292 = arith.divf %290, %291 : vector<8x8xf32>
    %293 = arith.mulf %284, %220 : vector<8x8xf32>
    %294 = arith.mulf %278, %286 : vector<8x8xf32>
    %295 = arith.addf %293, %294 : vector<8x8xf32>
    %296 = math.tanh %295 : vector<8x8xf32>
    %297 = arith.mulf %292, %296 : vector<8x8xf32>
    %298 = arith.truncf %297 : vector<8x8xf32> to vector<8x8xbf16>
    %299 = arith.index_cast %228 : i32 to index
    %c0_66 = arith.constant 0 : index
    %c8_67 = arith.constant 8 : index
    %300 = vector.load %arg4[%299, %c0_66, %c8_67] : memref<8x8x16xbf16, #tpu.memory_space<vmem>>, vector<1x8x8xbf16>
    %301 = vector.shape_cast %300 : vector<1x8x8xbf16> to vector<8x8xbf16>
    %302 = vector.shape_cast %298 : vector<8x8xbf16> to vector<1x8x8xbf16>
    tpu.vector_store %arg4[%299, %c0_66, %c8_67], %302 {strides = array<i32>} : memref<8x8x16xbf16, #tpu.memory_space<vmem>>, vector<1x8x8xbf16>,
    %c4_i32 = arith.constant 4 : i32
    %c7_i32_68 = arith.constant 7 : i32
    %303 = arith.subi %c7_i32_68, %c4_i32 : i32
    %304 = arith.index_cast %c4_i32 : i32 to index
    %c0_69 = arith.constant 0 : index
    %c0_70 = arith.constant 0 : index
    %305 = vector.load %arg1[%304, %c0_69, %c0_70] : memref<8x8x64xbf16, #tpu.memory_space<vmem>>, vector<1x8x32xbf16>
    %306 = vector.shape_cast %305 : vector<1x8x32xbf16> to vector<8x32xbf16>
    %307 = arith.extf %306 : vector<8x32xbf16> to vector<8x32xf32>
    %308 = arith.truncf %260 : vector<8x8xf32> to vector<8x8xbf16>
    %cst_71 = arith.constant dense<0.000000e+00> : vector<8x32xf32>
    %309 = tpu.matmul %308, %0, %cst_71 {dimension_numbers = #tpu.dot_dimension_numbers<[1], [0], [0], [1], [0, 0, 1, 1], [], []>} : vector<8x8xbf16>, vector<8x32xbf16>, vector<8x32xf32> -> vector<8x32xf32>
    %310 = arith.addf %307, %309 : vector<8x32xf32>
    %311 = vector.extract_strided_slice %310 {offsets = [0, 0], sizes = [8, 8], strides = [1, 1]} : vector<8x32xf32> to vector<8x8xf32>
    %312 = arith.negf %311 : vector<8x8xf32>
    %313 = math.exp %312 : vector<8x8xf32>
    %cst_72 = arith.constant 1.000000e+00 : f32
    %314 = vector.broadcast %cst_72 : f32 to vector<8x8xf32>
    %315 = arith.addf %314, %313 : vector<8x8xf32>
    %316 = arith.divf %314, %315 : vector<8x8xf32>
    %317 = vector.extract_strided_slice %310 {offsets = [0, 8], sizes = [8, 8], strides = [1, 1]} : vector<8x32xf32> to vector<8x8xf32>
    %318 = arith.negf %317 : vector<8x8xf32>
    %319 = math.exp %318 : vector<8x8xf32>
    %cst_73 = arith.constant 1.000000e+00 : f32
    %320 = vector.broadcast %cst_73 : f32 to vector<8x8xf32>
    %321 = arith.addf %320, %319 : vector<8x8xf32>
    %322 = arith.divf %320, %321 : vector<8x8xf32>
    %323 = vector.extract_strided_slice %310 {offsets = [0, 16], sizes = [8, 8], strides = [1, 1]} : vector<8x32xf32> to vector<8x8xf32>
    %324 = math.tanh %323 : vector<8x8xf32>
    %325 = vector.extract_strided_slice %310 {offsets = [0, 24], sizes = [8, 8], strides = [1, 1]} : vector<8x32xf32> to vector<8x8xf32>
    %326 = arith.negf %325 : vector<8x8xf32>
    %327 = math.exp %326 : vector<8x8xf32>
    %cst_74 = arith.constant 1.000000e+00 : f32
    %328 = vector.broadcast %cst_74 : f32 to vector<8x8xf32>
    %329 = arith.addf %328, %327 : vector<8x8xf32>
    %330 = arith.divf %328, %329 : vector<8x8xf32>
    %331 = arith.mulf %322, %258 : vector<8x8xf32>
    %332 = arith.mulf %316, %324 : vector<8x8xf32>
    %333 = arith.addf %331, %332 : vector<8x8xf32>
    %334 = math.tanh %333 : vector<8x8xf32>
    %335 = arith.mulf %330, %334 : vector<8x8xf32>
    %336 = arith.truncf %335 : vector<8x8xf32> to vector<8x8xbf16>
    %337 = arith.index_cast %c4_i32 : i32 to index
    %c0_75 = arith.constant 0 : index
    %c0_76 = arith.constant 0 : index
    %338 = vector.load %arg4[%337, %c0_75, %c0_76] : memref<8x8x16xbf16, #tpu.memory_space<vmem>>, vector<1x8x8xbf16>
    %339 = vector.shape_cast %338 : vector<1x8x8xbf16> to vector<8x8xbf16>
    %340 = vector.shape_cast %336 : vector<8x8xbf16> to vector<1x8x8xbf16>
    tpu.vector_store %arg4[%337, %c0_75, %c0_76], %340 {strides = array<i32>} : memref<8x8x16xbf16, #tpu.memory_space<vmem>>, vector<1x8x8xbf16>,
    %341 = arith.index_cast %303 : i32 to index
    %c0_77 = arith.constant 0 : index
    %c32_78 = arith.constant 32 : index
    %342 = vector.load %arg1[%341, %c0_77, %c32_78] : memref<8x8x64xbf16, #tpu.memory_space<vmem>>, vector<1x8x32xbf16>
    %343 = vector.shape_cast %342 : vector<1x8x32xbf16> to vector<8x32xbf16>
    %344 = arith.extf %343 : vector<8x32xbf16> to vector<8x32xf32>
    %345 = arith.truncf %297 : vector<8x8xf32> to vector<8x8xbf16>
    %cst_79 = arith.constant dense<0.000000e+00> : vector<8x32xf32>
    %346 = tpu.matmul %345, %1, %cst_79 {dimension_numbers = #tpu.dot_dimension_numbers<[1], [0], [0], [1], [0, 0, 1, 1], [], []>} : vector<8x8xbf16>, vector<8x32xbf16>, vector<8x32xf32> -> vector<8x32xf32>
    %347 = arith.addf %344, %346 : vector<8x32xf32>
    %348 = vector.extract_strided_slice %347 {offsets = [0, 0], sizes = [8, 8], strides = [1, 1]} : vector<8x32xf32> to vector<8x8xf32>
    %349 = arith.negf %348 : vector<8x8xf32>
    %350 = math.exp %349 : vector<8x8xf32>
    %cst_80 = arith.constant 1.000000e+00 : f32
    %351 = vector.broadcast %cst_80 : f32 to vector<8x8xf32>
    %352 = arith.addf %351, %350 : vector<8x8xf32>
    %353 = arith.divf %351, %352 : vector<8x8xf32>
    %354 = vector.extract_strided_slice %347 {offsets = [0, 8], sizes = [8, 8], strides = [1, 1]} : vector<8x32xf32> to vector<8x8xf32>
    %355 = arith.negf %354 : vector<8x8xf32>
    %356 = math.exp %355 : vector<8x8xf32>
    %cst_81 = arith.constant 1.000000e+00 : f32
    %357 = vector.broadcast %cst_81 : f32 to vector<8x8xf32>
    %358 = arith.addf %357, %356 : vector<8x8xf32>
    %359 = arith.divf %357, %358 : vector<8x8xf32>
    %360 = vector.extract_strided_slice %347 {offsets = [0, 16], sizes = [8, 8], strides = [1, 1]} : vector<8x32xf32> to vector<8x8xf32>
    %361 = math.tanh %360 : vector<8x8xf32>
    %362 = vector.extract_strided_slice %347 {offsets = [0, 24], sizes = [8, 8], strides = [1, 1]} : vector<8x32xf32> to vector<8x8xf32>
    %363 = arith.negf %362 : vector<8x8xf32>
    %364 = math.exp %363 : vector<8x8xf32>
    %cst_82 = arith.constant 1.000000e+00 : f32
    %365 = vector.broadcast %cst_82 : f32 to vector<8x8xf32>
    %366 = arith.addf %365, %364 : vector<8x8xf32>
    %367 = arith.divf %365, %366 : vector<8x8xf32>
    %368 = arith.mulf %359, %295 : vector<8x8xf32>
    %369 = arith.mulf %353, %361 : vector<8x8xf32>
    %370 = arith.addf %368, %369 : vector<8x8xf32>
    %371 = math.tanh %370 : vector<8x8xf32>
    %372 = arith.mulf %367, %371 : vector<8x8xf32>
    %373 = arith.truncf %372 : vector<8x8xf32> to vector<8x8xbf16>
    %374 = arith.index_cast %303 : i32 to index
    %c0_83 = arith.constant 0 : index
    %c8_84 = arith.constant 8 : index
    %375 = vector.load %arg4[%374, %c0_83, %c8_84] : memref<8x8x16xbf16, #tpu.memory_space<vmem>>, vector<1x8x8xbf16>
    %376 = vector.shape_cast %375 : vector<1x8x8xbf16> to vector<8x8xbf16>
    %377 = vector.shape_cast %373 : vector<8x8xbf16> to vector<1x8x8xbf16>
    tpu.vector_store %arg4[%374, %c0_83, %c8_84], %377 {strides = array<i32>} : memref<8x8x16xbf16, #tpu.memory_space<vmem>>, vector<1x8x8xbf16>,
    %c5_i32 = arith.constant 5 : i32
    %c7_i32_85 = arith.constant 7 : i32
    %378 = arith.subi %c7_i32_85, %c5_i32 : i32
    %379 = arith.index_cast %c5_i32 : i32 to index
    %c0_86 = arith.constant 0 : index
    %c0_87 = arith.constant 0 : index
    %380 = vector.load %arg1[%379, %c0_86, %c0_87] : memref<8x8x64xbf16, #tpu.memory_space<vmem>>, vector<1x8x32xbf16>
    %381 = vector.shape_cast %380 : vector<1x8x32xbf16> to vector<8x32xbf16>
    %382 = arith.extf %381 : vector<8x32xbf16> to vector<8x32xf32>
    %383 = arith.truncf %335 : vector<8x8xf32> to vector<8x8xbf16>
    %cst_88 = arith.constant dense<0.000000e+00> : vector<8x32xf32>
    %384 = tpu.matmul %383, %0, %cst_88 {dimension_numbers = #tpu.dot_dimension_numbers<[1], [0], [0], [1], [0, 0, 1, 1], [], []>} : vector<8x8xbf16>, vector<8x32xbf16>, vector<8x32xf32> -> vector<8x32xf32>
    %385 = arith.addf %382, %384 : vector<8x32xf32>
    %386 = vector.extract_strided_slice %385 {offsets = [0, 0], sizes = [8, 8], strides = [1, 1]} : vector<8x32xf32> to vector<8x8xf32>
    %387 = arith.negf %386 : vector<8x8xf32>
    %388 = math.exp %387 : vector<8x8xf32>
    %cst_89 = arith.constant 1.000000e+00 : f32
    %389 = vector.broadcast %cst_89 : f32 to vector<8x8xf32>
    %390 = arith.addf %389, %388 : vector<8x8xf32>
    %391 = arith.divf %389, %390 : vector<8x8xf32>
    %392 = vector.extract_strided_slice %385 {offsets = [0, 8], sizes = [8, 8], strides = [1, 1]} : vector<8x32xf32> to vector<8x8xf32>
    %393 = arith.negf %392 : vector<8x8xf32>
    %394 = math.exp %393 : vector<8x8xf32>
    %cst_90 = arith.constant 1.000000e+00 : f32
    %395 = vector.broadcast %cst_90 : f32 to vector<8x8xf32>
    %396 = arith.addf %395, %394 : vector<8x8xf32>
    %397 = arith.divf %395, %396 : vector<8x8xf32>
    %398 = vector.extract_strided_slice %385 {offsets = [0, 16], sizes = [8, 8], strides = [1, 1]} : vector<8x32xf32> to vector<8x8xf32>
    %399 = math.tanh %398 : vector<8x8xf32>
    %400 = vector.extract_strided_slice %385 {offsets = [0, 24], sizes = [8, 8], strides = [1, 1]} : vector<8x32xf32> to vector<8x8xf32>
    %401 = arith.negf %400 : vector<8x8xf32>
    %402 = math.exp %401 : vector<8x8xf32>
    %cst_91 = arith.constant 1.000000e+00 : f32
    %403 = vector.broadcast %cst_91 : f32 to vector<8x8xf32>
    %404 = arith.addf %403, %402 : vector<8x8xf32>
    %405 = arith.divf %403, %404 : vector<8x8xf32>
    %406 = arith.mulf %397, %333 : vector<8x8xf32>
    %407 = arith.mulf %391, %399 : vector<8x8xf32>
    %408 = arith.addf %406, %407 : vector<8x8xf32>
    %409 = math.tanh %408 : vector<8x8xf32>
    %410 = arith.mulf %405, %409 : vector<8x8xf32>
    %411 = arith.truncf %410 : vector<8x8xf32> to vector<8x8xbf16>
    %412 = arith.index_cast %c5_i32 : i32 to index
    %c0_92 = arith.constant 0 : index
    %c0_93 = arith.constant 0 : index
    %413 = vector.load %arg4[%412, %c0_92, %c0_93] : memref<8x8x16xbf16, #tpu.memory_space<vmem>>, vector<1x8x8xbf16>
    %414 = vector.shape_cast %413 : vector<1x8x8xbf16> to vector<8x8xbf16>
    %415 = vector.shape_cast %411 : vector<8x8xbf16> to vector<1x8x8xbf16>
    tpu.vector_store %arg4[%412, %c0_92, %c0_93], %415 {strides = array<i32>} : memref<8x8x16xbf16, #tpu.memory_space<vmem>>, vector<1x8x8xbf16>,
    %416 = arith.index_cast %378 : i32 to index
    %c0_94 = arith.constant 0 : index
    %c32_95 = arith.constant 32 : index
    %417 = vector.load %arg1[%416, %c0_94, %c32_95] : memref<8x8x64xbf16, #tpu.memory_space<vmem>>, vector<1x8x32xbf16>
    %418 = vector.shape_cast %417 : vector<1x8x32xbf16> to vector<8x32xbf16>
    %419 = arith.extf %418 : vector<8x32xbf16> to vector<8x32xf32>
    %420 = arith.truncf %372 : vector<8x8xf32> to vector<8x8xbf16>
    %cst_96 = arith.constant dense<0.000000e+00> : vector<8x32xf32>
    %421 = tpu.matmul %420, %1, %cst_96 {dimension_numbers = #tpu.dot_dimension_numbers<[1], [0], [0], [1], [0, 0, 1, 1], [], []>} : vector<8x8xbf16>, vector<8x32xbf16>, vector<8x32xf32> -> vector<8x32xf32>
    %422 = arith.addf %419, %421 : vector<8x32xf32>
    %423 = vector.extract_strided_slice %422 {offsets = [0, 0], sizes = [8, 8], strides = [1, 1]} : vector<8x32xf32> to vector<8x8xf32>
    %424 = arith.negf %423 : vector<8x8xf32>
    %425 = math.exp %424 : vector<8x8xf32>
    %cst_97 = arith.constant 1.000000e+00 : f32
    %426 = vector.broadcast %cst_97 : f32 to vector<8x8xf32>
    %427 = arith.addf %426, %425 : vector<8x8xf32>
    %428 = arith.divf %426, %427 : vector<8x8xf32>
    %429 = vector.extract_strided_slice %422 {offsets = [0, 8], sizes = [8, 8], strides = [1, 1]} : vector<8x32xf32> to vector<8x8xf32>
    %430 = arith.negf %429 : vector<8x8xf32>
    %431 = math.exp %430 : vector<8x8xf32>
    %cst_98 = arith.constant 1.000000e+00 : f32
    %432 = vector.broadcast %cst_98 : f32 to vector<8x8xf32>
    %433 = arith.addf %432, %431 : vector<8x8xf32>
    %434 = arith.divf %432, %433 : vector<8x8xf32>
    %435 = vector.extract_strided_slice %422 {offsets = [0, 16], sizes = [8, 8], strides = [1, 1]} : vector<8x32xf32> to vector<8x8xf32>
    %436 = math.tanh %435 : vector<8x8xf32>
    %437 = vector.extract_strided_slice %422 {offsets = [0, 24], sizes = [8, 8], strides = [1, 1]} : vector<8x32xf32> to vector<8x8xf32>
    %438 = arith.negf %437 : vector<8x8xf32>
    %439 = math.exp %438 : vector<8x8xf32>
    %cst_99 = arith.constant 1.000000e+00 : f32
    %440 = vector.broadcast %cst_99 : f32 to vector<8x8xf32>
    %441 = arith.addf %440, %439 : vector<8x8xf32>
    %442 = arith.divf %440, %441 : vector<8x8xf32>
    %443 = arith.mulf %434, %370 : vector<8x8xf32>
    %444 = arith.mulf %428, %436 : vector<8x8xf32>
    %445 = arith.addf %443, %444 : vector<8x8xf32>
    %446 = math.tanh %445 : vector<8x8xf32>
    %447 = arith.mulf %442, %446 : vector<8x8xf32>
    %448 = arith.truncf %447 : vector<8x8xf32> to vector<8x8xbf16>
    %449 = arith.index_cast %378 : i32 to index
    %c0_100 = arith.constant 0 : index
    %c8_101 = arith.constant 8 : index
    %450 = vector.load %arg4[%449, %c0_100, %c8_101] : memref<8x8x16xbf16, #tpu.memory_space<vmem>>, vector<1x8x8xbf16>
    %451 = vector.shape_cast %450 : vector<1x8x8xbf16> to vector<8x8xbf16>
    %452 = vector.shape_cast %448 : vector<8x8xbf16> to vector<1x8x8xbf16>
    tpu.vector_store %arg4[%449, %c0_100, %c8_101], %452 {strides = array<i32>} : memref<8x8x16xbf16, #tpu.memory_space<vmem>>, vector<1x8x8xbf16>,
    %c6_i32 = arith.constant 6 : i32
    %c7_i32_102 = arith.constant 7 : i32
    %453 = arith.subi %c7_i32_102, %c6_i32 : i32
    %454 = arith.index_cast %c6_i32 : i32 to index
    %c0_103 = arith.constant 0 : index
    %c0_104 = arith.constant 0 : index
    %455 = vector.load %arg1[%454, %c0_103, %c0_104] : memref<8x8x64xbf16, #tpu.memory_space<vmem>>, vector<1x8x32xbf16>
    %456 = vector.shape_cast %455 : vector<1x8x32xbf16> to vector<8x32xbf16>
    %457 = arith.extf %456 : vector<8x32xbf16> to vector<8x32xf32>
    %458 = arith.truncf %410 : vector<8x8xf32> to vector<8x8xbf16>
    %cst_105 = arith.constant dense<0.000000e+00> : vector<8x32xf32>
    %459 = tpu.matmul %458, %0, %cst_105 {dimension_numbers = #tpu.dot_dimension_numbers<[1], [0], [0], [1], [0, 0, 1, 1], [], []>} : vector<8x8xbf16>, vector<8x32xbf16>, vector<8x32xf32> -> vector<8x32xf32>
    %460 = arith.addf %457, %459 : vector<8x32xf32>
    %461 = vector.extract_strided_slice %460 {offsets = [0, 0], sizes = [8, 8], strides = [1, 1]} : vector<8x32xf32> to vector<8x8xf32>
    %462 = arith.negf %461 : vector<8x8xf32>
    %463 = math.exp %462 : vector<8x8xf32>
    %cst_106 = arith.constant 1.000000e+00 : f32
    %464 = vector.broadcast %cst_106 : f32 to vector<8x8xf32>
    %465 = arith.addf %464, %463 : vector<8x8xf32>
    %466 = arith.divf %464, %465 : vector<8x8xf32>
    %467 = vector.extract_strided_slice %460 {offsets = [0, 8], sizes = [8, 8], strides = [1, 1]} : vector<8x32xf32> to vector<8x8xf32>
    %468 = arith.negf %467 : vector<8x8xf32>
    %469 = math.exp %468 : vector<8x8xf32>
    %cst_107 = arith.constant 1.000000e+00 : f32
    %470 = vector.broadcast %cst_107 : f32 to vector<8x8xf32>
    %471 = arith.addf %470, %469 : vector<8x8xf32>
    %472 = arith.divf %470, %471 : vector<8x8xf32>
    %473 = vector.extract_strided_slice %460 {offsets = [0, 16], sizes = [8, 8], strides = [1, 1]} : vector<8x32xf32> to vector<8x8xf32>
    %474 = math.tanh %473 : vector<8x8xf32>
    %475 = vector.extract_strided_slice %460 {offsets = [0, 24], sizes = [8, 8], strides = [1, 1]} : vector<8x32xf32> to vector<8x8xf32>
    %476 = arith.negf %475 : vector<8x8xf32>
    %477 = math.exp %476 : vector<8x8xf32>
    %cst_108 = arith.constant 1.000000e+00 : f32
    %478 = vector.broadcast %cst_108 : f32 to vector<8x8xf32>
    %479 = arith.addf %478, %477 : vector<8x8xf32>
    %480 = arith.divf %478, %479 : vector<8x8xf32>
    %481 = arith.mulf %472, %408 : vector<8x8xf32>
    %482 = arith.mulf %466, %474 : vector<8x8xf32>
    %483 = arith.addf %481, %482 : vector<8x8xf32>
    %484 = math.tanh %483 : vector<8x8xf32>
    %485 = arith.mulf %480, %484 : vector<8x8xf32>
    %486 = arith.truncf %485 : vector<8x8xf32> to vector<8x8xbf16>
    %487 = arith.index_cast %c6_i32 : i32 to index
    %c0_109 = arith.constant 0 : index
    %c0_110 = arith.constant 0 : index
    %488 = vector.load %arg4[%487, %c0_109, %c0_110] : memref<8x8x16xbf16, #tpu.memory_space<vmem>>, vector<1x8x8xbf16>
    %489 = vector.shape_cast %488 : vector<1x8x8xbf16> to vector<8x8xbf16>
    %490 = vector.shape_cast %486 : vector<8x8xbf16> to vector<1x8x8xbf16>
    tpu.vector_store %arg4[%487, %c0_109, %c0_110], %490 {strides = array<i32>} : memref<8x8x16xbf16, #tpu.memory_space<vmem>>, vector<1x8x8xbf16>,
    %491 = arith.index_cast %453 : i32 to index
    %c0_111 = arith.constant 0 : index
    %c32_112 = arith.constant 32 : index
    %492 = vector.load %arg1[%491, %c0_111, %c32_112] : memref<8x8x64xbf16, #tpu.memory_space<vmem>>, vector<1x8x32xbf16>
    %493 = vector.shape_cast %492 : vector<1x8x32xbf16> to vector<8x32xbf16>
    %494 = arith.extf %493 : vector<8x32xbf16> to vector<8x32xf32>
    %495 = arith.truncf %447 : vector<8x8xf32> to vector<8x8xbf16>
    %cst_113 = arith.constant dense<0.000000e+00> : vector<8x32xf32>
    %496 = tpu.matmul %495, %1, %cst_113 {dimension_numbers = #tpu.dot_dimension_numbers<[1], [0], [0], [1], [0, 0, 1, 1], [], []>} : vector<8x8xbf16>, vector<8x32xbf16>, vector<8x32xf32> -> vector<8x32xf32>
    %497 = arith.addf %494, %496 : vector<8x32xf32>
    %498 = vector.extract_strided_slice %497 {offsets = [0, 0], sizes = [8, 8], strides = [1, 1]} : vector<8x32xf32> to vector<8x8xf32>
    %499 = arith.negf %498 : vector<8x8xf32>
    %500 = math.exp %499 : vector<8x8xf32>
    %cst_114 = arith.constant 1.000000e+00 : f32
    %501 = vector.broadcast %cst_114 : f32 to vector<8x8xf32>
    %502 = arith.addf %501, %500 : vector<8x8xf32>
    %503 = arith.divf %501, %502 : vector<8x8xf32>
    %504 = vector.extract_strided_slice %497 {offsets = [0, 8], sizes = [8, 8], strides = [1, 1]} : vector<8x32xf32> to vector<8x8xf32>
    %505 = arith.negf %504 : vector<8x8xf32>
    %506 = math.exp %505 : vector<8x8xf32>
    %cst_115 = arith.constant 1.000000e+00 : f32
    %507 = vector.broadcast %cst_115 : f32 to vector<8x8xf32>
    %508 = arith.addf %507, %506 : vector<8x8xf32>
    %509 = arith.divf %507, %508 : vector<8x8xf32>
    %510 = vector.extract_strided_slice %497 {offsets = [0, 16], sizes = [8, 8], strides = [1, 1]} : vector<8x32xf32> to vector<8x8xf32>
    %511 = math.tanh %510 : vector<8x8xf32>
    %512 = vector.extract_strided_slice %497 {offsets = [0, 24], sizes = [8, 8], strides = [1, 1]} : vector<8x32xf32> to vector<8x8xf32>
    %513 = arith.negf %512 : vector<8x8xf32>
    %514 = math.exp %513 : vector<8x8xf32>
    %cst_116 = arith.constant 1.000000e+00 : f32
    %515 = vector.broadcast %cst_116 : f32 to vector<8x8xf32>
    %516 = arith.addf %515, %514 : vector<8x8xf32>
    %517 = arith.divf %515, %516 : vector<8x8xf32>
    %518 = arith.mulf %509, %445 : vector<8x8xf32>
    %519 = arith.mulf %503, %511 : vector<8x8xf32>
    %520 = arith.addf %518, %519 : vector<8x8xf32>
    %521 = math.tanh %520 : vector<8x8xf32>
    %522 = arith.mulf %517, %521 : vector<8x8xf32>
    %523 = arith.truncf %522 : vector<8x8xf32> to vector<8x8xbf16>
    %524 = arith.index_cast %453 : i32 to index
    %c0_117 = arith.constant 0 : index
    %c8_118 = arith.constant 8 : index
    %525 = vector.load %arg4[%524, %c0_117, %c8_118] : memref<8x8x16xbf16, #tpu.memory_space<vmem>>, vector<1x8x8xbf16>
    %526 = vector.shape_cast %525 : vector<1x8x8xbf16> to vector<8x8xbf16>
    %527 = vector.shape_cast %523 : vector<8x8xbf16> to vector<1x8x8xbf16>
    tpu.vector_store %arg4[%524, %c0_117, %c8_118], %527 {strides = array<i32>} : memref<8x8x16xbf16, #tpu.memory_space<vmem>>, vector<1x8x8xbf16>,
    %c7_i32_119 = arith.constant 7 : i32
    %c7_i32_120 = arith.constant 7 : i32
    %528 = arith.subi %c7_i32_120, %c7_i32_119 : i32
    %529 = arith.index_cast %c7_i32_119 : i32 to index
    %c0_121 = arith.constant 0 : index
    %c0_122 = arith.constant 0 : index
    %530 = vector.load %arg1[%529, %c0_121, %c0_122] : memref<8x8x64xbf16, #tpu.memory_space<vmem>>, vector<1x8x32xbf16>
    %531 = vector.shape_cast %530 : vector<1x8x32xbf16> to vector<8x32xbf16>
    %532 = arith.extf %531 : vector<8x32xbf16> to vector<8x32xf32>
    %533 = arith.truncf %485 : vector<8x8xf32> to vector<8x8xbf16>
    %cst_123 = arith.constant dense<0.000000e+00> : vector<8x32xf32>
    %534 = tpu.matmul %533, %0, %cst_123 {dimension_numbers = #tpu.dot_dimension_numbers<[1], [0], [0], [1], [0, 0, 1, 1], [], []>} : vector<8x8xbf16>, vector<8x32xbf16>, vector<8x32xf32> -> vector<8x32xf32>
    %535 = arith.addf %532, %534 : vector<8x32xf32>
    %536 = vector.extract_strided_slice %535 {offsets = [0, 0], sizes = [8, 8], strides = [1, 1]} : vector<8x32xf32> to vector<8x8xf32>
    %537 = arith.negf %536 : vector<8x8xf32>
    %538 = math.exp %537 : vector<8x8xf32>
    %cst_124 = arith.constant 1.000000e+00 : f32
    %539 = vector.broadcast %cst_124 : f32 to vector<8x8xf32>
    %540 = arith.addf %539, %538 : vector<8x8xf32>
    %541 = arith.divf %539, %540 : vector<8x8xf32>
    %542 = vector.extract_strided_slice %535 {offsets = [0, 8], sizes = [8, 8], strides = [1, 1]} : vector<8x32xf32> to vector<8x8xf32>
    %543 = arith.negf %542 : vector<8x8xf32>
    %544 = math.exp %543 : vector<8x8xf32>
    %cst_125 = arith.constant 1.000000e+00 : f32
    %545 = vector.broadcast %cst_125 : f32 to vector<8x8xf32>
    %546 = arith.addf %545, %544 : vector<8x8xf32>
    %547 = arith.divf %545, %546 : vector<8x8xf32>
    %548 = vector.extract_strided_slice %535 {offsets = [0, 16], sizes = [8, 8], strides = [1, 1]} : vector<8x32xf32> to vector<8x8xf32>
    %549 = math.tanh %548 : vector<8x8xf32>
    %550 = vector.extract_strided_slice %535 {offsets = [0, 24], sizes = [8, 8], strides = [1, 1]} : vector<8x32xf32> to vector<8x8xf32>
    %551 = arith.negf %550 : vector<8x8xf32>
    %552 = math.exp %551 : vector<8x8xf32>
    %cst_126 = arith.constant 1.000000e+00 : f32
    %553 = vector.broadcast %cst_126 : f32 to vector<8x8xf32>
    %554 = arith.addf %553, %552 : vector<8x8xf32>
    %555 = arith.divf %553, %554 : vector<8x8xf32>
    %556 = arith.mulf %547, %483 : vector<8x8xf32>
    %557 = arith.mulf %541, %549 : vector<8x8xf32>
    %558 = arith.addf %556, %557 : vector<8x8xf32>
    %559 = math.tanh %558 : vector<8x8xf32>
    %560 = arith.mulf %555, %559 : vector<8x8xf32>
    %561 = arith.truncf %560 : vector<8x8xf32> to vector<8x8xbf16>
    %562 = arith.index_cast %c7_i32_119 : i32 to index
    %c0_127 = arith.constant 0 : index
    %c0_128 = arith.constant 0 : index
    %563 = vector.load %arg4[%562, %c0_127, %c0_128] : memref<8x8x16xbf16, #tpu.memory_space<vmem>>, vector<1x8x8xbf16>
    %564 = vector.shape_cast %563 : vector<1x8x8xbf16> to vector<8x8xbf16>
    %565 = vector.shape_cast %561 : vector<8x8xbf16> to vector<1x8x8xbf16>
    tpu.vector_store %arg4[%562, %c0_127, %c0_128], %565 {strides = array<i32>} : memref<8x8x16xbf16, #tpu.memory_space<vmem>>, vector<1x8x8xbf16>,
    %566 = arith.index_cast %528 : i32 to index
    %c0_129 = arith.constant 0 : index
    %c32_130 = arith.constant 32 : index
    %567 = vector.load %arg1[%566, %c0_129, %c32_130] : memref<8x8x64xbf16, #tpu.memory_space<vmem>>, vector<1x8x32xbf16>
    %568 = vector.shape_cast %567 : vector<1x8x32xbf16> to vector<8x32xbf16>
    %569 = arith.extf %568 : vector<8x32xbf16> to vector<8x32xf32>
    %570 = arith.truncf %522 : vector<8x8xf32> to vector<8x8xbf16>
    %cst_131 = arith.constant dense<0.000000e+00> : vector<8x32xf32>
    %571 = tpu.matmul %570, %1, %cst_131 {dimension_numbers = #tpu.dot_dimension_numbers<[1], [0], [0], [1], [0, 0, 1, 1], [], []>} : vector<8x8xbf16>, vector<8x32xbf16>, vector<8x32xf32> -> vector<8x32xf32>
    %572 = arith.addf %569, %571 : vector<8x32xf32>
    %573 = vector.extract_strided_slice %572 {offsets = [0, 0], sizes = [8, 8], strides = [1, 1]} : vector<8x32xf32> to vector<8x8xf32>
    %574 = arith.negf %573 : vector<8x8xf32>
    %575 = math.exp %574 : vector<8x8xf32>
    %cst_132 = arith.constant 1.000000e+00 : f32
    %576 = vector.broadcast %cst_132 : f32 to vector<8x8xf32>
    %577 = arith.addf %576, %575 : vector<8x8xf32>
    %578 = arith.divf %576, %577 : vector<8x8xf32>
    %579 = vector.extract_strided_slice %572 {offsets = [0, 8], sizes = [8, 8], strides = [1, 1]} : vector<8x32xf32> to vector<8x8xf32>
    %580 = arith.negf %579 : vector<8x8xf32>
    %581 = math.exp %580 : vector<8x8xf32>
    %cst_133 = arith.constant 1.000000e+00 : f32
    %582 = vector.broadcast %cst_133 : f32 to vector<8x8xf32>
    %583 = arith.addf %582, %581 : vector<8x8xf32>
    %584 = arith.divf %582, %583 : vector<8x8xf32>
    %585 = vector.extract_strided_slice %572 {offsets = [0, 16], sizes = [8, 8], strides = [1, 1]} : vector<8x32xf32> to vector<8x8xf32>
    %586 = math.tanh %585 : vector<8x8xf32>
    %587 = vector.extract_strided_slice %572 {offsets = [0, 24], sizes = [8, 8], strides = [1, 1]} : vector<8x32xf32> to vector<8x8xf32>
    %588 = arith.negf %587 : vector<8x8xf32>
    %589 = math.exp %588 : vector<8x8xf32>
    %cst_134 = arith.constant 1.000000e+00 : f32
    %590 = vector.broadcast %cst_134 : f32 to vector<8x8xf32>
    %591 = arith.addf %590, %589 : vector<8x8xf32>
    %592 = arith.divf %590, %591 : vector<8x8xf32>
    %593 = arith.mulf %584, %520 : vector<8x8xf32>
    %594 = arith.mulf %578, %586 : vector<8x8xf32>
    %595 = arith.addf %593, %594 : vector<8x8xf32>
    %596 = math.tanh %595 : vector<8x8xf32>
    %597 = arith.mulf %592, %596 : vector<8x8xf32>
    %598 = arith.truncf %597 : vector<8x8xf32> to vector<8x8xbf16>
    %599 = arith.index_cast %528 : i32 to index
    %c0_135 = arith.constant 0 : index
    %c8_136 = arith.constant 8 : index
    %600 = vector.load %arg4[%599, %c0_135, %c8_136] : memref<8x8x16xbf16, #tpu.memory_space<vmem>>, vector<1x8x8xbf16>
    %601 = vector.shape_cast %600 : vector<1x8x8xbf16> to vector<8x8xbf16>
    %602 = vector.shape_cast %598 : vector<8x8xbf16> to vector<1x8x8xbf16>
    tpu.vector_store %arg4[%599, %c0_135, %c8_136], %602 {strides = array<i32>} : memref<8x8x16xbf16, #tpu.memory_space<vmem>>, vector<1x8x8xbf16>,
    %c8_i32 = arith.constant 8 : i32
    return
  }
  func.func @transform_0(%arg0: i32) -> (i32, i32, i32) {
    %c0_i32 = arith.constant 0 : i32
    %c0_i32_0 = arith.constant 0 : i32
    %c0_i32_1 = arith.constant 0 : i32
    return %c0_i32, %arg0, %c0_i32_0 : i32, i32, i32
  }
  func.func @transform_1(%arg0: i32) -> (i32, i32) {
    %c0_i32 = arith.constant 0 : i32
    %c0_i32_0 = arith.constant 0 : i32
    %c0_i32_1 = arith.constant 0 : i32
    return %c0_i32, %c0_i32_0 : i32, i32
  }
  func.func @transform_2(%arg0: i32) -> (i32, i32) {
    %c0_i32 = arith.constant 0 : i32
    %c0_i32_0 = arith.constant 0 : i32
    %c0_i32_1 = arith.constant 0 : i32
    return %c0_i32, %c0_i32_0 : i32, i32
  }
  func.func @transform_3(%arg0: i32) -> (i32, i32, i32) {
    %c0_i32 = arith.constant 0 : i32
    %c0_i32_0 = arith.constant 0 : i32
    %c0_i32_1 = arith.constant 0 : i32
    return %c0_i32, %arg0, %c0_i32_0 : i32, i32, i32
  }
}

module attributes {stable_mosaic.version = 11 : i64} {
  func.func @_mm_kernel(%arg0: i32, %arg1: memref<64x16xf32, #tpu.memory_space<vmem>>, %arg2: memref<16x16xbf16, #tpu.memory_space<vmem>>, %arg3: memref<1x16xf32, #tpu.memory_space<vmem>>, %arg4: memref<64x16xf32, #tpu.memory_space<vmem>>) attributes {dimension_semantics = [#tpu.dimension_semantics<parallel>], iteration_bounds = array<i64: 1>, scalar_prefetch = 0 : i64, scratch_operands = 0 : i64, tpu.core_type = #tpu.core_type<tc>, window_params = [{transform_indices = @transform_0, window_bounds = array<i64: 64, 16>}, {pipeline_mode = #tpu.pipeline_mode<synchronous>, transform_indices = @transform_1, window_bounds = array<i64: 16, 16>}, {pipeline_mode = #tpu.pipeline_mode<synchronous>, transform_indices = @transform_2, window_bounds = array<i64: 1, 16>}, {transform_indices = @transform_3, window_bounds = array<i64: 64, 16>}]} {
    %c0 = arith.constant 0 : index
    %c0_0 = arith.constant 0 : index
    %0 = vector.load %arg1[%c0, %c0_0] : memref<64x16xf32, #tpu.memory_space<vmem>>, vector<64x16xf32>
    %1 = arith.truncf %0 : vector<64x16xf32> to vector<64x16xbf16>
    %c0_1 = arith.constant 0 : index
    %c0_2 = arith.constant 0 : index
    %2 = vector.load %arg2[%c0_1, %c0_2] : memref<16x16xbf16, #tpu.memory_space<vmem>>, vector<16x16xbf16>
    %cst = arith.constant dense<0.000000e+00> : vector<64x16xf32>
    %3 = tpu.matmul %1, %2, %cst {dimension_numbers = #tpu.dot_dimension_numbers<[1], [0], [0], [1], [0, 0, 1, 1], [], []>} : vector<64x16xbf16>, vector<16x16xbf16>, vector<64x16xf32> -> vector<64x16xf32>
    %c0_3 = arith.constant 0 : index
    %c0_4 = arith.constant 0 : index
    %4 = vector.load %arg3[%c0_3, %c0_4] : memref<1x16xf32, #tpu.memory_space<vmem>>, vector<1x16xf32>
    %5 = vector.broadcast %4 : vector<1x16xf32> to vector<64x16xf32>
    %6 = arith.addf %3, %5 : vector<64x16xf32>
    %c0_5 = arith.constant 0 : index
    %c0_6 = arith.constant 0 : index
    %7 = vector.load %arg4[%c0_5, %c0_6] : memref<64x16xf32, #tpu.memory_space<vmem>>, vector<64x16xf32>
    tpu.vector_store %arg4[%c0_5, %c0_6], %6 {strides = array<i32>} : memref<64x16xf32, #tpu.memory_space<vmem>>, vector<64x16xf32>,
    return
  }
  func.func @transform_0(%arg0: i32) -> (i32, i32) {
    %c0_i32 = arith.constant 0 : i32
    %c0_i32_0 = arith.constant 0 : i32
    return %arg0, %c0_i32 : i32, i32
  }
  func.func @transform_1(%arg0: i32) -> (i32, i32) {
    %c0_i32 = arith.constant 0 : i32
    %c0_i32_0 = arith.constant 0 : i32
    %c0_i32_1 = arith.constant 0 : i32
    return %c0_i32, %c0_i32_0 : i32, i32
  }
  func.func @transform_2(%arg0: i32) -> (i32, i32) {
    %c0_i32 = arith.constant 0 : i32
    %c0_i32_0 = arith.constant 0 : i32
    %c0_i32_1 = arith.constant 0 : i32
    return %c0_i32, %c0_i32_0 : i32, i32
  }
  func.func @transform_3(%arg0: i32) -> (i32, i32) {
    %c0_i32 = arith.constant 0 : i32
    %c0_i32_0 = arith.constant 0 : i32
    return %arg0, %c0_i32 : i32, i32
  }
}

module attributes {stable_mosaic.version = 11 : i64} {
  func.func @_mm_res_ln_kernel(%arg0: i32, %arg1: memref<64x16xbf16, #tpu.memory_space<vmem>>, %arg2: memref<64x16xf32, #tpu.memory_space<vmem>>, %arg3: memref<16x16xbf16, #tpu.memory_space<vmem>>, %arg4: memref<1x16xf32, #tpu.memory_space<vmem>>, %arg5: memref<1x16xf32, #tpu.memory_space<vmem>>, %arg6: memref<1x16xf32, #tpu.memory_space<vmem>>, %arg7: memref<64x16xf32, #tpu.memory_space<vmem>>) attributes {dimension_semantics = [#tpu.dimension_semantics<parallel>], iteration_bounds = array<i64: 1>, scalar_prefetch = 0 : i64, scratch_operands = 0 : i64, tpu.core_type = #tpu.core_type<tc>, window_params = [{transform_indices = @transform_0, window_bounds = array<i64: 64, 16>}, {transform_indices = @transform_1, window_bounds = array<i64: 64, 16>}, {pipeline_mode = #tpu.pipeline_mode<synchronous>, transform_indices = @transform_2, window_bounds = array<i64: 16, 16>}, {pipeline_mode = #tpu.pipeline_mode<synchronous>, transform_indices = @transform_3, window_bounds = array<i64: 1, 16>}, {pipeline_mode = #tpu.pipeline_mode<synchronous>, transform_indices = @transform_4, window_bounds = array<i64: 1, 16>}, {pipeline_mode = #tpu.pipeline_mode<synchronous>, transform_indices = @transform_5, window_bounds = array<i64: 1, 16>}, {transform_indices = @transform_6, window_bounds = array<i64: 64, 16>}]} {
    %c0 = arith.constant 0 : index
    %c0_0 = arith.constant 0 : index
    %0 = vector.load %arg1[%c0, %c0_0] : memref<64x16xbf16, #tpu.memory_space<vmem>>, vector<64x16xbf16>
    %c0_1 = arith.constant 0 : index
    %c0_2 = arith.constant 0 : index
    %1 = vector.load %arg3[%c0_1, %c0_2] : memref<16x16xbf16, #tpu.memory_space<vmem>>, vector<16x16xbf16>
    %cst = arith.constant dense<0.000000e+00> : vector<64x16xf32>
    %2 = tpu.matmul %0, %1, %cst {dimension_numbers = #tpu.dot_dimension_numbers<[1], [0], [0], [1], [0, 0, 1, 1], [], []>} : vector<64x16xbf16>, vector<16x16xbf16>, vector<64x16xf32> -> vector<64x16xf32>
    %c0_3 = arith.constant 0 : index
    %c0_4 = arith.constant 0 : index
    %3 = vector.load %arg4[%c0_3, %c0_4] : memref<1x16xf32, #tpu.memory_space<vmem>>, vector<1x16xf32>
    %4 = vector.broadcast %3 : vector<1x16xf32> to vector<64x16xf32>
    %5 = arith.addf %2, %4 : vector<64x16xf32>
    %c0_5 = arith.constant 0 : index
    %c0_6 = arith.constant 0 : index
    %6 = vector.load %arg2[%c0_5, %c0_6] : memref<64x16xf32, #tpu.memory_space<vmem>>, vector<64x16xf32>
    %7 = arith.addf %5, %6 : vector<64x16xf32>
    %c0_7 = arith.constant 0 : index
    %c0_8 = arith.constant 0 : index
    %8 = vector.load %arg5[%c0_7, %c0_8] : memref<1x16xf32, #tpu.memory_space<vmem>>, vector<1x16xf32>
    %c0_9 = arith.constant 0 : index
    %c0_10 = arith.constant 0 : index
    %9 = vector.load %arg6[%c0_9, %c0_10] : memref<1x16xf32, #tpu.memory_space<vmem>>, vector<1x16xf32>
    %cst_11 = arith.constant dense<0.000000e+00> : vector<64xf32>
    %10 = vector.multi_reduction <add>, %7, %cst_11 [1] : vector<64x16xf32> to vector<64xf32>
    %11 = vector.shape_cast %10 : vector<64xf32> to vector<64x1xf32>
    %cst_12 = arith.constant 1.600000e+01 : f32
    %12 = vector.broadcast %cst_12 : f32 to vector<64x1xf32>
    %13 = arith.divf %11, %12 : vector<64x1xf32>
    %14 = vector.broadcast %13 : vector<64x1xf32> to vector<64x16xf32>
    %15 = arith.subf %7, %14 : vector<64x16xf32>
    %16 = arith.mulf %15, %15 : vector<64x16xf32>
    %cst_13 = arith.constant dense<0.000000e+00> : vector<64xf32>
    %17 = vector.multi_reduction <add>, %16, %cst_13 [1] : vector<64x16xf32> to vector<64xf32>
    %18 = vector.shape_cast %17 : vector<64xf32> to vector<64x1xf32>
    %cst_14 = arith.constant 1.600000e+01 : f32
    %19 = vector.broadcast %cst_14 : f32 to vector<64x1xf32>
    %20 = arith.divf %18, %19 : vector<64x1xf32>
    %21 = vector.broadcast %13 : vector<64x1xf32> to vector<64x16xf32>
    %22 = arith.subf %7, %21 : vector<64x16xf32>
    %cst_15 = arith.constant 9.99999974E-6 : f32
    %23 = vector.broadcast %cst_15 : f32 to vector<64x1xf32>
    %24 = arith.addf %20, %23 : vector<64x1xf32>
    %25 = math.rsqrt %24 : vector<64x1xf32>
    %26 = vector.broadcast %25 : vector<64x1xf32> to vector<64x16xf32>
    %27 = arith.mulf %22, %26 : vector<64x16xf32>
    %28 = vector.broadcast %8 : vector<1x16xf32> to vector<64x16xf32>
    %29 = arith.mulf %27, %28 : vector<64x16xf32>
    %30 = vector.broadcast %9 : vector<1x16xf32> to vector<64x16xf32>
    %31 = arith.addf %29, %30 : vector<64x16xf32>
    %c0_16 = arith.constant 0 : index
    %c0_17 = arith.constant 0 : index
    %32 = vector.load %arg7[%c0_16, %c0_17] : memref<64x16xf32, #tpu.memory_space<vmem>>, vector<64x16xf32>
    tpu.vector_store %arg7[%c0_16, %c0_17], %31 {strides = array<i32>} : memref<64x16xf32, #tpu.memory_space<vmem>>, vector<64x16xf32>,
    return
  }
  func.func @transform_0(%arg0: i32) -> (i32, i32) {
    %c0_i32 = arith.constant 0 : i32
    %c0_i32_0 = arith.constant 0 : i32
    return %arg0, %c0_i32 : i32, i32
  }
  func.func @transform_1(%arg0: i32) -> (i32, i32) {
    %c0_i32 = arith.constant 0 : i32
    %c0_i32_0 = arith.constant 0 : i32
    return %arg0, %c0_i32 : i32, i32
  }
  func.func @transform_2(%arg0: i32) -> (i32, i32) {
    %c0_i32 = arith.constant 0 : i32
    %c0_i32_0 = arith.constant 0 : i32
    %c0_i32_1 = arith.constant 0 : i32
    return %c0_i32, %c0_i32_0 : i32, i32
  }
  func.func @transform_3(%arg0: i32) -> (i32, i32) {
    %c0_i32 = arith.constant 0 : i32
    %c0_i32_0 = arith.constant 0 : i32
    %c0_i32_1 = arith.constant 0 : i32
    return %c0_i32, %c0_i32_0 : i32, i32
  }
  func.func @transform_4(%arg0: i32) -> (i32, i32) {
    %c0_i32 = arith.constant 0 : i32
    %c0_i32_0 = arith.constant 0 : i32
    %c0_i32_1 = arith.constant 0 : i32
    return %c0_i32, %c0_i32_0 : i32, i32
  }
  func.func @transform_5(%arg0: i32) -> (i32, i32) {
    %c0_i32 = arith.constant 0 : i32
    %c0_i32_0 = arith.constant 0 : i32
    %c0_i32_1 = arith.constant 0 : i32
    return %c0_i32, %c0_i32_0 : i32, i32
  }
  func.func @transform_6(%arg0: i32) -> (i32, i32) {
    %c0_i32 = arith.constant 0 : i32
    %c0_i32_0 = arith.constant 0 : i32
    return %arg0, %c0_i32 : i32, i32
  }
}

module attributes {stable_mosaic.version = 11 : i64} {
  func.func @_ga_kernel(%arg0: i32, %arg1: memref<1x16x16xf32, #tpu.memory_space<vmem>>, %arg2: memref<16x16xf32, #tpu.memory_space<vmem>>, %arg3: memref<1x16xf32, #tpu.memory_space<vmem>>, %arg4: memref<1x16xf32, #tpu.memory_space<vmem>>, %arg5: memref<16x48xbf16, #tpu.memory_space<vmem>>, %arg6: memref<1x48xf32, #tpu.memory_space<vmem>>, %arg7: memref<16x16xbf16, #tpu.memory_space<vmem>>, %arg8: memref<1x16xf32, #tpu.memory_space<vmem>>, %arg9: memref<1x16xf32, #tpu.memory_space<vmem>>, %arg10: memref<1x16xf32, #tpu.memory_space<vmem>>, %arg11: memref<1x16x16xf32, #tpu.memory_space<vmem>>) attributes {dimension_semantics = [#tpu.dimension_semantics<parallel>], iteration_bounds = array<i64: 4>, scalar_prefetch = 0 : i64, scratch_operands = 0 : i64, tpu.core_type = #tpu.core_type<tc>, window_params = [{transform_indices = @transform_0, window_bounds = array<i64: 1, 16, 16>}, {pipeline_mode = #tpu.pipeline_mode<synchronous>, transform_indices = @transform_1, window_bounds = array<i64: 16, 16>}, {pipeline_mode = #tpu.pipeline_mode<synchronous>, transform_indices = @transform_2, window_bounds = array<i64: 1, 16>}, {pipeline_mode = #tpu.pipeline_mode<synchronous>, transform_indices = @transform_3, window_bounds = array<i64: 1, 16>}, {pipeline_mode = #tpu.pipeline_mode<synchronous>, transform_indices = @transform_4, window_bounds = array<i64: 16, 48>}, {pipeline_mode = #tpu.pipeline_mode<synchronous>, transform_indices = @transform_5, window_bounds = array<i64: 1, 48>}, {pipeline_mode = #tpu.pipeline_mode<synchronous>, transform_indices = @transform_6, window_bounds = array<i64: 16, 16>}, {pipeline_mode = #tpu.pipeline_mode<synchronous>, transform_indices = @transform_7, window_bounds = array<i64: 1, 16>}, {pipeline_mode = #tpu.pipeline_mode<synchronous>, transform_indices = @transform_8, window_bounds = array<i64: 1, 16>}, {pipeline_mode = #tpu.pipeline_mode<synchronous>, transform_indices = @transform_9, window_bounds = array<i64: 1, 16>}, {transform_indices = @transform_10, window_bounds = array<i64: 1, 16, 16>}]} {
    %c0 = arith.constant 0 : index
    %c0_0 = arith.constant 0 : index
    %c0_1 = arith.constant 0 : index
    %0 = vector.load %arg1[%c0, %c0_0, %c0_1] : memref<1x16x16xf32, #tpu.memory_space<vmem>>, vector<1x16x16xf32>
    %1 = vector.shape_cast %0 : vector<1x16x16xf32> to vector<16x16xf32>
    %c0_2 = arith.constant 0 : index
    %c0_3 = arith.constant 0 : index
    %2 = vector.load %arg3[%c0_2, %c0_3] : memref<1x16xf32, #tpu.memory_space<vmem>>, vector<1x16xf32>
    %c0_4 = arith.constant 0 : index
    %c0_5 = arith.constant 0 : index
    %3 = vector.load %arg4[%c0_4, %c0_5] : memref<1x16xf32, #tpu.memory_space<vmem>>, vector<1x16xf32>
    %cst = arith.constant dense<0.000000e+00> : vector<16xf32>
    %4 = vector.multi_reduction <add>, %1, %cst [1] : vector<16x16xf32> to vector<16xf32>
    %5 = vector.shape_cast %4 : vector<16xf32> to vector<16x1xf32>
    %cst_6 = arith.constant 1.600000e+01 : f32
    %6 = vector.broadcast %cst_6 : f32 to vector<16x1xf32>
    %7 = arith.divf %5, %6 : vector<16x1xf32>
    %8 = vector.broadcast %7 : vector<16x1xf32> to vector<16x16xf32>
    %9 = arith.subf %1, %8 : vector<16x16xf32>
    %10 = arith.mulf %9, %9 : vector<16x16xf32>
    %cst_7 = arith.constant dense<0.000000e+00> : vector<16xf32>
    %11 = vector.multi_reduction <add>, %10, %cst_7 [1] : vector<16x16xf32> to vector<16xf32>
    %12 = vector.shape_cast %11 : vector<16xf32> to vector<16x1xf32>
    %cst_8 = arith.constant 1.600000e+01 : f32
    %13 = vector.broadcast %cst_8 : f32 to vector<16x1xf32>
    %14 = arith.divf %12, %13 : vector<16x1xf32>
    %15 = vector.broadcast %7 : vector<16x1xf32> to vector<16x16xf32>
    %16 = arith.subf %1, %15 : vector<16x16xf32>
    %cst_9 = arith.constant 9.99999974E-6 : f32
    %17 = vector.broadcast %cst_9 : f32 to vector<16x1xf32>
    %18 = arith.addf %14, %17 : vector<16x1xf32>
    %19 = math.rsqrt %18 : vector<16x1xf32>
    %20 = vector.broadcast %19 : vector<16x1xf32> to vector<16x16xf32>
    %21 = arith.mulf %16, %20 : vector<16x16xf32>
    %22 = vector.broadcast %2 : vector<1x16xf32> to vector<16x16xf32>
    %23 = arith.mulf %21, %22 : vector<16x16xf32>
    %24 = vector.broadcast %3 : vector<1x16xf32> to vector<16x16xf32>
    %25 = arith.addf %23, %24 : vector<16x16xf32>
    %26 = arith.addf %25, %1 : vector<16x16xf32>
    %c0_10 = arith.constant 0 : index
    %c0_11 = arith.constant 0 : index
    %27 = vector.load %arg2[%c0_10, %c0_11] : memref<16x16xf32, #tpu.memory_space<vmem>>, vector<16x16xf32>
    %28 = arith.addf %26, %27 : vector<16x16xf32>
    %29 = arith.truncf %28 : vector<16x16xf32> to vector<16x16xbf16>
    %c0_12 = arith.constant 0 : index
    %c0_13 = arith.constant 0 : index
    %30 = vector.load %arg5[%c0_12, %c0_13] : memref<16x48xbf16, #tpu.memory_space<vmem>>, vector<16x48xbf16>
    %cst_14 = arith.constant dense<0.000000e+00> : vector<16x48xf32>
    %31 = tpu.matmul %29, %30, %cst_14 {dimension_numbers = #tpu.dot_dimension_numbers<[1], [0], [0], [1], [0, 0, 1, 1], [], []>} : vector<16x16xbf16>, vector<16x48xbf16>, vector<16x48xf32> -> vector<16x48xf32>
    %c0_15 = arith.constant 0 : index
    %c0_16 = arith.constant 0 : index
    %32 = vector.load %arg6[%c0_15, %c0_16] : memref<1x48xf32, #tpu.memory_space<vmem>>, vector<1x48xf32>
    %33 = vector.broadcast %32 : vector<1x48xf32> to vector<16x48xf32>
    %34 = arith.addf %31, %33 : vector<16x48xf32>
    %35 = vector.extract_strided_slice %34 {offsets = [0, 0], sizes = [16, 4], strides = [1, 1]} : vector<16x48xf32> to vector<16x4xf32>
    %36 = arith.truncf %35 : vector<16x4xf32> to vector<16x4xbf16>
    %37 = vector.extract_strided_slice %34 {offsets = [0, 16], sizes = [16, 4], strides = [1, 1]} : vector<16x48xf32> to vector<16x4xf32>
    %38 = arith.truncf %37 : vector<16x4xf32> to vector<16x4xbf16>
    %39 = vector.extract_strided_slice %34 {offsets = [0, 32], sizes = [16, 4], strides = [1, 1]} : vector<16x48xf32> to vector<16x4xf32>
    %40 = arith.truncf %39 : vector<16x4xf32> to vector<16x4xbf16>
    %cst_17 = arith.constant dense<0.000000e+00> : vector<16x16xf32>
    %41 = tpu.matmul %36, %38, %cst_17 {dimension_numbers = #tpu.dot_dimension_numbers<[1], [1], [0], [0], [0, 0, 1, 0], [], []>} : vector<16x4xbf16>, vector<16x4xbf16>, vector<16x16xf32> -> vector<16x16xf32>
    %cst_18 = arith.constant 5.000000e-01 : f32
    %42 = vector.broadcast %cst_18 : f32 to vector<16x16xf32>
    %43 = arith.mulf %41, %42 : vector<16x16xf32>
    %cst_19 = arith.constant dense<0xFF800000> : vector<16xf32>
    %44 = vector.multi_reduction <maximumf>, %43, %cst_19 [1] : vector<16x16xf32> to vector<16xf32>
    %45 = vector.shape_cast %44 : vector<16xf32> to vector<16x1xf32>
    %46 = vector.broadcast %45 : vector<16x1xf32> to vector<16x16xf32>
    %47 = arith.subf %43, %46 : vector<16x16xf32>
    %48 = math.exp %47 : vector<16x16xf32>
    %cst_20 = arith.constant dense<0.000000e+00> : vector<16xf32>
    %49 = vector.multi_reduction <add>, %48, %cst_20 [1] : vector<16x16xf32> to vector<16xf32>
    %50 = vector.shape_cast %49 : vector<16xf32> to vector<16x1xf32>
    %51 = tpu.reciprocal %50 {approx = true} : vector<16x1xf32> -> vector<16x1xf32>
    %52 = vector.broadcast %51 : vector<16x1xf32> to vector<16x16xf32>
    %53 = arith.mulf %48, %52 : vector<16x16xf32>
    %54 = arith.truncf %53 : vector<16x16xf32> to vector<16x16xbf16>
    %cst_21 = arith.constant dense<0.000000e+00> : vector<16x4xf32>
    %55 = tpu.matmul %54, %40, %cst_21 {dimension_numbers = #tpu.dot_dimension_numbers<[1], [0], [0], [1], [0, 0, 1, 1], [], []>} : vector<16x16xbf16>, vector<16x4xbf16>, vector<16x4xf32> -> vector<16x4xf32>
    %56 = vector.extract_strided_slice %34 {offsets = [0, 4], sizes = [16, 4], strides = [1, 1]} : vector<16x48xf32> to vector<16x4xf32>
    %57 = arith.truncf %56 : vector<16x4xf32> to vector<16x4xbf16>
    %58 = vector.extract_strided_slice %34 {offsets = [0, 20], sizes = [16, 4], strides = [1, 1]} : vector<16x48xf32> to vector<16x4xf32>
    %59 = arith.truncf %58 : vector<16x4xf32> to vector<16x4xbf16>
    %60 = vector.extract_strided_slice %34 {offsets = [0, 36], sizes = [16, 4], strides = [1, 1]} : vector<16x48xf32> to vector<16x4xf32>
    %61 = arith.truncf %60 : vector<16x4xf32> to vector<16x4xbf16>
    %cst_22 = arith.constant dense<0.000000e+00> : vector<16x16xf32>
    %62 = tpu.matmul %57, %59, %cst_22 {dimension_numbers = #tpu.dot_dimension_numbers<[1], [1], [0], [0], [0, 0, 1, 0], [], []>} : vector<16x4xbf16>, vector<16x4xbf16>, vector<16x16xf32> -> vector<16x16xf32>
    %cst_23 = arith.constant 5.000000e-01 : f32
    %63 = vector.broadcast %cst_23 : f32 to vector<16x16xf32>
    %64 = arith.mulf %62, %63 : vector<16x16xf32>
    %cst_24 = arith.constant dense<0xFF800000> : vector<16xf32>
    %65 = vector.multi_reduction <maximumf>, %64, %cst_24 [1] : vector<16x16xf32> to vector<16xf32>
    %66 = vector.shape_cast %65 : vector<16xf32> to vector<16x1xf32>
    %67 = vector.broadcast %66 : vector<16x1xf32> to vector<16x16xf32>
    %68 = arith.subf %64, %67 : vector<16x16xf32>
    %69 = math.exp %68 : vector<16x16xf32>
    %cst_25 = arith.constant dense<0.000000e+00> : vector<16xf32>
    %70 = vector.multi_reduction <add>, %69, %cst_25 [1] : vector<16x16xf32> to vector<16xf32>
    %71 = vector.shape_cast %70 : vector<16xf32> to vector<16x1xf32>
    %72 = tpu.reciprocal %71 {approx = true} : vector<16x1xf32> -> vector<16x1xf32>
    %73 = vector.broadcast %72 : vector<16x1xf32> to vector<16x16xf32>
    %74 = arith.mulf %69, %73 : vector<16x16xf32>
    %75 = arith.truncf %74 : vector<16x16xf32> to vector<16x16xbf16>
    %cst_26 = arith.constant dense<0.000000e+00> : vector<16x4xf32>
    %76 = tpu.matmul %75, %61, %cst_26 {dimension_numbers = #tpu.dot_dimension_numbers<[1], [0], [0], [1], [0, 0, 1, 1], [], []>} : vector<16x16xbf16>, vector<16x4xbf16>, vector<16x4xf32> -> vector<16x4xf32>
    %77 = vector.extract_strided_slice %34 {offsets = [0, 8], sizes = [16, 4], strides = [1, 1]} : vector<16x48xf32> to vector<16x4xf32>
    %78 = arith.truncf %77 : vector<16x4xf32> to vector<16x4xbf16>
    %79 = vector.extract_strided_slice %34 {offsets = [0, 24], sizes = [16, 4], strides = [1, 1]} : vector<16x48xf32> to vector<16x4xf32>
    %80 = arith.truncf %79 : vector<16x4xf32> to vector<16x4xbf16>
    %81 = vector.extract_strided_slice %34 {offsets = [0, 40], sizes = [16, 4], strides = [1, 1]} : vector<16x48xf32> to vector<16x4xf32>
    %82 = arith.truncf %81 : vector<16x4xf32> to vector<16x4xbf16>
    %cst_27 = arith.constant dense<0.000000e+00> : vector<16x16xf32>
    %83 = tpu.matmul %78, %80, %cst_27 {dimension_numbers = #tpu.dot_dimension_numbers<[1], [1], [0], [0], [0, 0, 1, 0], [], []>} : vector<16x4xbf16>, vector<16x4xbf16>, vector<16x16xf32> -> vector<16x16xf32>
    %cst_28 = arith.constant 5.000000e-01 : f32
    %84 = vector.broadcast %cst_28 : f32 to vector<16x16xf32>
    %85 = arith.mulf %83, %84 : vector<16x16xf32>
    %cst_29 = arith.constant dense<0xFF800000> : vector<16xf32>
    %86 = vector.multi_reduction <maximumf>, %85, %cst_29 [1] : vector<16x16xf32> to vector<16xf32>
    %87 = vector.shape_cast %86 : vector<16xf32> to vector<16x1xf32>
    %88 = vector.broadcast %87 : vector<16x1xf32> to vector<16x16xf32>
    %89 = arith.subf %85, %88 : vector<16x16xf32>
    %90 = math.exp %89 : vector<16x16xf32>
    %cst_30 = arith.constant dense<0.000000e+00> : vector<16xf32>
    %91 = vector.multi_reduction <add>, %90, %cst_30 [1] : vector<16x16xf32> to vector<16xf32>
    %92 = vector.shape_cast %91 : vector<16xf32> to vector<16x1xf32>
    %93 = tpu.reciprocal %92 {approx = true} : vector<16x1xf32> -> vector<16x1xf32>
    %94 = vector.broadcast %93 : vector<16x1xf32> to vector<16x16xf32>
    %95 = arith.mulf %90, %94 : vector<16x16xf32>
    %96 = arith.truncf %95 : vector<16x16xf32> to vector<16x16xbf16>
    %cst_31 = arith.constant dense<0.000000e+00> : vector<16x4xf32>
    %97 = tpu.matmul %96, %82, %cst_31 {dimension_numbers = #tpu.dot_dimension_numbers<[1], [0], [0], [1], [0, 0, 1, 1], [], []>} : vector<16x16xbf16>, vector<16x4xbf16>, vector<16x4xf32> -> vector<16x4xf32>
    %98 = vector.extract_strided_slice %34 {offsets = [0, 12], sizes = [16, 4], strides = [1, 1]} : vector<16x48xf32> to vector<16x4xf32>
    %99 = arith.truncf %98 : vector<16x4xf32> to vector<16x4xbf16>
    %100 = vector.extract_strided_slice %34 {offsets = [0, 28], sizes = [16, 4], strides = [1, 1]} : vector<16x48xf32> to vector<16x4xf32>
    %101 = arith.truncf %100 : vector<16x4xf32> to vector<16x4xbf16>
    %102 = vector.extract_strided_slice %34 {offsets = [0, 44], sizes = [16, 4], strides = [1, 1]} : vector<16x48xf32> to vector<16x4xf32>
    %103 = arith.truncf %102 : vector<16x4xf32> to vector<16x4xbf16>
    %cst_32 = arith.constant dense<0.000000e+00> : vector<16x16xf32>
    %104 = tpu.matmul %99, %101, %cst_32 {dimension_numbers = #tpu.dot_dimension_numbers<[1], [1], [0], [0], [0, 0, 1, 0], [], []>} : vector<16x4xbf16>, vector<16x4xbf16>, vector<16x16xf32> -> vector<16x16xf32>
    %cst_33 = arith.constant 5.000000e-01 : f32
    %105 = vector.broadcast %cst_33 : f32 to vector<16x16xf32>
    %106 = arith.mulf %104, %105 : vector<16x16xf32>
    %cst_34 = arith.constant dense<0xFF800000> : vector<16xf32>
    %107 = vector.multi_reduction <maximumf>, %106, %cst_34 [1] : vector<16x16xf32> to vector<16xf32>
    %108 = vector.shape_cast %107 : vector<16xf32> to vector<16x1xf32>
    %109 = vector.broadcast %108 : vector<16x1xf32> to vector<16x16xf32>
    %110 = arith.subf %106, %109 : vector<16x16xf32>
    %111 = math.exp %110 : vector<16x16xf32>
    %cst_35 = arith.constant dense<0.000000e+00> : vector<16xf32>
    %112 = vector.multi_reduction <add>, %111, %cst_35 [1] : vector<16x16xf32> to vector<16xf32>
    %113 = vector.shape_cast %112 : vector<16xf32> to vector<16x1xf32>
    %114 = tpu.reciprocal %113 {approx = true} : vector<16x1xf32> -> vector<16x1xf32>
    %115 = vector.broadcast %114 : vector<16x1xf32> to vector<16x16xf32>
    %116 = arith.mulf %111, %115 : vector<16x16xf32>
    %117 = arith.truncf %116 : vector<16x16xf32> to vector<16x16xbf16>
    %cst_36 = arith.constant dense<0.000000e+00> : vector<16x4xf32>
    %118 = tpu.matmul %117, %103, %cst_36 {dimension_numbers = #tpu.dot_dimension_numbers<[1], [0], [0], [1], [0, 0, 1, 1], [], []>} : vector<16x16xbf16>, vector<16x4xbf16>, vector<16x4xf32> -> vector<16x4xf32>
    %119 = tpu.concatenate %55, %76, %97, %118 in 1 : vector<16x4xf32>, vector<16x4xf32>, vector<16x4xf32>, vector<16x4xf32> -> vector<16x16xf32>
    %120 = arith.truncf %119 : vector<16x16xf32> to vector<16x16xbf16>
    %c0_37 = arith.constant 0 : index
    %c0_38 = arith.constant 0 : index
    %121 = vector.load %arg7[%c0_37, %c0_38] : memref<16x16xbf16, #tpu.memory_space<vmem>>, vector<16x16xbf16>
    %cst_39 = arith.constant dense<0.000000e+00> : vector<16x16xf32>
    %122 = tpu.matmul %120, %121, %cst_39 {dimension_numbers = #tpu.dot_dimension_numbers<[1], [0], [0], [1], [0, 0, 1, 1], [], []>} : vector<16x16xbf16>, vector<16x16xbf16>, vector<16x16xf32> -> vector<16x16xf32>
    %c0_40 = arith.constant 0 : index
    %c0_41 = arith.constant 0 : index
    %123 = vector.load %arg8[%c0_40, %c0_41] : memref<1x16xf32, #tpu.memory_space<vmem>>, vector<1x16xf32>
    %124 = vector.broadcast %123 : vector<1x16xf32> to vector<16x16xf32>
    %125 = arith.addf %122, %124 : vector<16x16xf32>
    %126 = arith.addf %125, %28 : vector<16x16xf32>
    %c0_42 = arith.constant 0 : index
    %c0_43 = arith.constant 0 : index
    %127 = vector.load %arg9[%c0_42, %c0_43] : memref<1x16xf32, #tpu.memory_space<vmem>>, vector<1x16xf32>
    %c0_44 = arith.constant 0 : index
    %c0_45 = arith.constant 0 : index
    %128 = vector.load %arg10[%c0_44, %c0_45] : memref<1x16xf32, #tpu.memory_space<vmem>>, vector<1x16xf32>
    %cst_46 = arith.constant dense<0.000000e+00> : vector<16xf32>
    %129 = vector.multi_reduction <add>, %126, %cst_46 [1] : vector<16x16xf32> to vector<16xf32>
    %130 = vector.shape_cast %129 : vector<16xf32> to vector<16x1xf32>
    %cst_47 = arith.constant 1.600000e+01 : f32
    %131 = vector.broadcast %cst_47 : f32 to vector<16x1xf32>
    %132 = arith.divf %130, %131 : vector<16x1xf32>
    %133 = vector.broadcast %132 : vector<16x1xf32> to vector<16x16xf32>
    %134 = arith.subf %126, %133 : vector<16x16xf32>
    %135 = arith.mulf %134, %134 : vector<16x16xf32>
    %cst_48 = arith.constant dense<0.000000e+00> : vector<16xf32>
    %136 = vector.multi_reduction <add>, %135, %cst_48 [1] : vector<16x16xf32> to vector<16xf32>
    %137 = vector.shape_cast %136 : vector<16xf32> to vector<16x1xf32>
    %cst_49 = arith.constant 1.600000e+01 : f32
    %138 = vector.broadcast %cst_49 : f32 to vector<16x1xf32>
    %139 = arith.divf %137, %138 : vector<16x1xf32>
    %140 = vector.broadcast %132 : vector<16x1xf32> to vector<16x16xf32>
    %141 = arith.subf %126, %140 : vector<16x16xf32>
    %cst_50 = arith.constant 9.99999974E-6 : f32
    %142 = vector.broadcast %cst_50 : f32 to vector<16x1xf32>
    %143 = arith.addf %139, %142 : vector<16x1xf32>
    %144 = math.rsqrt %143 : vector<16x1xf32>
    %145 = vector.broadcast %144 : vector<16x1xf32> to vector<16x16xf32>
    %146 = arith.mulf %141, %145 : vector<16x16xf32>
    %147 = vector.broadcast %127 : vector<1x16xf32> to vector<16x16xf32>
    %148 = arith.mulf %146, %147 : vector<16x16xf32>
    %149 = vector.broadcast %128 : vector<1x16xf32> to vector<16x16xf32>
    %150 = arith.addf %148, %149 : vector<16x16xf32>
    %151 = arith.addf %150, %1 : vector<16x16xf32>
    %c0_51 = arith.constant 0 : index
    %c0_52 = arith.constant 0 : index
    %c0_53 = arith.constant 0 : index
    %152 = vector.load %arg11[%c0_51, %c0_52, %c0_53] : memref<1x16x16xf32, #tpu.memory_space<vmem>>, vector<1x16x16xf32>
    %153 = vector.shape_cast %152 : vector<1x16x16xf32> to vector<16x16xf32>
    %154 = vector.shape_cast %151 : vector<16x16xf32> to vector<1x16x16xf32>
    tpu.vector_store %arg11[%c0_51, %c0_52, %c0_53], %154 {strides = array<i32>} : memref<1x16x16xf32, #tpu.memory_space<vmem>>, vector<1x16x16xf32>,
    return
  }
  func.func @transform_0(%arg0: i32) -> (i32, i32, i32) {
    %c0_i32 = arith.constant 0 : i32
    %c0_i32_0 = arith.constant 0 : i32
    %c0_i32_1 = arith.constant 0 : i32
    return %arg0, %c0_i32, %c0_i32_0 : i32, i32, i32
  }
  func.func @transform_1(%arg0: i32) -> (i32, i32) {
    %c0_i32 = arith.constant 0 : i32
    %c0_i32_0 = arith.constant 0 : i32
    %c0_i32_1 = arith.constant 0 : i32
    return %c0_i32, %c0_i32_0 : i32, i32
  }
  func.func @transform_2(%arg0: i32) -> (i32, i32) {
    %c0_i32 = arith.constant 0 : i32
    %c0_i32_0 = arith.constant 0 : i32
    %c0_i32_1 = arith.constant 0 : i32
    return %c0_i32, %c0_i32_0 : i32, i32
  }
  func.func @transform_3(%arg0: i32) -> (i32, i32) {
    %c0_i32 = arith.constant 0 : i32
    %c0_i32_0 = arith.constant 0 : i32
    %c0_i32_1 = arith.constant 0 : i32
    return %c0_i32, %c0_i32_0 : i32, i32
  }
  func.func @transform_4(%arg0: i32) -> (i32, i32) {
    %c0_i32 = arith.constant 0 : i32
    %c0_i32_0 = arith.constant 0 : i32
    %c0_i32_1 = arith.constant 0 : i32
    return %c0_i32, %c0_i32_0 : i32, i32
  }
  func.func @transform_5(%arg0: i32) -> (i32, i32) {
    %c0_i32 = arith.constant 0 : i32
    %c0_i32_0 = arith.constant 0 : i32
    %c0_i32_1 = arith.constant 0 : i32
    return %c0_i32, %c0_i32_0 : i32, i32
  }
  func.func @transform_6(%arg0: i32) -> (i32, i32) {
    %c0_i32 = arith.constant 0 : i32
    %c0_i32_0 = arith.constant 0 : i32
    %c0_i32_1 = arith.constant 0 : i32
    return %c0_i32, %c0_i32_0 : i32, i32
  }
  func.func @transform_7(%arg0: i32) -> (i32, i32) {
    %c0_i32 = arith.constant 0 : i32
    %c0_i32_0 = arith.constant 0 : i32
    %c0_i32_1 = arith.constant 0 : i32
    return %c0_i32, %c0_i32_0 : i32, i32
  }
  func.func @transform_8(%arg0: i32) -> (i32, i32) {
    %c0_i32 = arith.constant 0 : i32
    %c0_i32_0 = arith.constant 0 : i32
    %c0_i32_1 = arith.constant 0 : i32
    return %c0_i32, %c0_i32_0 : i32, i32
  }
  func.func @transform_9(%arg0: i32) -> (i32, i32) {
    %c0_i32 = arith.constant 0 : i32
    %c0_i32_0 = arith.constant 0 : i32
    %c0_i32_1 = arith.constant 0 : i32
    return %c0_i32, %c0_i32_0 : i32, i32
  }
  func.func @transform_10(%arg0: i32) -> (i32, i32, i32) {
    %c0_i32 = arith.constant 0 : i32
    %c0_i32_0 = arith.constant 0 : i32
    %c0_i32_1 = arith.constant 0 : i32
    return %arg0, %c0_i32, %c0_i32_0 : i32, i32, i32
  }
}

module attributes {stable_mosaic.version = 11 : i64} {
  func.func @_mm_kernel(%arg0: i32, %arg1: memref<16x64xf32, #tpu.memory_space<vmem>>, %arg2: memref<64x16xbf16, #tpu.memory_space<vmem>>, %arg3: memref<1x16xf32, #tpu.memory_space<vmem>>, %arg4: memref<16x16xf32, #tpu.memory_space<vmem>>) attributes {dimension_semantics = [#tpu.dimension_semantics<parallel>], iteration_bounds = array<i64: 1>, scalar_prefetch = 0 : i64, scratch_operands = 0 : i64, tpu.core_type = #tpu.core_type<tc>, window_params = [{transform_indices = @transform_0, window_bounds = array<i64: 16, 64>}, {pipeline_mode = #tpu.pipeline_mode<synchronous>, transform_indices = @transform_1, window_bounds = array<i64: 64, 16>}, {pipeline_mode = #tpu.pipeline_mode<synchronous>, transform_indices = @transform_2, window_bounds = array<i64: 1, 16>}, {transform_indices = @transform_3, window_bounds = array<i64: 16, 16>}]} {
    %c0 = arith.constant 0 : index
    %c0_0 = arith.constant 0 : index
    %0 = vector.load %arg1[%c0, %c0_0] : memref<16x64xf32, #tpu.memory_space<vmem>>, vector<16x64xf32>
    %1 = arith.truncf %0 : vector<16x64xf32> to vector<16x64xbf16>
    %c0_1 = arith.constant 0 : index
    %c0_2 = arith.constant 0 : index
    %2 = vector.load %arg2[%c0_1, %c0_2] : memref<64x16xbf16, #tpu.memory_space<vmem>>, vector<64x16xbf16>
    %cst = arith.constant dense<0.000000e+00> : vector<16x16xf32>
    %3 = tpu.matmul %1, %2, %cst {dimension_numbers = #tpu.dot_dimension_numbers<[1], [0], [0], [1], [0, 0, 1, 1], [], []>} : vector<16x64xbf16>, vector<64x16xbf16>, vector<16x16xf32> -> vector<16x16xf32>
    %c0_3 = arith.constant 0 : index
    %c0_4 = arith.constant 0 : index
    %4 = vector.load %arg3[%c0_3, %c0_4] : memref<1x16xf32, #tpu.memory_space<vmem>>, vector<1x16xf32>
    %5 = vector.broadcast %4 : vector<1x16xf32> to vector<16x16xf32>
    %6 = arith.addf %3, %5 : vector<16x16xf32>
    %c0_5 = arith.constant 0 : index
    %c0_6 = arith.constant 0 : index
    %7 = vector.load %arg4[%c0_5, %c0_6] : memref<16x16xf32, #tpu.memory_space<vmem>>, vector<16x16xf32>
    tpu.vector_store %arg4[%c0_5, %c0_6], %6 {strides = array<i32>} : memref<16x16xf32, #tpu.memory_space<vmem>>, vector<16x16xf32>,
    return
  }
  func.func @transform_0(%arg0: i32) -> (i32, i32) {
    %c0_i32 = arith.constant 0 : i32
    %c0_i32_0 = arith.constant 0 : i32
    return %arg0, %c0_i32 : i32, i32
  }
  func.func @transform_1(%arg0: i32) -> (i32, i32) {
    %c0_i32 = arith.constant 0 : i32
    %c0_i32_0 = arith.constant 0 : i32
    %c0_i32_1 = arith.constant 0 : i32
    return %c0_i32, %c0_i32_0 : i32, i32
  }
  func.func @transform_2(%arg0: i32) -> (i32, i32) {
    %c0_i32 = arith.constant 0 : i32
    %c0_i32_0 = arith.constant 0 : i32
    %c0_i32_1 = arith.constant 0 : i32
    return %c0_i32, %c0_i32_0 : i32, i32
  }
  func.func @transform_3(%arg0: i32) -> (i32, i32) {
    %c0_i32 = arith.constant 0 : i32
    %c0_i32_0 = arith.constant 0 : i32
    return %arg0, %c0_i32 : i32, i32
  }
}

module attributes {stable_mosaic.version = 11 : i64} {
  func.func @_mm_kernel(%arg0: i32, %arg1: memref<16x16xf32, #tpu.memory_space<vmem>>, %arg2: memref<16x64xbf16, #tpu.memory_space<vmem>>, %arg3: memref<1x64xf32, #tpu.memory_space<vmem>>, %arg4: memref<16x64xf32, #tpu.memory_space<vmem>>) attributes {dimension_semantics = [#tpu.dimension_semantics<parallel>], iteration_bounds = array<i64: 1>, scalar_prefetch = 0 : i64, scratch_operands = 0 : i64, tpu.core_type = #tpu.core_type<tc>, window_params = [{transform_indices = @transform_0, window_bounds = array<i64: 16, 16>}, {pipeline_mode = #tpu.pipeline_mode<synchronous>, transform_indices = @transform_1, window_bounds = array<i64: 16, 64>}, {pipeline_mode = #tpu.pipeline_mode<synchronous>, transform_indices = @transform_2, window_bounds = array<i64: 1, 64>}, {transform_indices = @transform_3, window_bounds = array<i64: 16, 64>}]} {
    %c0 = arith.constant 0 : index
    %c0_0 = arith.constant 0 : index
    %0 = vector.load %arg1[%c0, %c0_0] : memref<16x16xf32, #tpu.memory_space<vmem>>, vector<16x16xf32>
    %1 = arith.truncf %0 : vector<16x16xf32> to vector<16x16xbf16>
    %c0_1 = arith.constant 0 : index
    %c0_2 = arith.constant 0 : index
    %2 = vector.load %arg2[%c0_1, %c0_2] : memref<16x64xbf16, #tpu.memory_space<vmem>>, vector<16x64xbf16>
    %cst = arith.constant dense<0.000000e+00> : vector<16x64xf32>
    %3 = tpu.matmul %1, %2, %cst {dimension_numbers = #tpu.dot_dimension_numbers<[1], [0], [0], [1], [0, 0, 1, 1], [], []>} : vector<16x16xbf16>, vector<16x64xbf16>, vector<16x64xf32> -> vector<16x64xf32>
    %c0_3 = arith.constant 0 : index
    %c0_4 = arith.constant 0 : index
    %4 = vector.load %arg3[%c0_3, %c0_4] : memref<1x64xf32, #tpu.memory_space<vmem>>, vector<1x64xf32>
    %5 = vector.broadcast %4 : vector<1x64xf32> to vector<16x64xf32>
    %6 = arith.addf %3, %5 : vector<16x64xf32>
    %c0_5 = arith.constant 0 : index
    %c0_6 = arith.constant 0 : index
    %7 = vector.load %arg4[%c0_5, %c0_6] : memref<16x64xf32, #tpu.memory_space<vmem>>, vector<16x64xf32>
    tpu.vector_store %arg4[%c0_5, %c0_6], %6 {strides = array<i32>} : memref<16x64xf32, #tpu.memory_space<vmem>>, vector<16x64xf32>,
    return
  }
  func.func @transform_0(%arg0: i32) -> (i32, i32) {
    %c0_i32 = arith.constant 0 : i32
    %c0_i32_0 = arith.constant 0 : i32
    return %arg0, %c0_i32 : i32, i32
  }
  func.func @transform_1(%arg0: i32) -> (i32, i32) {
    %c0_i32 = arith.constant 0 : i32
    %c0_i32_0 = arith.constant 0 : i32
    %c0_i32_1 = arith.constant 0 : i32
    return %c0_i32, %c0_i32_0 : i32, i32
  }
  func.func @transform_2(%arg0: i32) -> (i32, i32) {
    %c0_i32 = arith.constant 0 : i32
    %c0_i32_0 = arith.constant 0 : i32
    %c0_i32_1 = arith.constant 0 : i32
    return %c0_i32, %c0_i32_0 : i32, i32
  }
  func.func @transform_3(%arg0: i32) -> (i32, i32) {
    %c0_i32 = arith.constant 0 : i32
    %c0_i32_0 = arith.constant 0 : i32
    return %arg0, %c0_i32 : i32, i32
  }
}

module attributes {stable_mosaic.version = 11 : i64} {
  func.func @_ga_kernel(%arg0: i32, %arg1: memref<1x4x16xf32, #tpu.memory_space<vmem>>, %arg2: memref<4x16xf32, #tpu.memory_space<vmem>>, %arg3: memref<1x16xf32, #tpu.memory_space<vmem>>, %arg4: memref<1x16xf32, #tpu.memory_space<vmem>>, %arg5: memref<16x48xbf16, #tpu.memory_space<vmem>>, %arg6: memref<1x48xf32, #tpu.memory_space<vmem>>, %arg7: memref<16x16xbf16, #tpu.memory_space<vmem>>, %arg8: memref<1x16xf32, #tpu.memory_space<vmem>>, %arg9: memref<1x16xf32, #tpu.memory_space<vmem>>, %arg10: memref<1x16xf32, #tpu.memory_space<vmem>>, %arg11: memref<1x4x16xf32, #tpu.memory_space<vmem>>) attributes {dimension_semantics = [#tpu.dimension_semantics<parallel>], iteration_bounds = array<i64: 4>, scalar_prefetch = 0 : i64, scratch_operands = 0 : i64, tpu.core_type = #tpu.core_type<tc>, window_params = [{transform_indices = @transform_0, window_bounds = array<i64: 1, 4, 16>}, {pipeline_mode = #tpu.pipeline_mode<synchronous>, transform_indices = @transform_1, window_bounds = array<i64: 4, 16>}, {pipeline_mode = #tpu.pipeline_mode<synchronous>, transform_indices = @transform_2, window_bounds = array<i64: 1, 16>}, {pipeline_mode = #tpu.pipeline_mode<synchronous>, transform_indices = @transform_3, window_bounds = array<i64: 1, 16>}, {pipeline_mode = #tpu.pipeline_mode<synchronous>, transform_indices = @transform_4, window_bounds = array<i64: 16, 48>}, {pipeline_mode = #tpu.pipeline_mode<synchronous>, transform_indices = @transform_5, window_bounds = array<i64: 1, 48>}, {pipeline_mode = #tpu.pipeline_mode<synchronous>, transform_indices = @transform_6, window_bounds = array<i64: 16, 16>}, {pipeline_mode = #tpu.pipeline_mode<synchronous>, transform_indices = @transform_7, window_bounds = array<i64: 1, 16>}, {pipeline_mode = #tpu.pipeline_mode<synchronous>, transform_indices = @transform_8, window_bounds = array<i64: 1, 16>}, {pipeline_mode = #tpu.pipeline_mode<synchronous>, transform_indices = @transform_9, window_bounds = array<i64: 1, 16>}, {transform_indices = @transform_10, window_bounds = array<i64: 1, 4, 16>}]} {
    %c0 = arith.constant 0 : index
    %c0_0 = arith.constant 0 : index
    %c0_1 = arith.constant 0 : index
    %0 = vector.load %arg1[%c0, %c0_0, %c0_1] : memref<1x4x16xf32, #tpu.memory_space<vmem>>, vector<1x4x16xf32>
    %1 = vector.shape_cast %0 : vector<1x4x16xf32> to vector<4x16xf32>
    %c0_2 = arith.constant 0 : index
    %c0_3 = arith.constant 0 : index
    %2 = vector.load %arg3[%c0_2, %c0_3] : memref<1x16xf32, #tpu.memory_space<vmem>>, vector<1x16xf32>
    %c0_4 = arith.constant 0 : index
    %c0_5 = arith.constant 0 : index
    %3 = vector.load %arg4[%c0_4, %c0_5] : memref<1x16xf32, #tpu.memory_space<vmem>>, vector<1x16xf32>
    %cst = arith.constant dense<0.000000e+00> : vector<4xf32>
    %4 = vector.multi_reduction <add>, %1, %cst [1] : vector<4x16xf32> to vector<4xf32>
    %5 = vector.shape_cast %4 : vector<4xf32> to vector<4x1xf32>
    %cst_6 = arith.constant 1.600000e+01 : f32
    %6 = vector.broadcast %cst_6 : f32 to vector<4x1xf32>
    %7 = arith.divf %5, %6 : vector<4x1xf32>
    %8 = vector.broadcast %7 : vector<4x1xf32> to vector<4x16xf32>
    %9 = arith.subf %1, %8 : vector<4x16xf32>
    %10 = arith.mulf %9, %9 : vector<4x16xf32>
    %cst_7 = arith.constant dense<0.000000e+00> : vector<4xf32>
    %11 = vector.multi_reduction <add>, %10, %cst_7 [1] : vector<4x16xf32> to vector<4xf32>
    %12 = vector.shape_cast %11 : vector<4xf32> to vector<4x1xf32>
    %cst_8 = arith.constant 1.600000e+01 : f32
    %13 = vector.broadcast %cst_8 : f32 to vector<4x1xf32>
    %14 = arith.divf %12, %13 : vector<4x1xf32>
    %15 = vector.broadcast %7 : vector<4x1xf32> to vector<4x16xf32>
    %16 = arith.subf %1, %15 : vector<4x16xf32>
    %cst_9 = arith.constant 9.99999974E-6 : f32
    %17 = vector.broadcast %cst_9 : f32 to vector<4x1xf32>
    %18 = arith.addf %14, %17 : vector<4x1xf32>
    %19 = math.rsqrt %18 : vector<4x1xf32>
    %20 = vector.broadcast %19 : vector<4x1xf32> to vector<4x16xf32>
    %21 = arith.mulf %16, %20 : vector<4x16xf32>
    %22 = vector.broadcast %2 : vector<1x16xf32> to vector<4x16xf32>
    %23 = arith.mulf %21, %22 : vector<4x16xf32>
    %24 = vector.broadcast %3 : vector<1x16xf32> to vector<4x16xf32>
    %25 = arith.addf %23, %24 : vector<4x16xf32>
    %26 = arith.addf %25, %1 : vector<4x16xf32>
    %c0_10 = arith.constant 0 : index
    %c0_11 = arith.constant 0 : index
    %27 = vector.load %arg2[%c0_10, %c0_11] : memref<4x16xf32, #tpu.memory_space<vmem>>, vector<4x16xf32>
    %28 = arith.addf %26, %27 : vector<4x16xf32>
    %29 = arith.truncf %28 : vector<4x16xf32> to vector<4x16xbf16>
    %c0_12 = arith.constant 0 : index
    %c0_13 = arith.constant 0 : index
    %30 = vector.load %arg5[%c0_12, %c0_13] : memref<16x48xbf16, #tpu.memory_space<vmem>>, vector<16x48xbf16>
    %cst_14 = arith.constant dense<0.000000e+00> : vector<4x48xf32>
    %31 = tpu.matmul %29, %30, %cst_14 {dimension_numbers = #tpu.dot_dimension_numbers<[1], [0], [0], [1], [0, 0, 1, 1], [], []>} : vector<4x16xbf16>, vector<16x48xbf16>, vector<4x48xf32> -> vector<4x48xf32>
    %c0_15 = arith.constant 0 : index
    %c0_16 = arith.constant 0 : index
    %32 = vector.load %arg6[%c0_15, %c0_16] : memref<1x48xf32, #tpu.memory_space<vmem>>, vector<1x48xf32>
    %33 = vector.broadcast %32 : vector<1x48xf32> to vector<4x48xf32>
    %34 = arith.addf %31, %33 : vector<4x48xf32>
    %35 = vector.extract_strided_slice %34 {offsets = [0, 0], sizes = [4, 4], strides = [1, 1]} : vector<4x48xf32> to vector<4x4xf32>
    %36 = arith.truncf %35 : vector<4x4xf32> to vector<4x4xbf16>
    %37 = vector.extract_strided_slice %34 {offsets = [0, 16], sizes = [4, 4], strides = [1, 1]} : vector<4x48xf32> to vector<4x4xf32>
    %38 = arith.truncf %37 : vector<4x4xf32> to vector<4x4xbf16>
    %39 = vector.extract_strided_slice %34 {offsets = [0, 32], sizes = [4, 4], strides = [1, 1]} : vector<4x48xf32> to vector<4x4xf32>
    %40 = arith.truncf %39 : vector<4x4xf32> to vector<4x4xbf16>
    %cst_17 = arith.constant dense<0.000000e+00> : vector<4x4xf32>
    %41 = tpu.matmul %36, %38, %cst_17 {dimension_numbers = #tpu.dot_dimension_numbers<[1], [1], [0], [0], [0, 0, 1, 0], [], []>} : vector<4x4xbf16>, vector<4x4xbf16>, vector<4x4xf32> -> vector<4x4xf32>
    %cst_18 = arith.constant 5.000000e-01 : f32
    %42 = vector.broadcast %cst_18 : f32 to vector<4x4xf32>
    %43 = arith.mulf %41, %42 : vector<4x4xf32>
    %cst_19 = arith.constant dense<0xFF800000> : vector<4xf32>
    %44 = vector.multi_reduction <maximumf>, %43, %cst_19 [1] : vector<4x4xf32> to vector<4xf32>
    %45 = vector.shape_cast %44 : vector<4xf32> to vector<4x1xf32>
    %46 = vector.broadcast %45 : vector<4x1xf32> to vector<4x4xf32>
    %47 = arith.subf %43, %46 : vector<4x4xf32>
    %48 = math.exp %47 : vector<4x4xf32>
    %cst_20 = arith.constant dense<0.000000e+00> : vector<4xf32>
    %49 = vector.multi_reduction <add>, %48, %cst_20 [1] : vector<4x4xf32> to vector<4xf32>
    %50 = vector.shape_cast %49 : vector<4xf32> to vector<4x1xf32>
    %51 = tpu.reciprocal %50 {approx = true} : vector<4x1xf32> -> vector<4x1xf32>
    %52 = vector.broadcast %51 : vector<4x1xf32> to vector<4x4xf32>
    %53 = arith.mulf %48, %52 : vector<4x4xf32>
    %54 = arith.truncf %53 : vector<4x4xf32> to vector<4x4xbf16>
    %cst_21 = arith.constant dense<0.000000e+00> : vector<4x4xf32>
    %55 = tpu.matmul %54, %40, %cst_21 {dimension_numbers = #tpu.dot_dimension_numbers<[1], [0], [0], [1], [0, 0, 1, 1], [], []>} : vector<4x4xbf16>, vector<4x4xbf16>, vector<4x4xf32> -> vector<4x4xf32>
    %56 = vector.extract_strided_slice %34 {offsets = [0, 4], sizes = [4, 4], strides = [1, 1]} : vector<4x48xf32> to vector<4x4xf32>
    %57 = arith.truncf %56 : vector<4x4xf32> to vector<4x4xbf16>
    %58 = vector.extract_strided_slice %34 {offsets = [0, 20], sizes = [4, 4], strides = [1, 1]} : vector<4x48xf32> to vector<4x4xf32>
    %59 = arith.truncf %58 : vector<4x4xf32> to vector<4x4xbf16>
    %60 = vector.extract_strided_slice %34 {offsets = [0, 36], sizes = [4, 4], strides = [1, 1]} : vector<4x48xf32> to vector<4x4xf32>
    %61 = arith.truncf %60 : vector<4x4xf32> to vector<4x4xbf16>
    %cst_22 = arith.constant dense<0.000000e+00> : vector<4x4xf32>
    %62 = tpu.matmul %57, %59, %cst_22 {dimension_numbers = #tpu.dot_dimension_numbers<[1], [1], [0], [0], [0, 0, 1, 0], [], []>} : vector<4x4xbf16>, vector<4x4xbf16>, vector<4x4xf32> -> vector<4x4xf32>
    %cst_23 = arith.constant 5.000000e-01 : f32
    %63 = vector.broadcast %cst_23 : f32 to vector<4x4xf32>
    %64 = arith.mulf %62, %63 : vector<4x4xf32>
    %cst_24 = arith.constant dense<0xFF800000> : vector<4xf32>
    %65 = vector.multi_reduction <maximumf>, %64, %cst_24 [1] : vector<4x4xf32> to vector<4xf32>
    %66 = vector.shape_cast %65 : vector<4xf32> to vector<4x1xf32>
    %67 = vector.broadcast %66 : vector<4x1xf32> to vector<4x4xf32>
    %68 = arith.subf %64, %67 : vector<4x4xf32>
    %69 = math.exp %68 : vector<4x4xf32>
    %cst_25 = arith.constant dense<0.000000e+00> : vector<4xf32>
    %70 = vector.multi_reduction <add>, %69, %cst_25 [1] : vector<4x4xf32> to vector<4xf32>
    %71 = vector.shape_cast %70 : vector<4xf32> to vector<4x1xf32>
    %72 = tpu.reciprocal %71 {approx = true} : vector<4x1xf32> -> vector<4x1xf32>
    %73 = vector.broadcast %72 : vector<4x1xf32> to vector<4x4xf32>
    %74 = arith.mulf %69, %73 : vector<4x4xf32>
    %75 = arith.truncf %74 : vector<4x4xf32> to vector<4x4xbf16>
    %cst_26 = arith.constant dense<0.000000e+00> : vector<4x4xf32>
    %76 = tpu.matmul %75, %61, %cst_26 {dimension_numbers = #tpu.dot_dimension_numbers<[1], [0], [0], [1], [0, 0, 1, 1], [], []>} : vector<4x4xbf16>, vector<4x4xbf16>, vector<4x4xf32> -> vector<4x4xf32>
    %77 = vector.extract_strided_slice %34 {offsets = [0, 8], sizes = [4, 4], strides = [1, 1]} : vector<4x48xf32> to vector<4x4xf32>
    %78 = arith.truncf %77 : vector<4x4xf32> to vector<4x4xbf16>
    %79 = vector.extract_strided_slice %34 {offsets = [0, 24], sizes = [4, 4], strides = [1, 1]} : vector<4x48xf32> to vector<4x4xf32>
    %80 = arith.truncf %79 : vector<4x4xf32> to vector<4x4xbf16>
    %81 = vector.extract_strided_slice %34 {offsets = [0, 40], sizes = [4, 4], strides = [1, 1]} : vector<4x48xf32> to vector<4x4xf32>
    %82 = arith.truncf %81 : vector<4x4xf32> to vector<4x4xbf16>
    %cst_27 = arith.constant dense<0.000000e+00> : vector<4x4xf32>
    %83 = tpu.matmul %78, %80, %cst_27 {dimension_numbers = #tpu.dot_dimension_numbers<[1], [1], [0], [0], [0, 0, 1, 0], [], []>} : vector<4x4xbf16>, vector<4x4xbf16>, vector<4x4xf32> -> vector<4x4xf32>
    %cst_28 = arith.constant 5.000000e-01 : f32
    %84 = vector.broadcast %cst_28 : f32 to vector<4x4xf32>
    %85 = arith.mulf %83, %84 : vector<4x4xf32>
    %cst_29 = arith.constant dense<0xFF800000> : vector<4xf32>
    %86 = vector.multi_reduction <maximumf>, %85, %cst_29 [1] : vector<4x4xf32> to vector<4xf32>
    %87 = vector.shape_cast %86 : vector<4xf32> to vector<4x1xf32>
    %88 = vector.broadcast %87 : vector<4x1xf32> to vector<4x4xf32>
    %89 = arith.subf %85, %88 : vector<4x4xf32>
    %90 = math.exp %89 : vector<4x4xf32>
    %cst_30 = arith.constant dense<0.000000e+00> : vector<4xf32>
    %91 = vector.multi_reduction <add>, %90, %cst_30 [1] : vector<4x4xf32> to vector<4xf32>
    %92 = vector.shape_cast %91 : vector<4xf32> to vector<4x1xf32>
    %93 = tpu.reciprocal %92 {approx = true} : vector<4x1xf32> -> vector<4x1xf32>
    %94 = vector.broadcast %93 : vector<4x1xf32> to vector<4x4xf32>
    %95 = arith.mulf %90, %94 : vector<4x4xf32>
    %96 = arith.truncf %95 : vector<4x4xf32> to vector<4x4xbf16>
    %cst_31 = arith.constant dense<0.000000e+00> : vector<4x4xf32>
    %97 = tpu.matmul %96, %82, %cst_31 {dimension_numbers = #tpu.dot_dimension_numbers<[1], [0], [0], [1], [0, 0, 1, 1], [], []>} : vector<4x4xbf16>, vector<4x4xbf16>, vector<4x4xf32> -> vector<4x4xf32>
    %98 = vector.extract_strided_slice %34 {offsets = [0, 12], sizes = [4, 4], strides = [1, 1]} : vector<4x48xf32> to vector<4x4xf32>
    %99 = arith.truncf %98 : vector<4x4xf32> to vector<4x4xbf16>
    %100 = vector.extract_strided_slice %34 {offsets = [0, 28], sizes = [4, 4], strides = [1, 1]} : vector<4x48xf32> to vector<4x4xf32>
    %101 = arith.truncf %100 : vector<4x4xf32> to vector<4x4xbf16>
    %102 = vector.extract_strided_slice %34 {offsets = [0, 44], sizes = [4, 4], strides = [1, 1]} : vector<4x48xf32> to vector<4x4xf32>
    %103 = arith.truncf %102 : vector<4x4xf32> to vector<4x4xbf16>
    %cst_32 = arith.constant dense<0.000000e+00> : vector<4x4xf32>
    %104 = tpu.matmul %99, %101, %cst_32 {dimension_numbers = #tpu.dot_dimension_numbers<[1], [1], [0], [0], [0, 0, 1, 0], [], []>} : vector<4x4xbf16>, vector<4x4xbf16>, vector<4x4xf32> -> vector<4x4xf32>
    %cst_33 = arith.constant 5.000000e-01 : f32
    %105 = vector.broadcast %cst_33 : f32 to vector<4x4xf32>
    %106 = arith.mulf %104, %105 : vector<4x4xf32>
    %cst_34 = arith.constant dense<0xFF800000> : vector<4xf32>
    %107 = vector.multi_reduction <maximumf>, %106, %cst_34 [1] : vector<4x4xf32> to vector<4xf32>
    %108 = vector.shape_cast %107 : vector<4xf32> to vector<4x1xf32>
    %109 = vector.broadcast %108 : vector<4x1xf32> to vector<4x4xf32>
    %110 = arith.subf %106, %109 : vector<4x4xf32>
    %111 = math.exp %110 : vector<4x4xf32>
    %cst_35 = arith.constant dense<0.000000e+00> : vector<4xf32>
    %112 = vector.multi_reduction <add>, %111, %cst_35 [1] : vector<4x4xf32> to vector<4xf32>
    %113 = vector.shape_cast %112 : vector<4xf32> to vector<4x1xf32>
    %114 = tpu.reciprocal %113 {approx = true} : vector<4x1xf32> -> vector<4x1xf32>
    %115 = vector.broadcast %114 : vector<4x1xf32> to vector<4x4xf32>
    %116 = arith.mulf %111, %115 : vector<4x4xf32>
    %117 = arith.truncf %116 : vector<4x4xf32> to vector<4x4xbf16>
    %cst_36 = arith.constant dense<0.000000e+00> : vector<4x4xf32>
    %118 = tpu.matmul %117, %103, %cst_36 {dimension_numbers = #tpu.dot_dimension_numbers<[1], [0], [0], [1], [0, 0, 1, 1], [], []>} : vector<4x4xbf16>, vector<4x4xbf16>, vector<4x4xf32> -> vector<4x4xf32>
    %119 = tpu.concatenate %55, %76, %97, %118 in 1 : vector<4x4xf32>, vector<4x4xf32>, vector<4x4xf32>, vector<4x4xf32> -> vector<4x16xf32>
    %120 = arith.truncf %119 : vector<4x16xf32> to vector<4x16xbf16>
    %c0_37 = arith.constant 0 : index
    %c0_38 = arith.constant 0 : index
    %121 = vector.load %arg7[%c0_37, %c0_38] : memref<16x16xbf16, #tpu.memory_space<vmem>>, vector<16x16xbf16>
    %cst_39 = arith.constant dense<0.000000e+00> : vector<4x16xf32>
    %122 = tpu.matmul %120, %121, %cst_39 {dimension_numbers = #tpu.dot_dimension_numbers<[1], [0], [0], [1], [0, 0, 1, 1], [], []>} : vector<4x16xbf16>, vector<16x16xbf16>, vector<4x16xf32> -> vector<4x16xf32>
    %c0_40 = arith.constant 0 : index
    %c0_41 = arith.constant 0 : index
    %123 = vector.load %arg8[%c0_40, %c0_41] : memref<1x16xf32, #tpu.memory_space<vmem>>, vector<1x16xf32>
    %124 = vector.broadcast %123 : vector<1x16xf32> to vector<4x16xf32>
    %125 = arith.addf %122, %124 : vector<4x16xf32>
    %126 = arith.addf %125, %28 : vector<4x16xf32>
    %c0_42 = arith.constant 0 : index
    %c0_43 = arith.constant 0 : index
    %127 = vector.load %arg9[%c0_42, %c0_43] : memref<1x16xf32, #tpu.memory_space<vmem>>, vector<1x16xf32>
    %c0_44 = arith.constant 0 : index
    %c0_45 = arith.constant 0 : index
    %128 = vector.load %arg10[%c0_44, %c0_45] : memref<1x16xf32, #tpu.memory_space<vmem>>, vector<1x16xf32>
    %cst_46 = arith.constant dense<0.000000e+00> : vector<4xf32>
    %129 = vector.multi_reduction <add>, %126, %cst_46 [1] : vector<4x16xf32> to vector<4xf32>
    %130 = vector.shape_cast %129 : vector<4xf32> to vector<4x1xf32>
    %cst_47 = arith.constant 1.600000e+01 : f32
    %131 = vector.broadcast %cst_47 : f32 to vector<4x1xf32>
    %132 = arith.divf %130, %131 : vector<4x1xf32>
    %133 = vector.broadcast %132 : vector<4x1xf32> to vector<4x16xf32>
    %134 = arith.subf %126, %133 : vector<4x16xf32>
    %135 = arith.mulf %134, %134 : vector<4x16xf32>
    %cst_48 = arith.constant dense<0.000000e+00> : vector<4xf32>
    %136 = vector.multi_reduction <add>, %135, %cst_48 [1] : vector<4x16xf32> to vector<4xf32>
    %137 = vector.shape_cast %136 : vector<4xf32> to vector<4x1xf32>
    %cst_49 = arith.constant 1.600000e+01 : f32
    %138 = vector.broadcast %cst_49 : f32 to vector<4x1xf32>
    %139 = arith.divf %137, %138 : vector<4x1xf32>
    %140 = vector.broadcast %132 : vector<4x1xf32> to vector<4x16xf32>
    %141 = arith.subf %126, %140 : vector<4x16xf32>
    %cst_50 = arith.constant 9.99999974E-6 : f32
    %142 = vector.broadcast %cst_50 : f32 to vector<4x1xf32>
    %143 = arith.addf %139, %142 : vector<4x1xf32>
    %144 = math.rsqrt %143 : vector<4x1xf32>
    %145 = vector.broadcast %144 : vector<4x1xf32> to vector<4x16xf32>
    %146 = arith.mulf %141, %145 : vector<4x16xf32>
    %147 = vector.broadcast %127 : vector<1x16xf32> to vector<4x16xf32>
    %148 = arith.mulf %146, %147 : vector<4x16xf32>
    %149 = vector.broadcast %128 : vector<1x16xf32> to vector<4x16xf32>
    %150 = arith.addf %148, %149 : vector<4x16xf32>
    %151 = arith.addf %150, %1 : vector<4x16xf32>
    %c0_51 = arith.constant 0 : index
    %c0_52 = arith.constant 0 : index
    %c0_53 = arith.constant 0 : index
    %152 = vector.load %arg11[%c0_51, %c0_52, %c0_53] : memref<1x4x16xf32, #tpu.memory_space<vmem>>, vector<1x4x16xf32>
    %153 = vector.shape_cast %152 : vector<1x4x16xf32> to vector<4x16xf32>
    %154 = vector.shape_cast %151 : vector<4x16xf32> to vector<1x4x16xf32>
    tpu.vector_store %arg11[%c0_51, %c0_52, %c0_53], %154 {strides = array<i32>} : memref<1x4x16xf32, #tpu.memory_space<vmem>>, vector<1x4x16xf32>,
    return
  }
  func.func @transform_0(%arg0: i32) -> (i32, i32, i32) {
    %c0_i32 = arith.constant 0 : i32
    %c0_i32_0 = arith.constant 0 : i32
    %c0_i32_1 = arith.constant 0 : i32
    return %arg0, %c0_i32, %c0_i32_0 : i32, i32, i32
  }
  func.func @transform_1(%arg0: i32) -> (i32, i32) {
    %c0_i32 = arith.constant 0 : i32
    %c0_i32_0 = arith.constant 0 : i32
    %c0_i32_1 = arith.constant 0 : i32
    return %c0_i32, %c0_i32_0 : i32, i32
  }
  func.func @transform_2(%arg0: i32) -> (i32, i32) {
    %c0_i32 = arith.constant 0 : i32
    %c0_i32_0 = arith.constant 0 : i32
    %c0_i32_1 = arith.constant 0 : i32
    return %c0_i32, %c0_i32_0 : i32, i32
  }
  func.func @transform_3(%arg0: i32) -> (i32, i32) {
    %c0_i32 = arith.constant 0 : i32
    %c0_i32_0 = arith.constant 0 : i32
    %c0_i32_1 = arith.constant 0 : i32
    return %c0_i32, %c0_i32_0 : i32, i32
  }
  func.func @transform_4(%arg0: i32) -> (i32, i32) {
    %c0_i32 = arith.constant 0 : i32
    %c0_i32_0 = arith.constant 0 : i32
    %c0_i32_1 = arith.constant 0 : i32
    return %c0_i32, %c0_i32_0 : i32, i32
  }
  func.func @transform_5(%arg0: i32) -> (i32, i32) {
    %c0_i32 = arith.constant 0 : i32
    %c0_i32_0 = arith.constant 0 : i32
    %c0_i32_1 = arith.constant 0 : i32
    return %c0_i32, %c0_i32_0 : i32, i32
  }
  func.func @transform_6(%arg0: i32) -> (i32, i32) {
    %c0_i32 = arith.constant 0 : i32
    %c0_i32_0 = arith.constant 0 : i32
    %c0_i32_1 = arith.constant 0 : i32
    return %c0_i32, %c0_i32_0 : i32, i32
  }
  func.func @transform_7(%arg0: i32) -> (i32, i32) {
    %c0_i32 = arith.constant 0 : i32
    %c0_i32_0 = arith.constant 0 : i32
    %c0_i32_1 = arith.constant 0 : i32
    return %c0_i32, %c0_i32_0 : i32, i32
  }
  func.func @transform_8(%arg0: i32) -> (i32, i32) {
    %c0_i32 = arith.constant 0 : i32
    %c0_i32_0 = arith.constant 0 : i32
    %c0_i32_1 = arith.constant 0 : i32
    return %c0_i32, %c0_i32_0 : i32, i32
  }
  func.func @transform_9(%arg0: i32) -> (i32, i32) {
    %c0_i32 = arith.constant 0 : i32
    %c0_i32_0 = arith.constant 0 : i32
    %c0_i32_1 = arith.constant 0 : i32
    return %c0_i32, %c0_i32_0 : i32, i32
  }
  func.func @transform_10(%arg0: i32) -> (i32, i32, i32) {
    %c0_i32 = arith.constant 0 : i32
    %c0_i32_0 = arith.constant 0 : i32
    %c0_i32_1 = arith.constant 0 : i32
    return %arg0, %c0_i32, %c0_i32_0 : i32, i32, i32
  }
}

module attributes {stable_mosaic.version = 11 : i64} {
  func.func @_mm_kernel(%arg0: i32, %arg1: memref<64x16xf32, #tpu.memory_space<vmem>>, %arg2: memref<16x32xbf16, #tpu.memory_space<vmem>>, %arg3: memref<1x32xf32, #tpu.memory_space<vmem>>, %arg4: memref<64x32xf32, #tpu.memory_space<vmem>>) attributes {dimension_semantics = [#tpu.dimension_semantics<parallel>], iteration_bounds = array<i64: 1>, scalar_prefetch = 0 : i64, scratch_operands = 0 : i64, tpu.core_type = #tpu.core_type<tc>, window_params = [{transform_indices = @transform_0, window_bounds = array<i64: 64, 16>}, {pipeline_mode = #tpu.pipeline_mode<synchronous>, transform_indices = @transform_1, window_bounds = array<i64: 16, 32>}, {pipeline_mode = #tpu.pipeline_mode<synchronous>, transform_indices = @transform_2, window_bounds = array<i64: 1, 32>}, {transform_indices = @transform_3, window_bounds = array<i64: 64, 32>}]} {
    %c0 = arith.constant 0 : index
    %c0_0 = arith.constant 0 : index
    %0 = vector.load %arg1[%c0, %c0_0] : memref<64x16xf32, #tpu.memory_space<vmem>>, vector<64x16xf32>
    %1 = arith.truncf %0 : vector<64x16xf32> to vector<64x16xbf16>
    %c0_1 = arith.constant 0 : index
    %c0_2 = arith.constant 0 : index
    %2 = vector.load %arg2[%c0_1, %c0_2] : memref<16x32xbf16, #tpu.memory_space<vmem>>, vector<16x32xbf16>
    %cst = arith.constant dense<0.000000e+00> : vector<64x32xf32>
    %3 = tpu.matmul %1, %2, %cst {dimension_numbers = #tpu.dot_dimension_numbers<[1], [0], [0], [1], [0, 0, 1, 1], [], []>} : vector<64x16xbf16>, vector<16x32xbf16>, vector<64x32xf32> -> vector<64x32xf32>
    %c0_3 = arith.constant 0 : index
    %c0_4 = arith.constant 0 : index
    %4 = vector.load %arg3[%c0_3, %c0_4] : memref<1x32xf32, #tpu.memory_space<vmem>>, vector<1x32xf32>
    %5 = vector.broadcast %4 : vector<1x32xf32> to vector<64x32xf32>
    %6 = arith.addf %3, %5 : vector<64x32xf32>
    %c0_5 = arith.constant 0 : index
    %c0_6 = arith.constant 0 : index
    %7 = vector.load %arg4[%c0_5, %c0_6] : memref<64x32xf32, #tpu.memory_space<vmem>>, vector<64x32xf32>
    tpu.vector_store %arg4[%c0_5, %c0_6], %6 {strides = array<i32>} : memref<64x32xf32, #tpu.memory_space<vmem>>, vector<64x32xf32>,
    return
  }
  func.func @transform_0(%arg0: i32) -> (i32, i32) {
    %c0_i32 = arith.constant 0 : i32
    %c0_i32_0 = arith.constant 0 : i32
    return %arg0, %c0_i32 : i32, i32
  }
  func.func @transform_1(%arg0: i32) -> (i32, i32) {
    %c0_i32 = arith.constant 0 : i32
    %c0_i32_0 = arith.constant 0 : i32
    %c0_i32_1 = arith.constant 0 : i32
    return %c0_i32, %c0_i32_0 : i32, i32
  }
  func.func @transform_2(%arg0: i32) -> (i32, i32) {
    %c0_i32 = arith.constant 0 : i32
    %c0_i32_0 = arith.constant 0 : i32
    %c0_i32_1 = arith.constant 0 : i32
    return %c0_i32, %c0_i32_0 : i32, i32
  }
  func.func @transform_3(%arg0: i32) -> (i32, i32) {
    %c0_i32 = arith.constant 0 : i32
    %c0_i32_0 = arith.constant 0 : i32
    return %arg0, %c0_i32 : i32, i32
  }
}

module attributes {stable_mosaic.version = 11 : i64} {
  func.func @_mask_mm_kernel(%arg0: i32, %arg1: i32, %arg2: memref<1x16x16xf32, #tpu.memory_space<vmem>>, %arg3: memref<16x16xf32, #tpu.memory_space<vmem>>, %arg4: memref<16x16xbf16, #tpu.memory_space<vmem>>, %arg5: memref<1x16x16xf32, #tpu.memory_space<vmem>>) attributes {dimension_semantics = [#tpu.dimension_semantics<parallel>, #tpu.dimension_semantics<parallel>], iteration_bounds = array<i64: 2, 1>, scalar_prefetch = 0 : i64, scratch_operands = 0 : i64, tpu.core_type = #tpu.core_type<tc>, window_params = [{transform_indices = @transform_0, window_bounds = array<i64: 1, 16, 16>}, {transform_indices = @transform_1, window_bounds = array<i64: 16, 16>}, {pipeline_mode = #tpu.pipeline_mode<synchronous>, transform_indices = @transform_2, window_bounds = array<i64: 16, 16>}, {transform_indices = @transform_3, window_bounds = array<i64: 1, 16, 16>}]} {
    %c0 = arith.constant 0 : index
    %c0_0 = arith.constant 0 : index
    %c0_1 = arith.constant 0 : index
    %0 = vector.load %arg2[%c0, %c0_0, %c0_1] : memref<1x16x16xf32, #tpu.memory_space<vmem>>, vector<1x16x16xf32>
    %1 = vector.shape_cast %0 : vector<1x16x16xf32> to vector<16x16xf32>
    %c0_2 = arith.constant 0 : index
    %c0_3 = arith.constant 0 : index
    %2 = vector.load %arg3[%c0_2, %c0_3] : memref<16x16xf32, #tpu.memory_space<vmem>>, vector<16x16xf32>
    %3 = arith.mulf %1, %2 : vector<16x16xf32>
    %4 = arith.truncf %3 : vector<16x16xf32> to vector<16x16xbf16>
    %c0_4 = arith.constant 0 : index
    %c0_5 = arith.constant 0 : index
    %5 = vector.load %arg4[%c0_4, %c0_5] : memref<16x16xbf16, #tpu.memory_space<vmem>>, vector<16x16xbf16>
    %cst = arith.constant dense<0.000000e+00> : vector<16x16xf32>
    %6 = tpu.matmul %4, %5, %cst {dimension_numbers = #tpu.dot_dimension_numbers<[1], [0], [0], [1], [0, 0, 1, 1], [], []>} : vector<16x16xbf16>, vector<16x16xbf16>, vector<16x16xf32> -> vector<16x16xf32>
    %c0_6 = arith.constant 0 : index
    %c0_7 = arith.constant 0 : index
    %c0_8 = arith.constant 0 : index
    %7 = vector.load %arg5[%c0_6, %c0_7, %c0_8] : memref<1x16x16xf32, #tpu.memory_space<vmem>>, vector<1x16x16xf32>
    %8 = vector.shape_cast %7 : vector<1x16x16xf32> to vector<16x16xf32>
    %9 = vector.shape_cast %6 : vector<16x16xf32> to vector<1x16x16xf32>
    tpu.vector_store %arg5[%c0_6, %c0_7, %c0_8], %9 {strides = array<i32>} : memref<1x16x16xf32, #tpu.memory_space<vmem>>, vector<1x16x16xf32>,
    return
  }
  func.func @transform_0(%arg0: i32, %arg1: i32) -> (i32, i32, i32) {
    %c0_i32 = arith.constant 0 : i32
    %c0_i32_0 = arith.constant 0 : i32
    return %arg0, %arg1, %c0_i32 : i32, i32, i32
  }
  func.func @transform_1(%arg0: i32, %arg1: i32) -> (i32, i32) {
    %c0_i32 = arith.constant 0 : i32
    %c0_i32_0 = arith.constant 0 : i32
    return %arg1, %c0_i32 : i32, i32
  }
  func.func @transform_2(%arg0: i32, %arg1: i32) -> (i32, i32) {
    %c0_i32 = arith.constant 0 : i32
    %c0_i32_0 = arith.constant 0 : i32
    %c0_i32_1 = arith.constant 0 : i32
    return %c0_i32, %c0_i32_0 : i32, i32
  }
  func.func @transform_3(%arg0: i32, %arg1: i32) -> (i32, i32, i32) {
    %c0_i32 = arith.constant 0 : i32
    %c0_i32_0 = arith.constant 0 : i32
    return %arg0, %arg1, %c0_i32 : i32, i32, i32
  }
}

</mosaic_0001>

<bundles_post_ra>
// kernel: sandglasset_forward.28
= control target key start
LH: loop header
LB: loop body
LE: loop exit
PB: predicated region body
PF: predicated region fallthrough
CT: control target
= control target key end

     0   :  { %v100_v0 = vmov 0.0   ;;  %vm101_vm0 = vmmov 0   ;;  %vm33_vm1 = vcmask 130048   ;;  %s140_s1 = inlined_call_operand.vmem [shape: bf16[16,16], index: 1, kind: input, shape index: {}]   ;;  %s141_s0 = inlined_call_operand.vmem [shape: f32[16,16], index: 0, kind: input, shape index: {}]   ;;  %s142_s2 = inlined_call_operand.vmem [shape: f32[1,16], index: 2, kind: input, shape index: {}]   ;;  %s143_s3 = inlined_call_operand.vmem [shape: f32[16,16], index: 3, kind: output, shape index: {}]  }
   0x1   :  { %91 = vmatprep.subr.bf16.mxu0 %v100_v0  ;;  %v99_v1 = vld [vmem:[%s140_s1] sm:$0xff]   ;;  %93 = vmatprep.mubr.msk.bf16.mxu0 %vm101_vm0, %v100_v0  ;;  %v16_v3 = vld [vmem:[%s141_s0 + $0x8] sm:$0xff] }
   0x2   :  { %v15_v2 = vld [vmem:[%s141_s0] sm:$0xff]  ;;  %92 = vmatpush3.bf16.msra.mxu0 %v99_v1 }
   0x3   :  { %v17_v4 = vpack.c.bf16 %v16_v3, %v15_v2  ;;  %v86_v5 = vld [vmem:[%s142_s2] ss:$0 sm:$0xff] }
   0x5   :  { %94 = vmatmul.mubr.msk.bf16.vlgmr.msra.gmra.mxu0 %vm33_vm1, %v17_v4 }
  0xc5   :  { %v71_v6 = vpop.f32.mrf.mxu0 }
  0xc6   :  { %v72_v7 = vadd.f32 %v86_v5, %v71_v6 }
  0xc7   :  { %v95_v8 = vpop.f32.mrf.mxu0 }
  0xc8   :  { %v78_v9 = vmax.f32 %v72_v7, 0.0 }
  0xc9   :  { %v74_v10 = vpop.f32.mrf.mxu0 }
  0xca   :  { %80 = vst.msk [vmem:[%s143_s3] sm:$0xff] %vm33_vm1, %v78_v9  ;;  %v75_v11 = vadd.f32 %v86_v5, %v74_v10 }
  0xcb   :  { %v96_v12 = vpop.f32.mrf.mxu0 }
  0xcc   :  { %v79_v13 = vmax.f32 %v75_v11, 0.0 }
  0xce   :  { %81 = vst.msk [vmem:[%s143_s3 + $0x8] sm:$0xff] %vm33_vm1, %v79_v13 }

// kernel: sandglasset_forward.29
= control target key start
LH: loop header
LB: loop body
LE: loop exit
PB: predicated region body
PF: predicated region fallthrough
CT: control target
= control target key end

     0   :  { %vm25_vm0 = vcmask 130048   ;;  %v155_v14 = vmov 0.0   ;;  %vm156_vm1 = vmmov 0   ;;  %s218_s0 = inlined_call_operand.vmem [shape: f32[16,16], index: 0, kind: input, shape index: {}]   ;;  %s219_s3 = inlined_call_operand.vmem [shape: bf16[16,16], index: 3, kind: input, shape index: {}]   ;;  %s220_s1 = inlined_call_operand.vmem [shape: f32[1,16], index: 1, kind: input, shape index: {}]   ;;  %s221_s2 = inlined_call_operand.vmem [shape: f32[1,16], index: 2, kind: input, shape index: {}]   ;;  %s222_s4 = inlined_call_operand.vmem [shape: f32[1,16], index: 4, kind: input, shape index: {}]   ;;  %s223_s5 = inlined_call_operand.vmem [shape: f32[16,16], index: 5, kind: output, shape index: {}]  }
   0x1   :  { %v21_v0 = vld [vmem:[%s218_s0] sm:$0xff]  ;;  %v22_v1 = vld [vmem:[%s218_s0 + $0x8] sm:$0xff]  ;;  %142 = vmatprep.subr.bf16.mxu0 %v155_v14  ;;  %144 = vmatprep.mubr.msk.bf16.mxu0 %vm156_vm1, %v155_v14 }
   0x2   :  { %v26_v2 = vsel %vm25_vm0, %v21_v0, 0.0  ;;  %v29_v3 = vsel %vm25_vm0, %v22_v1, 0.0  ;;  %v150_v15 = vld [vmem:[%s219_s3] sm:$0xff]  }
   0x3   :  { %27 = vadd.xlane.f32.xlu0 %v26_v2  ;;  %143 = vmatpush3.bf16.msra.mxu0 %v150_v15  ;;  %v135_v24 = vld [vmem:[%s220_s1] ss:$0 sm:$0xff] }
   0x4   :  { %v136_v28 = vld [vmem:[%s221_s2] ss:$0 sm:$0xff] }
   0x5   :  { %v137_v33 = vld [vmem:[%s222_s4] ss:$0 sm:$0xff] }
   0x7   :  { %30 = vadd.xlane.f32.xlu0 %v29_v3 }
  0x8c   :  { %v28_v4 = vpop.xlane.xlu0 %27 }
  0x8d   :  { %v33_v5 = vmul.f32 0.0625, %v28_v4 }
  0x8f   :  { %v35_v6 = vsub.f32 %v21_v0, %v33_v5 }
  0x90   :  { %v31_v7 = vpop.xlane.xlu0 %30 }
  0x91   :  { %v34_v8 = vmul.f32 0.0625, %v31_v7  ;;  %v37_v9 = vmul.f32 %v35_v6, %v35_v6 }
  0x93   :  { %v36_v10 = vsub.f32 %v22_v1, %v34_v8  ;;  %v39_v11 = vsel %vm25_vm0, %v37_v9, 0.0 }
  0x94   :  { %40 = vadd.xlane.f32.xlu1 %v39_v11 }
  0x95   :  { %v38_v12 = vmul.f32 %v36_v10, %v36_v10 }
  0x97   :  { %v42_v13 = vsel %vm25_vm0, %v38_v12, 0.0 }
  0x98   :  { %43 = vadd.xlane.f32.xlu1 %v42_v13 }
 0x11d   :  { %v41_v16 = vpop.xlane.xlu1 %40 }
 0x11e   :  { %v45_v17 = vmul.f32 0.0625, %v41_v16 }
 0x120   :  { %v47_v18 = vadd.f32 1e-05, %v45_v17 }
 0x121   :  { %v44_v19 = vpop.xlane.xlu1 %43 }
 0x122   :  { %151 = vrsqrt.f32 %v47_v18  ;;  %v46_v20 = vmul.f32 0.0625, %v44_v19 }
 0x124   :  { %v48_v21 = vadd.f32 1e-05, %v46_v20 }
 0x126   :  { %153 = vrsqrt.f32 %v48_v21 }
 0x12f   :  { %v152_v22 = vpop.eup %151 }
 0x130   :  { %v51_v23 = vmul.f32 %v152_v22, %v35_v6 }
 0x132   :  { %v59_v27 = vmul.f32 %v135_v24, %v51_v23 }
 0x133   :  { %v154_v25 = vpop.eup %153 }
 0x134   :  { %v52_v26 = vmul.f32 %v154_v25, %v36_v10  ;;  %v67_v30 = vadd.f32 %v136_v28, %v59_v27 }
 0x136   :  { %v60_v29 = vmul.f32 %v135_v24, %v52_v26 }
 0x138   :  { %v68_v31 = vadd.f32 %v136_v28, %v60_v29 }
 0x13a   :  { %v69_v32 = vpack.c.bf16 %v68_v31, %v67_v30 }
 0x13c   :  { %145 = vmatmul.mubr.msk.bf16.vlgmr.msra.gmra.mxu0 %vm25_vm0, %v69_v32 }
 0x1fc   :  { %v122_v34 = vpop.f32.mrf.mxu0 }
 0x1fd   :  { %v123_v35 = vadd.f32 %v137_v33, %v122_v34 }
 0x1fe   :  { %v146_v36 = vpop.f32.mrf.mxu0 }
 0x1ff   :  { %129 = vst.msk [vmem:[%s223_s5] sm:$0xff] %vm25_vm0, %v123_v35 }
 0x200   :  { %v125_v37 = vpop.f32.mrf.mxu0 }
 0x201   :  { %v126_v38 = vadd.f32 %v137_v33, %v125_v37 }
 0x202   :  { %v147_v39 = vpop.f32.mrf.mxu0 }
 0x203   :  { %130 = vst.msk [vmem:[%s223_s5 + $0x8] sm:$0xff] %vm25_vm0, %v126_v38 }

// kernel: sandglasset_forward.30
= control target key start
LH: loop header
LB: loop body
LE: loop exit
PB: predicated region body
PF: predicated region fallthrough
CT: control target
= control target key end

     0   :  { %vm42_vm0 = vcmask 130048   ;;  %vm152_vm1 = vcmask 519168   ;;  %s291_s1 = inlined_call_operand.vmem [shape: bf16[16,64], index: 1, kind: input, shape index: {}]   ;;  %s292_s0 = inlined_call_operand.vmem [shape: f32[64,16], index: 0, kind: input, shape index: {}]   ;;  %s293_s2 = inlined_call_operand.vmem [shape: f32[1,64], index: 2, kind: input, shape index: {}]   ;;  %s294_s3 = inlined_call_operand.vmem [shape: bf16[64,64], index: 3, kind: output, shape index: {}]  }
   0x1   :  { %v204_v0 = vld [vmem:[%s291_s1] sm:$0xff]   ;;  %v16_v2 = vld [vmem:[%s292_s0 + $0x8] sm:$0xff]  ;;  %v17_v6 = vld [vmem:[%s292_s0 + $0x10] sm:$0xff] }
   0x2   :  { %v15_v1 = vld [vmem:[%s292_s0] sm:$0xff]  ;;  %192 = vmatprep.subr.bf16.mxu0 %v204_v0  ;;  %202 = vmatprep.subr.bf16.mxu1 %v204_v0  ;;  %v20_v5 = vld [vmem:[%s292_s0 + $0x28] sm:$0xff]  ;;  %v18_v7 = vld [vmem:[%s292_s0 + $0x18] sm:$0xff] }
   0x3   :  { %v19_v3 = vld [vmem:[%s292_s0 + $0x20] sm:$0xff]  ;;  %v23_v4 = vpack.c.bf16 %v16_v2, %v15_v1  ;;  %193 = vmatpush3.bf16.msra.mxu0 %v204_v0  ;;  %203 = vmatpush3.bf16.msra.mxu1 %v204_v0  ;;  %v24_v9 = vpack.c.bf16 %v18_v7, %v17_v6  ;;  %v21_v10 = vld [vmem:[%s292_s0 + $0x30] sm:$0xff]  ;;  %v22_v11 = vld [vmem:[%s292_s0 + $0x38] sm:$0xff] }
   0x4   :  { %v25_v8 = vpack.c.bf16 %v20_v5, %v19_v3  ;;  %v26_v12 = vpack.c.bf16 %v22_v11, %v21_v10  ;;  %v165_v13 = vld [vmem:[%s293_s2] ss:$0 sm:$0xff] }
   0x5   :  { %194 = vmatprep.mubr.msk.bf16.mxu0 %vm42_vm0, %v23_v4 }
   0x6   :  { %198 = vmatprep.mubr.msk.bf16.mxu1 %vm42_vm0, %v25_v8  ;;  %195 = vmatmul.mubr.msk.bf16.vlgmr.msra.gmra.mxu0 %vm42_vm0, %v24_v9 }
   0x7   :  { %199 = vmatmul.mubr.msk.bf16.vlgmr.msra.gmra.mxu1 %vm42_vm0, %v26_v12 }
  0xc6   :  { %v196_v14 = vpop.f32.mrf.mxu0 }
  0xc7   :  { %v200_v15 = vpop.f32.mrf.mxu1  ;;  %v98_v16 = vadd.f32 %v196_v14, %v165_v13 }
  0xc8   :  { %v114_v17 = vadd.f32 %v200_v15, %v165_v13  ;;  %v89_v18 = vpop.f32.mrf.mxu0 }
  0xc9   :  { %v105_v19 = vpop.f32.mrf.mxu1  ;;  %v181_v20 = vpack.c.bf16 %v98_v16, %v98_v16  ;;  %v90_v22 = vadd.f32 %v165_v13, %v89_v18 }
  0xca   :  { %v185_v21 = vpack.c.bf16 %v114_v17, %v114_v17  ;;  %v106_v23 = vadd.f32 %v165_v13, %v105_v19  ;;  %v197_v24 = vpop.f32.mrf.mxu0 }
  0xcb   :  { %v201_v25 = vpop.f32.mrf.mxu1  ;;  %155 = vst.msk [vmem:[%s294_s3 + $0x8] sm:$0xf] %vm152_vm1, %v181_v20  ;;  %v179_v26 = vpack.c.bf16 %v90_v22, %v90_v22  ;;  %v101_v28 = vadd.f32 %v197_v24, %v165_v13 }
  0xcc   :  { %159 = vst.msk [vmem:[%s294_s3 + $0x18] sm:$0xf] %vm152_vm1, %v185_v21  ;;  %v183_v27 = vpack.c.bf16 %v106_v23, %v106_v23  ;;  %v117_v29 = vadd.f32 %v201_v25, %v165_v13  ;;  %v92_v30 = vpop.f32.mrf.mxu0 }
  0xcd   :  { %v108_v31 = vpop.f32.mrf.mxu1  ;;  %153 = vst.msk [vmem:[%s294_s3] sm:$0xf] %vm152_vm1, %v179_v26  ;;  %v182_v32 = vpack.c.bf16 %v101_v28, %v101_v28  ;;  %v93_v34 = vadd.f32 %v165_v13, %v92_v30 }
  0xce   :  { %157 = vst.msk [vmem:[%s294_s3 + $0x10] sm:$0xf] %vm152_vm1, %v183_v27  ;;  %v186_v33 = vpack.c.bf16 %v117_v29, %v117_v29  ;;  %v109_v35 = vadd.f32 %v165_v13, %v108_v31 }
  0xcf   :  { %156 = vst.msk [vmem:[%s294_s3 + $0xc] sm:$0xf] %vm152_vm1, %v182_v32  ;;  %v180_v36 = vpack.c.bf16 %v93_v34, %v93_v34 }
  0xd0   :  { %160 = vst.msk [vmem:[%s294_s3 + $0x1c] sm:$0xf] %vm152_vm1, %v186_v33  ;;  %v184_v37 = vpack.c.bf16 %v109_v35, %v109_v35 }
  0xd1   :  { %154 = vst.msk [vmem:[%s294_s3 + $0x4] sm:$0xf] %vm152_vm1, %v180_v36 }
  0xd2   :  { %158 = vst.msk [vmem:[%s294_s3 + $0x14] sm:$0xf] %vm152_vm1, %v184_v37 }

// kernel: sandglasset_forward.33
= control target key start
LH: loop header
LB: loop body
LE: loop exit
PB: predicated region body
PF: predicated region fallthrough
CT: control target
= control target key end

     0   :  { %vm42_vm0 = vcmask 130048   ;;  %s242_s1 = inlined_call_operand.vmem [shape: bf16[16,16], index: 1, kind: input, shape index: {}]   ;;  %s243_s0 = inlined_call_operand.vmem [shape: f32[64,16], index: 0, kind: input, shape index: {}]   ;;  %s244_s2 = inlined_call_operand.vmem [shape: f32[1,16], index: 2, kind: input, shape index: {}]   ;;  %s245_s3 = inlined_call_operand.vmem [shape: f32[64,16], index: 3, kind: output, shape index: {}]  }
   0x1   :  { %v155_v0 = vld [vmem:[%s242_s1] sm:$0xff]   ;;  %v16_v2 = vld [vmem:[%s243_s0 + $0x8] sm:$0xff]  ;;  %v17_v6 = vld [vmem:[%s243_s0 + $0x10] sm:$0xff] }
   0x2   :  { %v15_v1 = vld [vmem:[%s243_s0] sm:$0xff]  ;;  %143 = vmatprep.subr.bf16.mxu0 %v155_v0  ;;  %153 = vmatprep.subr.bf16.mxu1 %v155_v0  ;;  %v20_v5 = vld [vmem:[%s243_s0 + $0x28] sm:$0xff]  ;;  %v18_v7 = vld [vmem:[%s243_s0 + $0x18] sm:$0xff] }
   0x3   :  { %v19_v3 = vld [vmem:[%s243_s0 + $0x20] sm:$0xff]  ;;  %v23_v4 = vpack.c.bf16 %v16_v2, %v15_v1  ;;  %144 = vmatpush3.bf16.msra.mxu0 %v155_v0  ;;  %154 = vmatpush3.bf16.msra.mxu1 %v155_v0  ;;  %v24_v9 = vpack.c.bf16 %v18_v7, %v17_v6  ;;  %v21_v10 = vld [vmem:[%s243_s0 + $0x30] sm:$0xff]  ;;  %v22_v11 = vld [vmem:[%s243_s0 + $0x38] sm:$0xff] }
   0x4   :  { %v25_v8 = vpack.c.bf16 %v20_v5, %v19_v3  ;;  %v26_v12 = vpack.c.bf16 %v22_v11, %v21_v10  ;;  %v132_v13 = vld [vmem:[%s244_s2] ss:$0 sm:$0xff] }
   0x5   :  { %145 = vmatprep.mubr.msk.bf16.mxu0 %vm42_vm0, %v23_v4 }
   0x6   :  { %149 = vmatprep.mubr.msk.bf16.mxu1 %vm42_vm0, %v25_v8  ;;  %146 = vmatmul.mubr.msk.bf16.vlgmr.msra.gmra.mxu0 %vm42_vm0, %v24_v9 }
   0x7   :  { %150 = vmatmul.mubr.msk.bf16.vlgmr.msra.gmra.mxu1 %vm42_vm0, %v26_v12 }
  0xc6   :  { %v147_v14 = vpop.f32.mrf.mxu0 }
  0xc7   :  { %v151_v15 = vpop.f32.mrf.mxu1  ;;  %v98_v16 = vadd.f32 %v147_v14, %v132_v13 }
  0xc8   :  { %v114_v17 = vadd.f32 %v151_v15, %v132_v13  ;;  %v89_v18 = vpop.f32.mrf.mxu0 }
  0xc9   :  { %v105_v19 = vpop.f32.mrf.mxu1  ;;  %122 = vst.msk [vmem:[%s245_s3 + $0x10] sm:$0xff] %vm42_vm0, %v98_v16  ;;  %v90_v20 = vadd.f32 %v132_v13, %v89_v18 }
  0xca   :  { %126 = vst.msk [vmem:[%s245_s3 + $0x30] sm:$0xff] %vm42_vm0, %v114_v17  ;;  %v106_v21 = vadd.f32 %v132_v13, %v105_v19  ;;  %v148_v22 = vpop.f32.mrf.mxu0 }
  0xcb   :  { %v152_v23 = vpop.f32.mrf.mxu1  ;;  %120 = vst.msk [vmem:[%s245_s3] sm:$0xff] %vm42_vm0, %v90_v20  ;;  %v101_v24 = vadd.f32 %v148_v22, %v132_v13 }
  0xcc   :  { %124 = vst.msk [vmem:[%s245_s3 + $0x20] sm:$0xff] %vm42_vm0, %v106_v21  ;;  %v117_v25 = vadd.f32 %v152_v23, %v132_v13  ;;  %v92_v26 = vpop.f32.mrf.mxu0 }
  0xcd   :  { %v108_v27 = vpop.f32.mrf.mxu1  ;;  %123 = vst.msk [vmem:[%s245_s3 + $0x18] sm:$0xff] %vm42_vm0, %v101_v24  ;;  %v93_v28 = vadd.f32 %v132_v13, %v92_v26 }
  0xce   :  { %127 = vst.msk [vmem:[%s245_s3 + $0x38] sm:$0xff] %vm42_vm0, %v117_v25  ;;  %v109_v29 = vadd.f32 %v132_v13, %v108_v27 }
  0xcf   :  { %121 = vst.msk [vmem:[%s245_s3 + $0x8] sm:$0xff] %vm42_vm0, %v93_v28 }
  0xd0   :  { %125 = vst.msk [vmem:[%s245_s3 + $0x28] sm:$0xff] %vm42_vm0, %v109_v29 }

// kernel: sandglasset_forward.31
= control target key start
LH: loop header
LB: loop body
LE: loop exit
PB: predicated region body
PF: predicated region fallthrough
CT: control target
= control target key end

     0   :  { %vm23_vm0 = vcmask 1043456   ;;  %v1706_v0 = vmov 0.0   ;;  %vm1707_vm1 = vmmov 0   ;;  %v1708_v3 = vmov 0   ;;  %s1711_s18 = smov 8   ;;  %s1712_s21 = smov 16   ;;  %s2111_s2 = inlined_call_operand.vmem [shape: bf16[8,32], index: 2, kind: input, shape index: {}]   ;;  %s2112_s1 = inlined_call_operand.vmem [shape: bf16[8,32], index: 1, kind: input, shape index: {}]   ;;  %s2113_s0 = inlined_call_operand.vmem [shape: bf16[8,8,64], index: 0, kind: input, shape index: {}]   ;;  %s2114_s3 = inlined_call_operand.vmem [shape: bf16[8,8,16], index: 3, kind: output, shape index: {}]  }
   0x1   :  { %1478 = vmatprep.subr.bf16.mxu1 %v1706_v0  ;;  %v16_v1 = vld [vmem:[%s2111_s2] sm:$0xf]  ;;  %1480 = vmatprep.mubr.msk.bf16.mxu1 %vm1707_vm1, %v1706_v0  ;;  %s1709_s2 = smov 32   ;;  %v1352_v10 = vld [vmem:[%s2113_s0 + $0x1c] sm:$0xf]  ;;  %s1713_s22 = smov 72  }
   0x2   :  { %v1743_v2 = vsel %vm23_vm0, %v16_v1, 0  ;;  %1472 = vmatprep.subr.bf16.mxu0 %v1706_v0  ;;  %1474 = vmatprep.mubr.msk.bf16.mxu0 %vm1707_vm1, %v1706_v0  ;;  %v15_v8 = vld [vmem:[%s2112_s1] sm:$0xf]  ;;  %v103_v11 = vunpack.c.l.bf16 %v1352_v10  ;;  %s1710_s1 = smov 112   ;;  %vm19_vm2 = vcmask 64512   ;;  %s1714_s23 = smov 104  }
   0x3   :  { %1479 = vmatpush3.bf16.msra.mxu1 %v1743_v2  ;;  %v1759_v9 = vsel %vm23_vm0, %v15_v8, 0  ;;  %v1775_v25 = vld [vmem:[%s2113_s0] sm:$0xff]   ;;  %v1810_v55 = vld [vmem:[%s2113_s0 + $0x14] sm:$0xff]   ;;  %vm99_vm3 = vcmask 60416   ;;  %s1715_s17 = smov 80   ;;  %vm184_vm4 = vcmask 126016  }
   0x4   :  { %1490 = vmatprep.subr.bf16.mxu1 %v1706_v0  ;;  %1473 = vmatpush3.bf16.msra.mxu0 %v1759_v9  ;;  %v18_v26 = vunpack.c.l.bf16 %v1775_v25  ;;  %v270_v56 = vunpack.c.h.bf16 %v1810_v55  ;;  %v188_v8 = vunpack.c.h.bf16 %v1775_v25 }
   0x5   :  { %1484 = vmatprep.subr.bf16.mxu0 %v1706_v0 }
   0x6   :  { %1481 = vmatmul.mubr.bf16.vlgmr.msra.gmra.mxu1 %v1708_v3 }
   0x7   :  { %1491 = vmatpush3.bf16.msra.mxu1 %v1743_v2  ;;  %1492 = vmatprep.mubr.msk.bf16.mxu1 %vm1707_vm1, %v1706_v0 }
   0x8   :  { %1502 = vmatprep.subr.bf16.mxu1 %v1706_v0  ;;  %1475 = vmatmul.mubr.bf16.vlgmr.msra.gmra.mxu0 %v1708_v3 }
   0x9   :  { %1485 = vmatpush3.bf16.msra.mxu0 %v1759_v9  ;;  %1486 = vmatprep.mubr.msk.bf16.mxu0 %vm1707_vm1, %v1706_v0 }
   0xa   :  { %1496 = vmatprep.subr.bf16.mxu0 %v1706_v0 }
  0xc6   :  { %v141_v4 = vpop.f32.mrf.mxu1 }
  0xc7   :  { %148 = vrot.lane.b32.xlu0 %v141_v4, %s1709_s2 }
  0xc8   :  { %v1482_v5 = vpop.f32.mrf.mxu1  ;;  %v61_v18 = vpop.f32.mrf.mxu0 }
  0xc9   :  { %v67_v30 = vadd.f32 %v61_v18, %v18_v26 }
  0xca   :  { %v144_v6 = vpop.f32.mrf.mxu1  ;;  %v1476_v19 = vpop.f32.mrf.mxu0 }
  0xcb   :  { %v1350_v33 = vmul.f32 -1.442695, %v67_v30 }
  0xcc   :  { %v1483_v7 = vpop.f32.mrf.mxu1  ;;  %v64_v20 = vpop.f32.mrf.mxu0 }
  0xce   :  { %v1477_v21 = vpop.f32.mrf.mxu0 }
 0x139   :  { %v149_v12 = vpop.permute.xlu0 %148 }
 0x13a   :  { %v151_v13 = vadd.f32 %v149_v12, %v103_v11 }
 0x13c   :  { %1578 = vtanh.f32 %v151_v13  ;;  %v1353_v15 = vmul.f32 -1.442695, %v151_v13 }
 0x13e   :  { %1580 = vpow2.f32 %v1353_v15 }
 0x149   :  { %v1579_v14 = vpop.eup %1578 }
 0x14a   :  { %161 = vrot.lane.b32.xlu0 %v1579_v14, %s1710_s1 }
 0x14b   :  { %v1581_v16 = vpop.eup %1580 }
 0x14c   :  { %v155_v17 = vadd.f32 1.0, %v1581_v16 }
 0x14e   :  { %1582 = vrcp.f32 %v155_v17 }
 0x15b   :  { %v1583_v22 = vpop.eup %1582 }
 0x15c   :  { %v159_v27 = vmul.f32 0.0, %v1583_v22 }
 0x1bc   :  { %v162_v23 = vpop.permute.xlu0 %161 }
 0x1bd   :  { %v164_v24 = vmul.f32 %v1583_v22, %v162_v23 }
 0x1bf   :  { %166 = vrot.lane.b32.xlu1 %v164_v24, %s1711_s18 }
 0x231   :  { %v167_v28 = vpop.permute.xlu1 %166 }
 0x232   :  { %v1778_v29 = vadd.f32 %v167_v28, %v159_v27 }
 0x234   :  { %1584 = vtanh.f32 %v1778_v29 }
 0x235   :  { %1586 = vtanh.f32 %v67_v30 }
 0x236   :  { %1588 = vpow2.f32 %v1350_v33 }
 0x241   :  { %v1585_v31 = vpop.eup %1584 }
 0x242   :  { %172 = vrot.lane.b32.xlu1 %v1585_v31, %s1712_s21  ;;  %v1587_v32 = vpop.eup %1586 }
 0x243   :  { %v1589_v34 = vpop.eup %1588 }
 0x244   :  { %v71_v35 = vadd.f32 1.0, %v1589_v34 }
 0x246   :  { %77 = vrot.lane.b32.xlu1 %v1587_v32, %s1710_s1  ;;  %1590 = vrcp.f32 %v71_v35 }
 0x253   :  { %v1591_v38 = vpop.eup %1590 }
 0x254   :  { %v75_v42 = vmul.f32 0.0, %v1591_v38 }
 0x2b4   :  { %v173_v36 = vpop.permute.xlu1 %172 }
 0x2b5   :  { %v175_v37 = vmul.f32 %v1583_v22, %v173_v36 }
 0x2b7   :  { %v1783_v39 = vpack.c.bf16 %v175_v37, %v175_v37 }
 0x2b8   :  { %v78_v40 = vpop.permute.xlu1 %77 }
 0x2b9   :  { %v80_v41 = vmul.f32 %v1591_v38, %v78_v40  ;;  %271 = vrot.lane.b32.xlu0 %v1783_v39, %s1713_s22 }
 0x2bb   :  { %82 = vrot.lane.b32.xlu1 %v80_v41, %s1711_s18 }
 0x32b   :  { %v272_v43 = vpop.permute.xlu0 %271 }
 0x32c   :  { %1493 = vmatmul.mubr.msk.bf16.vlgmr.msra.gmra.mxu1 %vm19_vm2, %v272_v43 }
 0x32d   :  { %v83_v44 = vpop.permute.xlu1 %82  ;;  %1503 = vmatpush3.bf16.msra.mxu1 %v1743_v2  ;;  %1504 = vmatprep.mubr.msk.bf16.mxu1 %vm1707_vm1, %v1706_v0 }
 0x32e   :  { %v1792_v45 = vadd.f32 %v83_v44, %v75_v42  ;;  %1514 = vmatprep.subr.bf16.mxu1 %v1706_v0 }
 0x330   :  { %1592 = vtanh.f32 %v1792_v45 }
 0x33d   :  { %v1593_v46 = vpop.eup %1592 }
 0x33e   :  { %88 = vrot.lane.b32.xlu1 %v1593_v46, %s1712_s21 }
 0x3b0   :  { %v89_v47 = vpop.permute.xlu1 %88 }
 0x3b1   :  { %v91_v48 = vmul.f32 %v1591_v38, %v89_v47  ;;  %v438_v38 = vunpack.c.l.bf16 %v1810_v55 }
 0x3b3   :  { %v1797_v49 = vpack.c.bf16 %v91_v48, %v91_v48 }
 0x3b5   :  { %189 = vrot.lane.b32.xlu1 %v1797_v49, %s1714_s23 }
 0x3ec   :  { %v310_v50 = vpop.f32.mrf.mxu1 }
 0x3ed   :  { %317 = vrot.lane.b32.xlu0 %v310_v50, %s1709_s2 }
 0x3ee   :  { %v1494_v51 = vpop.f32.mrf.mxu1 }
 0x3f0   :  { %v313_v52 = vpop.f32.mrf.mxu1 }
 0x3f2   :  { %v1495_v53 = vpop.f32.mrf.mxu1 }
 0x427   :  { %v190_v54 = vpop.permute.xlu1 %189 }
 0x428   :  { %1487 = vmatmul.mubr.msk.bf16.vlgmr.msra.gmra.mxu0 %vm19_vm2, %v190_v54  ;;  %v1853_v54 = vld [vmem:[%s2113_s0 + $0x8] sm:$0xff]  }
 0x429   :  { %1497 = vmatpush3.bf16.msra.mxu0 %v1759_v9  ;;  %1498 = vmatprep.mubr.msk.bf16.mxu0 %vm1707_vm1, %v1706_v0  ;;  %v356_v55 = vunpack.c.l.bf16 %v1853_v54 }
 0x42a   :  { %1508 = vmatprep.subr.bf16.mxu0 %v1706_v0 }
 0x45f   :  { %v318_v57 = vpop.permute.xlu0 %317 }
 0x460   :  { %v320_v58 = vadd.f32 %v318_v57, %v270_v56 }
 0x462   :  { %1594 = vtanh.f32 %v320_v58  ;;  %v1363_v60 = vmul.f32 -1.442695, %v320_v58 }
 0x464   :  { %1596 = vpow2.f32 %v1363_v60 }
 0x46f   :  { %v1595_v59 = vpop.eup %1594 }
 0x470   :  { %330 = vrot.lane.b32.xlu0 %v1595_v59, %s1710_s1 }
 0x471   :  { %v1597_v61 = vpop.eup %1596 }
 0x472   :  { %v324_v62 = vadd.f32 1.0, %v1597_v61 }
 0x474   :  { %1598 = vrcp.f32 %v324_v62 }
 0x481   :  { %v1599_v63 = vpop.eup %1598 }
 0x482   :  { %v328_v10 = vmul.f32 %v1599_v63, %v1778_v29 }
 0x4e2   :  { %v331_v1 = vpop.permute.xlu0 %330 }
 0x4e3   :  { %v333_v3 = vmul.f32 %v1599_v63, %v331_v1 }
 0x4e5   :  { %335 = vrot.lane.b32.xlu0 %v333_v3, %s1711_s18 }
 0x4e8   :  { %v228_v4 = vpop.f32.mrf.mxu0 }
 0x4e9   :  { %v234_v13 = vadd.f32 %v228_v4, %v188_v8 }
 0x4ea   :  { %v1488_v5 = vpop.f32.mrf.mxu0 }
 0x4eb   :  { %v1358_v16 = vmul.f32 -1.442695, %v234_v13 }
 0x4ec   :  { %v231_v6 = vpop.f32.mrf.mxu0 }
 0x4ee   :  { %v1489_v7 = vpop.f32.mrf.mxu0 }
 0x557   :  { %v336_v11 = vpop.permute.xlu0 %335 }
 0x558   :  { %v1817_v12 = vadd.f32 %v336_v11, %v328_v10 }
 0x55a   :  { %1600 = vtanh.f32 %v1817_v12 }
 0x55b   :  { %1602 = vtanh.f32 %v234_v13 }
 0x55c   :  { %1604 = vpow2.f32 %v1358_v16 }
 0x567   :  { %v1601_v14 = vpop.eup %1600 }
 0x568   :  { %341 = vrot.lane.b32.xlu0 %v1601_v14, %s1712_s21  ;;  %v1603_v15 = vpop.eup %1602 }
 0x569   :  { %v1605_v17 = vpop.eup %1604 }
 0x56a   :  { %v238_v18 = vadd.f32 1.0, %v1605_v17 }
 0x56c   :  { %244 = vrot.lane.b32.xlu0 %v1603_v15, %s1710_s1  ;;  %1606 = vrcp.f32 %v238_v18 }
 0x579   :  { %v1607_v23 = vpop.eup %1606 }
 0x57a   :  { %v242_v26 = vmul.f32 %v1607_v23, %v1792_v45 }
 0x5da   :  { %v342_v19 = vpop.permute.xlu0 %341 }
 0x5db   :  { %v344_v20 = vmul.f32 %v1599_v63, %v342_v19 }
 0x5dd   :  { %v1822_v21 = vpack.c.bf16 %v344_v20, %v344_v20 }
 0x5de   :  { %v245_v22 = vpop.permute.xlu0 %244 }
 0x5df   :  { %439 = vrot.lane.b32.xlu1 %v1822_v21, %s1713_s22  ;;  %v247_v24 = vmul.f32 %v1607_v23, %v245_v22 }
 0x5e3   :  { %249 = vrot.lane.b32.xlu1 %v247_v24, %s1711_s18  ;;  %v1890_v24 = vld [vmem:[%s2113_s0 + $0x10] sm:$0xff]  }
 0x651   :  { %v440_v25 = vpop.permute.xlu1 %439 }
 0x652   :  { %1505 = vmatmul.mubr.msk.bf16.vlgmr.msra.gmra.mxu1 %vm19_vm2, %v440_v25  ;;  %v606_v25 = vunpack.c.l.bf16 %v1890_v24 }
 0x653   :  { %1515 = vmatpush3.bf16.msra.mxu1 %v1743_v2  ;;  %1516 = vmatprep.mubr.msk.bf16.mxu1 %vm1707_vm1, %v1706_v0 }
 0x654   :  { %1526 = vmatprep.subr.bf16.mxu1 %v1706_v0 }
 0x655   :  { %v250_v27 = vpop.permute.xlu1 %249 }
 0x656   :  { %v1833_v28 = vadd.f32 %v250_v27, %v242_v26 }
 0x658   :  { %1608 = vtanh.f32 %v1833_v28 }
 0x665   :  { %v1609_v29 = vpop.eup %1608 }
 0x666   :  { %255 = vrot.lane.b32.xlu1 %v1609_v29, %s1712_s21 }
 0x6d8   :  { %v256_v30 = vpop.permute.xlu1 %255 }
 0x6d9   :  { %v258_v31 = vmul.f32 %v1607_v23, %v256_v30 }
 0x6db   :  { %v1837_v32 = vpack.c.bf16 %v258_v31, %v258_v31 }
 0x6dd   :  { %357 = vrot.lane.b32.xlu1 %v1837_v32, %s1714_s23 }
 0x712   :  { %v478_v33 = vpop.f32.mrf.mxu1 }
 0x713   :  { %485 = vrot.lane.b32.xlu0 %v478_v33, %s1709_s2 }
 0x714   :  { %v1506_v34 = vpop.f32.mrf.mxu1 }
 0x716   :  { %v481_v35 = vpop.f32.mrf.mxu1 }
 0x718   :  { %v1507_v36 = vpop.f32.mrf.mxu1 }
 0x74f   :  { %v358_v37 = vpop.permute.xlu1 %357 }
 0x750   :  { %1499 = vmatmul.mubr.msk.bf16.vlgmr.msra.gmra.mxu0 %vm19_vm2, %v358_v37 }
 0x751   :  { %1509 = vmatpush3.bf16.msra.mxu0 %v1759_v9  ;;  %1510 = vmatprep.mubr.msk.bf16.mxu0 %vm1707_vm1, %v1706_v0 }
 0x752   :  { %1520 = vmatprep.subr.bf16.mxu0 %v1706_v0 }
 0x785   :  { %v486_v40 = vpop.permute.xlu0 %485 }
 0x786   :  { %v488_v41 = vadd.f32 %v486_v40, %v438_v38 }
 0x788   :  { %1610 = vtanh.f32 %v488_v41  ;;  %v1373_v43 = vmul.f32 -1.442695, %v488_v41  ;;  %v524_v41 = vunpack.c.h.bf16 %v1853_v54 }
 0x78a   :  { %1612 = vpow2.f32 %v1373_v43 }
 0x795   :  { %v1611_v42 = vpop.eup %1610 }
 0x796   :  { %498 = vrot.lane.b32.xlu0 %v1611_v42, %s1710_s1 }
 0x797   :  { %v1613_v44 = vpop.eup %1612 }
 0x798   :  { %v492_v45 = vadd.f32 1.0, %v1613_v44 }
 0x79a   :  { %1614 = vrcp.f32 %v492_v45 }
 0x7a7   :  { %v1615_v46 = vpop.eup %1614 }
 0x7a8   :  { %v496_v56 = vmul.f32 %v1615_v46, %v1817_v12 }
 0x808   :  { %v499_v47 = vpop.permute.xlu0 %498 }
 0x809   :  { %v501_v48 = vmul.f32 %v1615_v46, %v499_v47 }
 0x80b   :  { %503 = vrot.lane.b32.xlu0 %v501_v48, %s1711_s18 }
 0x810   :  { %v396_v50 = vpop.f32.mrf.mxu0 }
 0x811   :  { %v402_v59 = vadd.f32 %v396_v50, %v356_v55 }
 0x812   :  { %v1500_v51 = vpop.f32.mrf.mxu0 }
 0x813   :  { %v1368_v62 = vmul.f32 -1.442695, %v402_v59 }
 0x814   :  { %v399_v52 = vpop.f32.mrf.mxu0 }
 0x816   :  { %v1501_v53 = vpop.f32.mrf.mxu0 }
 0x87d   :  { %v504_v57 = vpop.permute.xlu0 %503 }
 0x87e   :  { %v1857_v58 = vadd.f32 %v504_v57, %v496_v56 }
 0x880   :  { %1616 = vtanh.f32 %v1857_v58 }
 0x881   :  { %1618 = vtanh.f32 %v402_v59 }
 0x882   :  { %1620 = vpow2.f32 %v1368_v62 }
 0x88d   :  { %v1617_v60 = vpop.eup %1616 }
 0x88e   :  { %509 = vrot.lane.b32.xlu1 %v1617_v60, %s1712_s21  ;;  %v1619_v61 = vpop.eup %1618 }
 0x88f   :  { %v1621_v63 = vpop.eup %1620 }
 0x890   :  { %v406_v1 = vadd.f32 1.0, %v1621_v63 }
 0x892   :  { %412 = vrot.lane.b32.xlu1 %v1619_v61, %s1710_s1  ;;  %1622 = vrcp.f32 %v406_v1 }
 0x89f   :  { %v1623_v7 = vpop.eup %1622 }
 0x8a0   :  { %v410_v11 = vmul.f32 %v1623_v7, %v1833_v28 }
 0x900   :  { %v510_v3 = vpop.permute.xlu1 %509 }
 0x901   :  { %v512_v4 = vmul.f32 %v1615_v46, %v510_v3 }
 0x903   :  { %v1862_v5 = vpack.c.bf16 %v512_v4, %v512_v4 }
 0x904   :  { %v413_v6 = vpop.permute.xlu1 %412 }
 0x905   :  { %607 = vrot.lane.b32.xlu0 %v1862_v5, %s1713_s22  ;;  %v415_v8 = vmul.f32 %v1623_v7, %v413_v6 }
 0x909   :  { %417 = vrot.lane.b32.xlu0 %v415_v8, %s1711_s18 }
 0x977   :  { %v608_v10 = vpop.permute.xlu0 %607 }
 0x978   :  { %1517 = vmatmul.mubr.msk.bf16.vlgmr.msra.gmra.mxu1 %vm19_vm2, %v608_v10 }
 0x979   :  { %1527 = vmatpush3.bf16.msra.mxu1 %v1743_v2  ;;  %1528 = vmatprep.mubr.msk.bf16.mxu1 %vm1707_vm1, %v1706_v0 }
 0x97a   :  { %1538 = vmatprep.subr.bf16.mxu1 %v1706_v0 }
 0x97b   :  { %v418_v12 = vpop.permute.xlu0 %417 }
 0x97c   :  { %v1873_v13 = vadd.f32 %v418_v12, %v410_v11  ;;  %v1391_v11 = vld [vmem:[%s2113_s0 + $0xc] sm:$0xff]  }
 0x97d   :  { %v771_v12 = vunpack.c.l.bf16 %v1391_v11 }
 0x97e   :  { %1624 = vtanh.f32 %v1873_v13 }
 0x98b   :  { %v1625_v14 = vpop.eup %1624 }
 0x98c   :  { %423 = vrot.lane.b32.xlu1 %v1625_v14, %s1712_s21 }
 0x9fe   :  { %v424_v15 = vpop.permute.xlu1 %423 }
 0x9ff   :  { %v426_v16 = vmul.f32 %v1623_v7, %v424_v15 }
 0xa01   :  { %v1877_v17 = vpack.c.bf16 %v426_v16, %v426_v16 }
 0xa03   :  { %525 = vrot.lane.b32.xlu1 %v1877_v17, %s1714_s23 }
 0xa38   :  { %v646_v18 = vpop.f32.mrf.mxu1 }
 0xa39   :  { %653 = vrot.lane.b32.xlu0 %v646_v18, %s1709_s2 }
 0xa3a   :  { %v1518_v19 = vpop.f32.mrf.mxu1 }
 0xa3c   :  { %v649_v20 = vpop.f32.mrf.mxu1 }
 0xa3e   :  { %v1519_v22 = vpop.f32.mrf.mxu1 }
 0xa75   :  { %v526_v23 = vpop.permute.xlu1 %525 }
 0xa76   :  { %1511 = vmatmul.mubr.msk.bf16.vlgmr.msra.gmra.mxu0 %vm19_vm2, %v526_v23 }
 0xa77   :  { %1521 = vmatpush3.bf16.msra.mxu0 %v1759_v9  ;;  %1522 = vmatprep.mubr.msk.bf16.mxu0 %vm1707_vm1, %v1706_v0 }
 0xa78   :  { %1532 = vmatprep.subr.bf16.mxu0 %v1706_v0 }
 0xaab   :  { %v654_v26 = vpop.permute.xlu0 %653 }
 0xaac   :  { %v656_v27 = vadd.f32 %v654_v26, %v606_v25  ;;  %v691_v25 = vunpack.c.h.bf16 %v1391_v11 }
 0xaae   :  { %1626 = vtanh.f32 %v656_v27  ;;  %v1383_v29 = vmul.f32 -1.442695, %v656_v27 }
 0xab0   :  { %1628 = vpow2.f32 %v1383_v29 }
 0xabb   :  { %v1627_v28 = vpop.eup %1626 }
 0xabc   :  { %666 = vrot.lane.b32.xlu0 %v1627_v28, %s1710_s1 }
 0xabd   :  { %v1629_v30 = vpop.eup %1628 }
 0xabe   :  { %v660_v31 = vadd.f32 1.0, %v1629_v30 }
 0xac0   :  { %1630 = vrcp.f32 %v660_v31 }
 0xacd   :  { %v1631_v33 = vpop.eup %1630 }
 0xace   :  { %v664_v42 = vmul.f32 %v1631_v33, %v1857_v58 }
 0xb2e   :  { %v667_v34 = vpop.permute.xlu0 %666 }
 0xb2f   :  { %v669_v35 = vmul.f32 %v1631_v33, %v667_v34 }
 0xb31   :  { %671 = vrot.lane.b32.xlu1 %v669_v35, %s1711_s18 }
 0xb36   :  { %v564_v36 = vpop.f32.mrf.mxu0 }
 0xb37   :  { %v570_v45 = vadd.f32 %v564_v36, %v524_v41 }
 0xb38   :  { %v1512_v37 = vpop.f32.mrf.mxu0 }
 0xb39   :  { %v1378_v48 = vmul.f32 -1.442695, %v570_v45 }
 0xb3a   :  { %v567_v38 = vpop.f32.mrf.mxu0 }
 0xb3c   :  { %v1513_v40 = vpop.f32.mrf.mxu0 }
 0xba3   :  { %v672_v43 = vpop.permute.xlu1 %671 }
 0xba4   :  { %v1897_v44 = vadd.f32 %v672_v43, %v664_v42 }
 0xba6   :  { %1632 = vtanh.f32 %v1897_v44 }
 0xba7   :  { %1634 = vtanh.f32 %v570_v45 }
 0xba8   :  { %1636 = vpow2.f32 %v1378_v48 }
 0xbb3   :  { %v1633_v46 = vpop.eup %1632 }
 0xbb4   :  { %677 = vrot.lane.b32.xlu0 %v1633_v46, %s1712_s21  ;;  %v1635_v47 = vpop.eup %1634 }
 0xbb5   :  { %v1637_v50 = vpop.eup %1636 }
 0xbb6   :  { %v574_v51 = vadd.f32 1.0, %v1637_v50 }
 0xbb8   :  { %580 = vrot.lane.b32.xlu0 %v1635_v47, %s1710_s1  ;;  %1638 = vrcp.f32 %v574_v51 }
 0xbc5   :  { %v1639_v56 = vpop.eup %1638 }
 0xbc6   :  { %v578_v59 = vmul.f32 %v1639_v56, %v1873_v13 }
 0xc26   :  { %v678_v52 = vpop.permute.xlu0 %677 }
 0xc27   :  { %v680_v53 = vmul.f32 %v1631_v33, %v678_v52 }
 0xc29   :  { %v1902_v54 = vpack.c.bf16 %v680_v53, %v680_v53 }
 0xc2a   :  { %v581_v55 = vpop.permute.xlu0 %580 }
 0xc2b   :  { %772 = vrot.lane.b32.xlu1 %v1902_v54, %s1713_s22  ;;  %v583_v57 = vmul.f32 %v1639_v56, %v581_v55 }
 0xc2f   :  { %585 = vrot.lane.b32.xlu1 %v583_v57, %s1711_s18 }
 0xc9d   :  { %v773_v58 = vpop.permute.xlu1 %772 }
 0xc9e   :  { %1529 = vmatmul.mubr.msk.bf16.vlgmr.msra.gmra.mxu1 %vm19_vm2, %v773_v58 }
 0xc9f   :  { %1539 = vmatpush3.bf16.msra.mxu1 %v1743_v2  ;;  %1540 = vmatprep.mubr.msk.bf16.mxu1 %vm1707_vm1, %v1706_v0 }
 0xca0   :  { %1550 = vmatprep.subr.bf16.mxu1 %v1706_v0 }
 0xca1   :  { %v586_v60 = vpop.permute.xlu1 %585 }
 0xca2   :  { %v588_v61 = vadd.f32 %v586_v60, %v578_v59 }
 0xca4   :  { %1640 = vtanh.f32 %v588_v61 }
 0xcb1   :  { %v1641_v62 = vpop.eup %1640 }
 0xcb2   :  { %591 = vrot.lane.b32.xlu0 %v1641_v62, %s1712_s21  ;;  %v1962_v62 = vld [vmem:[%s2113_s0 + $0x4] sm:$0xff]  }
 0xd24   :  { %v592_v63 = vpop.permute.xlu0 %591 }
 0xd25   :  { %v594_v1 = vmul.f32 %v1639_v56, %v592_v63  ;;  %v935_v63 = vunpack.c.h.bf16 %v1962_v62 }
 0xd27   :  { %v1914_v3 = vpack.c.bf16 %v594_v1, %v594_v1 }
 0xd29   :  { %692 = vrot.lane.b32.xlu1 %v1914_v3, %s1714_s23 }
 0xd5e   :  { %v811_v4 = vpop.f32.mrf.mxu1 }
 0xd5f   :  { %818 = vrot.lane.b32.xlu0 %v811_v4, %s1709_s2 }
 0xd60   :  { %v1530_v6 = vpop.f32.mrf.mxu1 }
 0xd62   :  { %v814_v7 = vpop.f32.mrf.mxu1 }
 0xd63   :  { %v855_v7 = vunpack.c.h.bf16 %v1890_v24 }
 0xd64   :  { %v1531_v8 = vpop.f32.mrf.mxu1 }
 0xd9b   :  { %v693_v10 = vpop.permute.xlu1 %692 }
 0xd9c   :  { %1523 = vmatmul.mubr.msk.bf16.vlgmr.msra.gmra.mxu0 %vm19_vm2, %v693_v10 }
 0xd9d   :  { %1533 = vmatpush3.bf16.msra.mxu0 %v1759_v9  ;;  %1534 = vmatprep.mubr.msk.bf16.mxu0 %vm1707_vm1, %v1706_v0 }
 0xd9e   :  { %1544 = vmatprep.subr.bf16.mxu0 %v1706_v0 }
 0xdd1   :  { %v819_v13 = vpop.permute.xlu0 %818 }
 0xdd2   :  { %v821_v14 = vadd.f32 %v819_v13, %v771_v12 }
 0xdd4   :  { %1642 = vtanh.f32 %v821_v14  ;;  %v1393_v16 = vmul.f32 -1.442695, %v821_v14 }
 0xdd6   :  { %1644 = vpow2.f32 %v1393_v16 }
 0xde1   :  { %v1643_v15 = vpop.eup %1642 }
 0xde2   :  { %831 = vrot.lane.b32.xlu1 %v1643_v15, %s1710_s1 }
 0xde3   :  { %v1645_v18 = vpop.eup %1644 }
 0xde4   :  { %v825_v19 = vadd.f32 1.0, %v1645_v18 }
 0xde6   :  { %1646 = vrcp.f32 %v825_v19 }
 0xdf3   :  { %v1647_v20 = vpop.eup %1646 }
 0xdf4   :  { %v829_v34 = vmul.f32 %v1647_v20, %v1897_v44 }
 0xe54   :  { %v832_v22 = vpop.permute.xlu1 %831 }
 0xe55   :  { %v834_v23 = vmul.f32 %v1647_v20, %v832_v22 }
 0xe57   :  { %836 = vrot.lane.b32.xlu0 %v834_v23, %s1711_s18 }
 0xe5c   :  { %v731_v26 = vpop.f32.mrf.mxu0 }
 0xe5d   :  { %v737_v27 = vadd.f32 %v731_v26, %v691_v25 }
 0xe5e   :  { %v1524_v28 = vpop.f32.mrf.mxu0 }
 0xe5f   :  { %1648 = vtanh.f32 %v737_v27  ;;  %v1388_v33 = vmul.f32 -1.442695, %v737_v27 }
 0xe60   :  { %v734_v29 = vpop.f32.mrf.mxu0 }
 0xe61   :  { %1650 = vpow2.f32 %v1388_v33 }
 0xe62   :  { %v1525_v30 = vpop.f32.mrf.mxu0 }
 0xe6c   :  { %v1649_v31 = vpop.eup %1648 }
 0xe6d   :  { %747 = vrot.lane.b32.xlu0 %v1649_v31, %s1710_s1 }
 0xe6e   :  { %v1651_v37 = vpop.eup %1650 }
 0xe6f   :  { %v741_v38 = vadd.f32 1.0, %v1651_v37 }
 0xec9   :  { %v837_v35 = vpop.permute.xlu0 %836 }
 0xeca   :  { %v1931_v36 = vadd.f32 %v837_v35, %v829_v34 }
 0xecc   :  { %1652 = vtanh.f32 %v1931_v36 }
 0xecd   :  { %1654 = vrcp.f32 %v741_v38 }
 0xed9   :  { %v1653_v40 = vpop.eup %1652 }
 0xeda   :  { %842 = vrot.lane.b32.xlu1 %v1653_v40, %s1712_s21  ;;  %v1655_v41 = vpop.eup %1654 }
 0xedb   :  { %v745_v44 = vmul.f32 %v1655_v41, %v588_v61 }
 0xedf   :  { %v748_v42 = vpop.permute.xlu0 %747 }
 0xee0   :  { %v750_v43 = vmul.f32 %v1655_v41, %v748_v42 }
 0xee2   :  { %752 = vrot.lane.b32.xlu0 %v750_v43, %s1711_s18 }
 0xf4c   :  { %v843_v45 = vpop.permute.xlu1 %842 }
 0xf4d   :  { %v845_v46 = vmul.f32 %v1647_v20, %v843_v45 }
 0xf4f   :  { %v1936_v47 = vpack.c.bf16 %v845_v46, %v845_v46 }
 0xf51   :  { %936 = vrot.lane.b32.xlu1 %v1936_v47, %s1713_s22 }
 0xf54   :  { %v753_v48 = vpop.permute.xlu0 %752 }
 0xf55   :  { %v1940_v50 = vadd.f32 %v753_v48, %v745_v44 }
 0xf57   :  { %1656 = vtanh.f32 %v1940_v50 }
 0xf64   :  { %v1657_v51 = vpop.eup %1656 }
 0xf65   :  { %758 = vrot.lane.b32.xlu1 %v1657_v51, %s1712_s21 }
 0xfc3   :  { %v937_v52 = vpop.permute.xlu1 %936 }
 0xfc4   :  { %1541 = vmatmul.mubr.msk.bf16.vlgmr.msra.gmra.mxu1 %vm19_vm2, %v937_v52 }
 0xfc5   :  { %1551 = vmatpush3.bf16.msra.mxu1 %v1743_v2  ;;  %1552 = vmatprep.mubr.msk.bf16.mxu1 %vm1707_vm1, %v1706_v0 }
 0xfc6   :  { %1562 = vmatprep.subr.bf16.mxu1 %v1706_v0 }
 0xfd7   :  { %v759_v53 = vpop.permute.xlu1 %758 }
 0xfd8   :  { %v761_v55 = vmul.f32 %v1655_v41, %v759_v53 }
 0xfda   :  { %v1949_v56 = vpack.c.bf16 %v761_v55, %v761_v55 }
 0xfdc   :  { %856 = vrot.lane.b32.xlu0 %v1949_v56, %s1714_s23 }
0x104e   :  { %v857_v57 = vpop.permute.xlu0 %856 }
0x104f   :  { %1535 = vmatmul.mubr.msk.bf16.vlgmr.msra.gmra.mxu0 %vm19_vm2, %v857_v57 }
0x1050   :  { %1545 = vmatpush3.bf16.msra.mxu0 %v1759_v9  ;;  %1546 = vmatprep.mubr.msk.bf16.mxu0 %vm1707_vm1, %v1706_v0 }
0x1051   :  { %1556 = vmatprep.subr.bf16.mxu0 %v1706_v0 }
0x1084   :  { %v975_v58 = vpop.f32.mrf.mxu1 }
0x1085   :  { %982 = vrot.lane.b32.xlu1 %v975_v58, %s1709_s2 }
0x1086   :  { %v1542_v59 = vpop.f32.mrf.mxu1 }
0x1088   :  { %v978_v60 = vpop.f32.mrf.mxu1 }
0x108a   :  { %v1543_v61 = vpop.f32.mrf.mxu1 }
0x10f7   :  { %v983_v1 = vpop.permute.xlu1 %982 }
0x10f8   :  { %v985_v4 = vadd.f32 %v983_v1, %v935_v63 }
0x10fa   :  { %1658 = vtanh.f32 %v985_v4  ;;  %v1403_v15 = vmul.f32 -1.442695, %v985_v4 }
0x1107   :  { %v1659_v6 = vpop.eup %1658 }
0x1108   :  { %995 = vrot.lane.b32.xlu0 %v1659_v6, %s1710_s1 }
0x110f   :  { %v895_v8 = vpop.f32.mrf.mxu0 }
0x1110   :  { %v901_v10 = vadd.f32 %v895_v8, %v855_v7 }
0x1111   :  { %v1536_v11 = vpop.f32.mrf.mxu0 }
0x1112   :  { %1660 = vtanh.f32 %v901_v10  ;;  %v1398_v19 = vmul.f32 -1.442695, %v901_v10 }
0x1113   :  { %v898_v12 = vpop.f32.mrf.mxu0  ;;  %1662 = vpow2.f32 %v1403_v15 }
0x1115   :  { %v1537_v13 = vpop.f32.mrf.mxu0 }
0x111f   :  { %v1661_v14 = vpop.eup %1660 }
0x1120   :  { %911 = vrot.lane.b32.xlu0 %v1661_v14, %s1710_s1  ;;  %v1663_v16 = vpop.eup %1662 }
0x1121   :  { %v989_v18 = vadd.f32 1.0, %v1663_v16 }
0x1123   :  { %1664 = vrcp.f32 %v989_v18 }
0x1124   :  { %1666 = vpow2.f32 %v1398_v19 }
0x1130   :  { %v1665_v20 = vpop.eup %1664 }
0x1131   :  { %v1667_v24 = vpop.eup %1666  ;;  %v993_v29 = vmul.f32 %v1665_v20, %v1931_v36 }
0x1132   :  { %v905_v25 = vadd.f32 1.0, %v1667_v24 }
0x1134   :  { %1668 = vrcp.f32 %v905_v25 }
0x1141   :  { %v1669_v26 = vpop.eup %1668 }
0x1142   :  { %v909_v34 = vmul.f32 %v1669_v26, %v1940_v50 }
0x117a   :  { %v996_v22 = vpop.permute.xlu0 %995 }
0x117b   :  { %v998_v23 = vmul.f32 %v1665_v20, %v996_v22 }
0x117d   :  { %1000 = vrot.lane.b32.xlu1 %v998_v23, %s1711_s18 }
0x1192   :  { %v912_v27 = vpop.permute.xlu0 %911 }
0x1193   :  { %v914_v28 = vmul.f32 %v1669_v26, %v912_v27 }
0x1195   :  { %916 = vrot.lane.b32.xlu0 %v914_v28, %s1711_s18 }
0x11ef   :  { %v1001_v30 = vpop.permute.xlu1 %1000 }
0x11f0   :  { %v1971_v31 = vadd.f32 %v1001_v30, %v993_v29 }
0x11f2   :  { %1670 = vtanh.f32 %v1971_v31 }
0x11ff   :  { %v1671_v33 = vpop.eup %1670 }
0x1200   :  { %1006 = vrot.lane.b32.xlu1 %v1671_v33, %s1712_s21 }
0x1207   :  { %v917_v35 = vpop.permute.xlu0 %916 }
0x1208   :  { %v919_v37 = vadd.f32 %v917_v35, %v909_v34 }
0x120a   :  { %1672 = vtanh.f32 %v919_v37 }
0x1217   :  { %v1673_v38 = vpop.eup %1672 }
0x1218   :  { %922 = vrot.lane.b32.xlu0 %v1673_v38, %s1712_s21 }
0x1272   :  { %v1007_v40 = vpop.permute.xlu1 %1006 }
0x1273   :  { %v1009_v41 = vmul.f32 %v1665_v20, %v1007_v40 }
0x1275   :  { %v1977_v42 = vpack.c.bf16 %v1009_v41, %v1009_v41 }
0x1277   :  { %1100 = vrot.lane.b32.xlu1 %v1977_v42, %s1713_s22 }
0x128a   :  { %v923_v36 = vpop.permute.xlu0 %922 }
0x128b   :  { %v925_v43 = vmul.f32 %v1669_v26, %v923_v36 }
0x128d   :  { %v1981_v45 = vpack.c.bf16 %v925_v43, %v925_v43 }
0x128f   :  { %1020 = vrot.lane.b32.xlu1 %v1981_v45, %s1714_s23 }
0x12e9   :  { %v1101_v46 = vpop.permute.xlu1 %1100 }
0x12ea   :  { %1553 = vmatmul.mubr.msk.bf16.vlgmr.msra.gmra.mxu1 %vm19_vm2, %v1101_v46 }
0x12eb   :  { %1563 = vmatpush3.bf16.msra.mxu1 %v1743_v2  ;;  %1564 = vmatprep.mubr.msk.bf16.mxu1 %vm1707_vm1, %v1706_v0  ;;  %v1406_v2 = vld [vmem:[%s2113_s0 + $0x18] sm:$0xff]  }
0x12ec   :  { %v1019_v53 = vunpack.c.l.bf16 %v1406_v2 }
0x1301   :  { %v1021_v44 = vpop.permute.xlu1 %1020 }
0x1302   :  { %1547 = vmatmul.mubr.msk.bf16.vlgmr.msra.gmra.mxu0 %vm19_vm2, %v1021_v44 }
0x1303   :  { %1557 = vmatpush3.bf16.msra.mxu0 %v1759_v9  ;;  %1558 = vmatprep.mubr.msk.bf16.mxu0 %vm1707_vm1, %v1706_v0  ;;  %v1099_v0 = vunpack.c.l.bf16 %v1962_v62 }
0x13aa   :  { %v1139_v48 = vpop.f32.mrf.mxu1 }
0x13ab   :  { %1146 = vrot.lane.b32.xlu0 %v1139_v48, %s1709_s2 }
0x13ac   :  { %v1554_v50 = vpop.f32.mrf.mxu1 }
0x13ae   :  { %v1142_v51 = vpop.f32.mrf.mxu1 }
0x13b0   :  { %v1555_v52 = vpop.f32.mrf.mxu1 }
0x13c2   :  { %v1059_v55 = vpop.f32.mrf.mxu0 }
0x13c3   :  { %v1065_v57 = vadd.f32 %v1059_v55, %v1019_v53 }
0x13c4   :  { %v1548_v58 = vpop.f32.mrf.mxu0 }
0x13c5   :  { %1674 = vtanh.f32 %v1065_v57  ;;  %v1408_v1 = vmul.f32 -1.442695, %v1065_v57 }
0x13c6   :  { %v1062_v59 = vpop.f32.mrf.mxu0 }
0x13c7   :  { %v1262_v59 = vld [vmem:[%s2113_s0] sm:$0xf] }
0x13c8   :  { %v1549_v9 = vpop.f32.mrf.mxu0 }
0x13c9   :  { %v1263_v9 = vunpack.c.l.bf16 %v1262_v59 }
0x13d2   :  { %v1675_v60 = vpop.eup %1674 }
0x13d3   :  { %1075 = vrot.lane.b32.xlu0 %v1675_v60, %s1710_s1 }
0x141d   :  { %v1147_v61 = vpop.permute.xlu0 %1146 }
0x141e   :  { %v1149_v63 = vadd.f32 %v1147_v61, %v1099_v0 }
0x1420   :  { %1676 = vtanh.f32 %v1149_v63  ;;  %v1413_v12 = vmul.f32 -1.442695, %v1149_v63 }
0x1421   :  { %1678 = vpow2.f32 %v1408_v1 }
0x142d   :  { %v1677_v4 = vpop.eup %1676 }
0x142e   :  { %1159 = vrot.lane.b32.xlu1 %v1677_v4, %s1710_s1  ;;  %v1679_v6 = vpop.eup %1678 }
0x142f   :  { %v1069_v7 = vadd.f32 1.0, %v1679_v6 }
0x1431   :  { %1680 = vrcp.f32 %v1069_v7 }
0x1432   :  { %1682 = vpow2.f32 %v1413_v12 }
0x143e   :  { %v1681_v8 = vpop.eup %1680 }
0x143f   :  { %v1683_v13 = vpop.eup %1682  ;;  %v1073_v18 = vmul.f32 %v1681_v8, %v919_v37  ;;  %v1183_v37 = vunpack.c.h.bf16 %v1406_v2 }
0x1440   :  { %v1153_v62 = vadd.f32 1.0, %v1683_v13 }
0x1442   :  { %1684 = vrcp.f32 %v1153_v62 }
0x1445   :  { %v1076_v10 = vpop.permute.xlu0 %1075 }
0x1446   :  { %v1078_v11 = vmul.f32 %v1681_v8, %v1076_v10 }
0x1448   :  { %1080 = vrot.lane.b32.xlu0 %v1078_v11, %s1711_s18 }
0x144f   :  { %v1685_v14 = vpop.eup %1684 }
0x1450   :  { %v1157_v23 = vmul.f32 %v1685_v14, %v1971_v31 }
0x14a0   :  { %v1160_v15 = vpop.permute.xlu1 %1159 }
0x14a1   :  { %v1162_v16 = vmul.f32 %v1685_v14, %v1160_v15 }
0x14a3   :  { %1164 = vrot.lane.b32.xlu1 %v1162_v16, %s1711_s18 }
0x14ba   :  { %v1081_v19 = vpop.permute.xlu0 %1080 }
0x14bb   :  { %v1083_v20 = vadd.f32 %v1081_v19, %v1073_v18 }
0x14bd   :  { %1686 = vtanh.f32 %v1083_v20 }
0x14ca   :  { %v1687_v22 = vpop.eup %1686 }
0x14cb   :  { %1086 = vrot.lane.b32.xlu0 %v1687_v22, %s1712_s21 }
0x1515   :  { %v1165_v24 = vpop.permute.xlu1 %1164 }
0x1516   :  { %v2004_v25 = vadd.f32 %v1165_v24, %v1157_v23 }
0x1518   :  { %1688 = vtanh.f32 %v2004_v25 }
0x1525   :  { %v1689_v26 = vpop.eup %1688 }
0x1526   :  { %1170 = vrot.lane.b32.xlu1 %v1689_v26, %s1712_s21 }
0x153d   :  { %v1087_v27 = vpop.permute.xlu0 %1086 }
0x153e   :  { %v1089_v28 = vmul.f32 %v1681_v8, %v1087_v27 }
0x1540   :  { %v1090_v29 = vpack.c.bf16 %v1089_v28, %v1089_v28 }
0x1542   :  { %1184 = vrot.lane.b32.xlu0 %v1090_v29, %s1714_s23 }
0x1598   :  { %v1171_v30 = vpop.permute.xlu1 %1170 }
0x1599   :  { %v1173_v33 = vmul.f32 %v1685_v14, %v1171_v30 }
0x159b   :  { %v2009_v34 = vpack.c.bf16 %v1173_v33, %v1173_v33 }
0x159d   :  { %1264 = vrot.lane.b32.xlu1 %v2009_v34, %s1713_s22 }
0x15b4   :  { %v1185_v31 = vpop.permute.xlu0 %1184 }
0x15b5   :  { %1559 = vmatmul.mubr.msk.bf16.vlgmr.msra.gmra.mxu0 %vm19_vm2, %v1185_v31 }
0x160f   :  { %v1265_v35 = vpop.permute.xlu1 %1264 }
0x1610   :  { %1565 = vmatmul.mubr.msk.bf16.vlgmr.msra.gmra.mxu1 %vm19_vm2, %v1265_v35 }
0x1675   :  { %v1223_v38 = vpop.f32.mrf.mxu0 }
0x1676   :  { %v1229_v40 = vadd.f32 %v1223_v38, %v1183_v37 }
0x1677   :  { %v1560_v41 = vpop.f32.mrf.mxu0 }
0x1678   :  { %1690 = vtanh.f32 %v1229_v40  ;;  %v1418_v50 = vmul.f32 -1.442695, %v1229_v40 }
0x1679   :  { %v1226_v36 = vpop.f32.mrf.mxu0 }
0x167a   :  { %1692 = vpow2.f32 %v1418_v50 }
0x167b   :  { %v1561_v43 = vpop.f32.mrf.mxu0 }
0x1685   :  { %v1691_v46 = vpop.eup %1690 }
0x1686   :  { %1239 = vrot.lane.b32.xlu0 %v1691_v46, %s1710_s1 }
0x1687   :  { %v1693_v53 = vpop.eup %1692 }
0x1688   :  { %v1233_v55 = vadd.f32 1.0, %v1693_v53 }
0x168a   :  { %1694 = vrcp.f32 %v1233_v55 }
0x1697   :  { %v1695_v2 = vpop.eup %1694 }
0x1698   :  { %v1237_v63 = vmul.f32 %v1695_v2, %v1083_v20 }
0x16d0   :  { %v1303_v44 = vpop.f32.mrf.mxu1 }
0x16d1   :  { %1310 = vrot.lane.b32.xlu1 %v1303_v44, %s1709_s2 }
0x16d2   :  { %v1566_v48 = vpop.f32.mrf.mxu1 }
0x16d4   :  { %v1306_v51 = vpop.f32.mrf.mxu1 }
0x16d6   :  { %v1567_v52 = vpop.f32.mrf.mxu1 }
0x16f8   :  { %v1240_v57 = vpop.permute.xlu0 %1239 }
0x16f9   :  { %v1242_v58 = vmul.f32 %v1695_v2, %v1240_v57 }
0x16fb   :  { %1244 = vrot.lane.b32.xlu0 %v1242_v58, %s1711_s18 }
0x1743   :  { %v1311_v60 = vpop.permute.xlu1 %1310 }
0x1744   :  { %v1313_v0 = vadd.f32 %v1311_v60, %v1263_v9 }
0x1746   :  { %1696 = vtanh.f32 %v1313_v0  ;;  %v1422_v7 = vmul.f32 -1.442695, %v1313_v0 }
0x1753   :  { %v1697_v61 = vpop.eup %1696 }
0x1754   :  { %1323 = vrot.lane.b32.xlu1 %v1697_v61, %s1710_s1 }
0x176d   :  { %v1245_v1 = vpop.permute.xlu0 %1244 }
0x176e   :  { %v1247_v4 = vadd.f32 %v1245_v1, %v1237_v63 }
0x1770   :  { %1698 = vtanh.f32 %v1247_v4 }
0x1771   :  { %1700 = vpow2.f32 %v1422_v7 }
0x177d   :  { %v1699_v6 = vpop.eup %1698 }
0x177e   :  { %1250 = vrot.lane.b32.xlu0 %v1699_v6, %s1712_s21 }
0x1782   :  { %96 = vrot.lane.b32.xlu0 %v1797_v49, %s1714_s23  ;;  %v1701_v49 = vpop.eup %1700 }
0x1783   :  { %v1317_v8 = vadd.f32 1.0, %v1701_v49 }
0x1785   :  { %1702 = vrcp.f32 %v1317_v8 }
0x1786   :  { %263 = vrot.lane.b32.xlu0 %v1837_v32, %s1714_s23 }
0x178a   :  { %431 = vrot.lane.b32.xlu0 %v1877_v17, %s1714_s23 }
0x178e   :  { %599 = vrot.lane.b32.xlu0 %v1914_v3, %s1714_s23 }
0x1792   :  { %766 = vrot.lane.b32.xlu0 %v1949_v56, %s1714_s23  ;;  %v1703_v32 = vpop.eup %1702 }
0x1793   :  { %v1321_v14 = vmul.f32 %v1703_v32, %v2004_v25 }
0x1796   :  { %930 = vrot.lane.b32.xlu0 %v1981_v45, %s1714_s23 }
0x179a   :  { %1094 = vrot.lane.b32.xlu0 %v1090_v29, %s1714_s23 }
0x17c6   :  { %v1324_v10 = vpop.permute.xlu1 %1323 }
0x17c7   :  { %v1326_v11 = vmul.f32 %v1703_v32, %v1324_v10 }
0x17c9   :  { %1328 = vrot.lane.b32.xlu1 %v1326_v11, %s1711_s18 }
0x17f0   :  { %v1251_v17 = vpop.permute.xlu0 %1250 }
0x17f1   :  { %v1253_v3 = vmul.f32 %v1695_v2, %v1251_v17 }
0x17f3   :  { %v1438_v12 = vpack.c.bf16 %v1253_v3, %v1253_v3 }
0x17f4   :  { %v97_v56 = vpop.permute.xlu0 %96 }
0x17f5   :  { %100 = vst.msk [vmem:[%s2114_s3] sm:$0xf] %vm99_vm3, %v97_v56  ;;  %1258 = vrot.lane.b32.xlu0 %v1438_v12, %s1714_s23 }
0x17f8   :  { %v264_v45 = vpop.permute.xlu0 %263 }
0x17f9   :  { %1360 = vst.msk [vmem:[%s2114_s3 + $0x4] sm:$0xf] %vm99_vm3, %v264_v45 }
0x17fc   :  { %v432_v13 = vpop.permute.xlu0 %431 }
0x17fd   :  { %1370 = vst.msk [vmem:[%s2114_s3 + $0x8] sm:$0xf] %vm99_vm3, %v432_v13 }
0x1800   :  { %v600_v62 = vpop.permute.xlu0 %599 }
0x1801   :  { %1380 = vst.msk [vmem:[%s2114_s3 + $0xc] sm:$0xf] %vm99_vm3, %v600_v62 }
0x1804   :  { %v767_v19 = vpop.permute.xlu0 %766 }
0x1808   :  { %v931_v20 = vpop.permute.xlu0 %930 }
0x180c   :  { %v1095_v23 = vpop.permute.xlu0 %1094 }
0x183b   :  { %v1329_v15 = vpop.permute.xlu1 %1328 }
0x183c   :  { %v1331_v16 = vadd.f32 %v1329_v15, %v1321_v14 }
0x183e   :  { %1704 = vtanh.f32 %v1331_v16 }
0x184b   :  { %v1705_v18 = vpop.eup %1704 }
0x184c   :  { %1334 = vrot.lane.b32.xlu1 %v1705_v18, %s1712_s21 }
0x1850   :  { %180 = vrot.lane.b32.xlu1 %v1783_v39, %s1715_s17 }
0x1854   :  { %349 = vrot.lane.b32.xlu1 %v1822_v21, %s1715_s17 }
0x1858   :  { %517 = vrot.lane.b32.xlu1 %v1862_v5, %s1715_s17 }
0x185c   :  { %685 = vrot.lane.b32.xlu1 %v1902_v54, %s1715_s17 }
0x1860   :  { %850 = vrot.lane.b32.xlu1 %v1936_v47, %s1715_s17 }
0x1864   :  { %1014 = vrot.lane.b32.xlu1 %v1977_v42, %s1715_s17 }
0x1867   :  { %v1259_v26 = vpop.permute.xlu0 %1258 }
0x1868   :  { %1178 = vrot.lane.b32.xlu1 %v2009_v34, %s1715_s17 }
0x18be   :  { %v1335_v22 = vpop.permute.xlu1 %1334 }
0x18bf   :  { %v1337_v24 = vmul.f32 %v1703_v32, %v1335_v22 }
0x18c1   :  { %v1439_v25 = vpack.c.bf16 %v1337_v24, %v1337_v24 }
0x18c2   :  { %v181_v39 = vpop.permute.xlu1 %180 }
0x18c3   :  { %1355 = vst.msk [vmem:[%s2114_s3 + $0x1c] sm:$0xf] %vm184_vm4, %v181_v39  ;;  %1342 = vrot.lane.b32.xlu1 %v1439_v25, %s1715_s17 }
0x18c4   :  { %1420 = vst.msk [vmem:[%s2114_s3 + $0x1c] sm:$0xf] %vm99_vm3, %v1259_v26 }
0x18c6   :  { %v350_v21 = vpop.permute.xlu1 %349 }
0x18c7   :  { %1365 = vst.msk [vmem:[%s2114_s3 + $0x18] sm:$0xf] %vm184_vm4, %v350_v21 }
0x18c8   :  { %1410 = vst.msk [vmem:[%s2114_s3 + $0x18] sm:$0xf] %vm99_vm3, %v1095_v23 }
0x18ca   :  { %v518_v5 = vpop.permute.xlu1 %517 }
0x18cb   :  { %1375 = vst.msk [vmem:[%s2114_s3 + $0x14] sm:$0xf] %vm184_vm4, %v518_v5 }
0x18cc   :  { %1400 = vst.msk [vmem:[%s2114_s3 + $0x14] sm:$0xf] %vm99_vm3, %v931_v20 }
0x18ce   :  { %v686_v54 = vpop.permute.xlu1 %685 }
0x18cf   :  { %1385 = vst.msk [vmem:[%s2114_s3 + $0x10] sm:$0xf] %vm184_vm4, %v686_v54 }
0x18d0   :  { %1390 = vst.msk [vmem:[%s2114_s3 + $0x10] sm:$0xf] %vm99_vm3, %v767_v19 }
0x18d2   :  { %v851_v47 = vpop.permute.xlu1 %850 }
0x18d3   :  { %1395 = vst.msk [vmem:[%s2114_s3 + $0xc] sm:$0xf] %vm184_vm4, %v851_v47 }
0x18d6   :  { %v1015_v42 = vpop.permute.xlu1 %1014 }
0x18d7   :  { %1405 = vst.msk [vmem:[%s2114_s3 + $0x8] sm:$0xf] %vm184_vm4, %v1015_v42 }
0x18da   :  { %v1179_v27 = vpop.permute.xlu1 %1178 }
0x18db   :  { %1415 = vst.msk [vmem:[%s2114_s3 + $0x4] sm:$0xf] %vm184_vm4, %v1179_v27 }
0x1935   :  { %v1343_v28 = vpop.permute.xlu1 %1342 }
0x1936   :  { %1345 = vst.msk [vmem:[%s2114_s3] sm:$0xf] %vm184_vm4, %v1343_v28 }

// kernel: sandglasset_forward.32
= control target key start
LH: loop header
LB: loop body
LE: loop exit
PB: predicated region body
PF: predicated region fallthrough
CT: control target
= control target key end

     0   :  { %vm67_vm0 = vcmask 130048   ;;  %s533_s2 = inlined_call_operand.vmem [shape: bf16[16,16], index: 2, kind: input, shape index: {}]   ;;  %s534_s0 = inlined_call_operand.vmem [shape: bf16[64,16], index: 0, kind: input, shape index: {}]   ;;  %s535_s3 = inlined_call_operand.vmem [shape: f32[1,16], index: 3, kind: input, shape index: {}]   ;;  %s536_s1 = inlined_call_operand.vmem [shape: f32[64,16], index: 1, kind: input, shape index: {}]   ;;  %s537_s4 = inlined_call_operand.vmem [shape: f32[1,16], index: 4, kind: input, shape index: {}]   ;;  %s538_s5 = inlined_call_operand.vmem [shape: f32[1,16], index: 5, kind: input, shape index: {}]   ;;  %s539_s6 = inlined_call_operand.vmem [shape: f32[64,16], index: 6, kind: output, shape index: {}]  }
   0x1   :  { %v337_v0 = vld [vmem:[%s533_s2] sm:$0xff]   ;;  %v339_v2 = vld [vmem:[%s534_s0 + $0x10] sm:$0xff]   ;;  %v340_v3 = vld [vmem:[%s534_s0 + $0x8] sm:$0xff]  }
   0x2   :  { %v338_v1 = vld [vmem:[%s534_s0] sm:$0xff]   ;;  %325 = vmatprep.subr.bf16.mxu0 %v337_v0  ;;  %335 = vmatprep.subr.bf16.mxu1 %v337_v0  ;;  %v341_v4 = vld [vmem:[%s534_s0 + $0x18] sm:$0xff]   ;;  %v147_v8 = vld [vmem:[%s536_s1 + $0x10] sm:$0xff] }
   0x3   :  { %326 = vmatpush3.bf16.msra.mxu0 %v337_v0  ;;  %336 = vmatpush3.bf16.msra.mxu1 %v337_v0  ;;  %v308_v5 = vld [vmem:[%s535_s3] ss:$0 sm:$0xff]  ;;  %v148_v19 = vld [vmem:[%s536_s1 + $0x18] sm:$0xff]  ;;  %v150_v26 = vld [vmem:[%s536_s1 + $0x28] sm:$0xff] }
   0x4   :  { %327 = vmatprep.mubr.msk.bf16.mxu0 %vm67_vm0, %v338_v1  ;;  %331 = vmatprep.mubr.msk.bf16.mxu1 %vm67_vm0, %v339_v2  ;;  %v145_v12 = vld [vmem:[%s536_s1] sm:$0xff]  ;;  %v146_v31 = vld [vmem:[%s536_s1 + $0x8] sm:$0xff]  ;;  %v152_v35 = vld [vmem:[%s536_s1 + $0x38] sm:$0xff] }
   0x5   :  { %v149_v16 = vld [vmem:[%s536_s1 + $0x20] sm:$0xff]  ;;  %v151_v39 = vld [vmem:[%s536_s1 + $0x30] sm:$0xff] }
   0x6   :  { %328 = vmatmul.mubr.msk.bf16.vlgmr.msra.gmra.mxu0 %vm67_vm0, %v340_v3  ;;  %332 = vmatmul.mubr.msk.bf16.vlgmr.msra.gmra.mxu1 %vm67_vm0, %v341_v4 }
  0xc6   :  { %v329_v6 = vpop.f32.mrf.mxu0  ;;  %v333_v7 = vpop.f32.mrf.mxu1 }
  0xc7   :  { %v123_v9 = vadd.f32 %v329_v6, %v308_v5  ;;  %v139_v36 = vadd.f32 %v333_v7, %v308_v5 }
  0xc8   :  { %v114_v10 = vpop.f32.mrf.mxu0  ;;  %v130_v11 = vpop.f32.mrf.mxu1 }
  0xc9   :  { %v115_v13 = vadd.f32 %v308_v5, %v114_v10  ;;  %v131_v14 = vadd.f32 %v308_v5, %v130_v11  ;;  %v155_v15 = vadd.f32 %v147_v8, %v123_v9  ;;  %v159_v43 = vadd.f32 %v151_v39, %v139_v36 }
  0xca   :  { %v330_v17 = vpop.f32.mrf.mxu0  ;;  %v334_v18 = vpop.f32.mrf.mxu1 }
  0xcb   :  { %v126_v20 = vadd.f32 %v330_v17, %v308_v5  ;;  %v169_v21 = vsel %vm67_vm0, %v155_v15, 0.0  ;;  %v153_v22 = vadd.f32 %v145_v12, %v115_v13  ;;  %v157_v25 = vadd.f32 %v149_v16, %v131_v14 }
  0xcc   :  { %v133_v23 = vpop.f32.mrf.mxu1  ;;  %170 = vadd.xlane.f32.xlu1 %v169_v21  ;;  %v117_v24 = vpop.f32.mrf.mxu0  ;;  %v142_v32 = vadd.f32 %v334_v18, %v308_v5  ;;  %v181_v45 = vsel %vm67_vm0, %v159_v43, 0.0 }
  0xcd   :  { %v134_v27 = vadd.f32 %v308_v5, %v133_v23  ;;  %v118_v28 = vadd.f32 %v308_v5, %v117_v24  ;;  %v163_v29 = vsel %vm67_vm0, %v153_v22, 0.0  ;;  %v156_v30 = vadd.f32 %v148_v19, %v126_v20 }
  0xce   :  { %164 = vadd.xlane.f32.xlu0 %v163_v29  ;;  %v175_v37 = vsel %vm67_vm0, %v157_v25, 0.0  ;;  %v160_v41 = vadd.f32 %v152_v35, %v142_v32 }
  0xcf   :  { %v172_v33 = vsel %vm67_vm0, %v156_v30, 0.0  ;;  %v158_v34 = vadd.f32 %v150_v26, %v134_v27  ;;  %v154_v38 = vadd.f32 %v146_v31, %v118_v28 }
  0xd0   :  { %173 = vadd.xlane.f32.xlu1 %v172_v33  ;;  %v184_v44 = vsel %vm67_vm0, %v160_v41, 0.0 }
  0xd1   :  { %v178_v40 = vsel %vm67_vm0, %v158_v34, 0.0  ;;  %v166_v42 = vsel %vm67_vm0, %v154_v38, 0.0 }
  0xd2   :  { %176 = vadd.xlane.f32.xlu0 %v175_v37 }
  0xd4   :  { %179 = vadd.xlane.f32.xlu1 %v178_v40 }
  0xd6   :  { %167 = vadd.xlane.f32.xlu0 %v166_v42 }
  0xd8   :  { %185 = vadd.xlane.f32.xlu1 %v184_v44  ;;  %v318_v44 = vld [vmem:[%s537_s4] ss:$0 sm:$0xff] }
  0xda   :  { %182 = vadd.xlane.f32.xlu0 %v181_v45 }
 0x155   :  { %v171_v46 = vpop.xlane.xlu1 %170 }
 0x156   :  { %v190_v47 = vmul.f32 0.0625, %v171_v46 }
 0x157   :  { %v165_v48 = vpop.xlane.xlu0 %164 }
 0x158   :  { %v447_v49 = vsub.f32 %v155_v15, %v190_v47  ;;  %v188_v50 = vmul.f32 0.0625, %v165_v48  ;;  %v319_v48 = vld [vmem:[%s538_s5] ss:$0 sm:$0xff] }
 0x159   :  { %v174_v51 = vpop.xlane.xlu1 %173 }
 0x15a   :  { %v449_v52 = vsub.f32 %v153_v22, %v188_v50  ;;  %v191_v53 = vmul.f32 0.0625, %v174_v51  ;;  %v206_v54 = vmul.f32 %v447_v49, %v447_v49 }
 0x15b   :  { %v177_v55 = vpop.xlane.xlu0 %176 }
 0x15c   :  { %v453_v56 = vsub.f32 %v156_v30, %v191_v53  ;;  %v192_v57 = vmul.f32 0.0625, %v177_v55  ;;  %v218_v58 = vsel %vm67_vm0, %v206_v54, 0.0  ;;  %v204_v59 = vmul.f32 %v449_v52, %v449_v52 }
 0x15d   :  { %v180_v60 = vpop.xlane.xlu1 %179  ;;  %219 = vadd.xlane.f32.xlu0 %v218_v58 }
 0x15e   :  { %v458_v61 = vsub.f32 %v157_v25, %v192_v57  ;;  %v193_v62 = vmul.f32 0.0625, %v180_v60  ;;  %v207_v63 = vmul.f32 %v453_v56, %v453_v56  ;;  %v212_v3 = vsel %vm67_vm0, %v204_v59, 0.0 }
 0x15f   :  { %v168_v0 = vpop.xlane.xlu0 %167 }
 0x160   :  { %v189_v1 = vmul.f32 0.0625, %v168_v0  ;;  %v221_v2 = vsel %vm67_vm0, %v207_v63, 0.0  ;;  %v208_v4 = vmul.f32 %v458_v61, %v458_v61  ;;  %v466_v6 = vsub.f32 %v158_v34, %v193_v62 }
 0x161   :  { %222 = vadd.xlane.f32.xlu1 %v221_v2  ;;  %v186_v5 = vpop.xlane.xlu1 %185  ;;  %213 = vadd.xlane.f32.xlu0 %v212_v3 }
 0x162   :  { %v468_v7 = vsub.f32 %v154_v38, %v189_v1  ;;  %v195_v8 = vmul.f32 0.0625, %v186_v5  ;;  %v224_v11 = vsel %vm67_vm0, %v208_v4, 0.0  ;;  %v209_v16 = vmul.f32 %v466_v6, %v466_v6 }
 0x163   :  { %v183_v9 = vpop.xlane.xlu0 %182 }
 0x164   :  { %v194_v10 = vmul.f32 0.0625, %v183_v9  ;;  %v205_v12 = vmul.f32 %v468_v7, %v468_v7  ;;  %v473_v13 = vsub.f32 %v160_v41, %v195_v8  ;;  %v227_v18 = vsel %vm67_vm0, %v209_v16, 0.0 }
 0x165   :  { %225 = vadd.xlane.f32.xlu0 %v224_v11 }
 0x166   :  { %v475_v14 = vsub.f32 %v159_v43, %v194_v10  ;;  %v215_v15 = vsel %vm67_vm0, %v205_v12, 0.0  ;;  %v211_v20 = vmul.f32 %v473_v13, %v473_v13 }
 0x167   :  { %216 = vadd.xlane.f32.xlu1 %v215_v15 }
 0x168   :  { %v210_v17 = vmul.f32 %v475_v14, %v475_v14  ;;  %v233_v21 = vsel %vm67_vm0, %v211_v20, 0.0 }
 0x16a   :  { %v230_v19 = vsel %vm67_vm0, %v210_v17, 0.0 }
 0x16b   :  { %228 = vadd.xlane.f32.xlu1 %v227_v18  ;;  %231 = vadd.xlane.f32.xlu0 %v230_v19 }
 0x16f   :  { %234 = vadd.xlane.f32.xlu1 %v233_v21 }
 0x1e6   :  { %v220_v22 = vpop.xlane.xlu0 %219 }
 0x1e7   :  { %v238_v23 = vmul.f32 0.0625, %v220_v22 }
 0x1e9   :  { %v246_v24 = vadd.f32 1e-05, %v238_v23 }
 0x1ea   :  { %v223_v25 = vpop.xlane.xlu1 %222  ;;  %v214_v26 = vpop.xlane.xlu0 %213 }
 0x1eb   :  { %342 = vrsqrt.f32 %v246_v24  ;;  %v239_v27 = vmul.f32 0.0625, %v223_v25  ;;  %v236_v28 = vmul.f32 0.0625, %v214_v26 }
 0x1ed   :  { %v247_v29 = vadd.f32 1e-05, %v239_v27  ;;  %v244_v30 = vadd.f32 1e-05, %v236_v28 }
 0x1ee   :  { %v226_v31 = vpop.xlane.xlu0 %225 }
 0x1ef   :  { %344 = vrsqrt.f32 %v247_v29  ;;  %v240_v32 = vmul.f32 0.0625, %v226_v31 }
 0x1f0   :  { %346 = vrsqrt.f32 %v244_v30  ;;  %v217_v33 = vpop.xlane.xlu1 %216 }
 0x1f1   :  { %v248_v34 = vadd.f32 1e-05, %v240_v32  ;;  %v237_v35 = vmul.f32 0.0625, %v217_v33 }
 0x1f3   :  { %348 = vrsqrt.f32 %v248_v34  ;;  %v245_v36 = vadd.f32 1e-05, %v237_v35 }
 0x1f4   :  { %v229_v37 = vpop.xlane.xlu1 %228  ;;  %v232_v38 = vpop.xlane.xlu0 %231 }
 0x1f5   :  { %350 = vrsqrt.f32 %v245_v36  ;;  %v241_v39 = vmul.f32 0.0625, %v229_v37  ;;  %v242_v40 = vmul.f32 0.0625, %v232_v38 }
 0x1f7   :  { %v249_v41 = vadd.f32 1e-05, %v241_v39  ;;  %v250_v42 = vadd.f32 1e-05, %v242_v40 }
 0x1f8   :  { %v343_v43 = vpop.eup %342  ;;  %v235_v45 = vpop.xlane.xlu1 %234 }
 0x1f9   :  { %v262_v46 = vmul.f32 %v343_v43, %v447_v49  ;;  %352 = vrsqrt.f32 %v249_v41  ;;  %v243_v47 = vmul.f32 0.0625, %v235_v45 }
 0x1fa   :  { %354 = vrsqrt.f32 %v250_v42 }
 0x1fb   :  { %v276_v50 = vmul.f32 %v318_v44, %v262_v46  ;;  %v251_v51 = vadd.f32 1e-05, %v243_v47 }
 0x1fc   :  { %v345_v53 = vpop.eup %344 }
 0x1fd   :  { %v347_v54 = vpop.eup %346  ;;  %v290_v55 = vadd.f32 %v319_v48, %v276_v50  ;;  %v263_v57 = vmul.f32 %v345_v53, %v453_v56  ;;  %356 = vrsqrt.f32 %v251_v51 }
 0x1fe   :  { %v260_v58 = vmul.f32 %v347_v54, %v449_v52 }
 0x1ff   :  { %298 = vst.msk [vmem:[%s539_s6 + $0x10] sm:$0xff] %vm67_vm0, %v290_v55  ;;  %v277_v49 = vmul.f32 %v318_v44, %v263_v57 }
 0x200   :  { %v349_v59 = vpop.eup %348  ;;  %v274_v60 = vmul.f32 %v318_v44, %v260_v58 }
 0x201   :  { %v291_v62 = vadd.f32 %v319_v48, %v277_v49  ;;  %v264_v63 = vmul.f32 %v349_v59, %v458_v61 }
 0x202   :  { %v351_v0 = vpop.eup %350  ;;  %v288_v1 = vadd.f32 %v319_v48, %v274_v60 }
 0x203   :  { %299 = vst.msk [vmem:[%s539_s6 + $0x18] sm:$0xff] %vm67_vm0, %v291_v62  ;;  %v278_v56 = vmul.f32 %v318_v44, %v264_v63  ;;  %v261_v52 = vmul.f32 %v351_v0, %v468_v7 }
 0x204   :  { %296 = vst.msk [vmem:[%s539_s6] sm:$0xff] %vm67_vm0, %v288_v1 }
 0x205   :  { %v292_v2 = vadd.f32 %v319_v48, %v278_v56  ;;  %v275_v3 = vmul.f32 %v318_v44, %v261_v52 }
 0x206   :  { %v353_v4 = vpop.eup %352 }
 0x207   :  { %v355_v5 = vpop.eup %354  ;;  %300 = vst.msk [vmem:[%s539_s6 + $0x20] sm:$0xff] %vm67_vm0, %v292_v2  ;;  %v289_v61 = vadd.f32 %v319_v48, %v275_v3  ;;  %v265_v8 = vmul.f32 %v353_v4, %v466_v6 }
 0x208   :  { %v266_v9 = vmul.f32 %v355_v5, %v475_v14 }
 0x209   :  { %297 = vst.msk [vmem:[%s539_s6 + $0x8] sm:$0xff] %vm67_vm0, %v289_v61  ;;  %v279_v7 = vmul.f32 %v318_v44, %v265_v8 }
 0x20a   :  { %v357_v10 = vpop.eup %356  ;;  %v280_v11 = vmul.f32 %v318_v44, %v266_v9 }
 0x20b   :  { %v293_v12 = vadd.f32 %v319_v48, %v279_v7  ;;  %v267_v15 = vmul.f32 %v357_v10, %v473_v13 }
 0x20c   :  { %v294_v16 = vadd.f32 %v319_v48, %v280_v11 }
 0x20d   :  { %301 = vst.msk [vmem:[%s539_s6 + $0x28] sm:$0xff] %vm67_vm0, %v293_v12  ;;  %v281_v6 = vmul.f32 %v318_v44, %v267_v15 }
 0x20e   :  { %302 = vst.msk [vmem:[%s539_s6 + $0x30] sm:$0xff] %vm67_vm0, %v294_v16 }
 0x20f   :  { %v295_v14 = vadd.f32 %v319_v48, %v281_v6 }
 0x211   :  { %303 = vst.msk [vmem:[%s539_s6 + $0x38] sm:$0xff] %vm67_vm0, %v295_v14 }

// kernel: sandglasset_forward.34
= control target key start
LH: loop header
LB: loop body
LE: loop exit
PB: predicated region body
PF: predicated region fallthrough
CT: control target
= control target key end

     0   :  { %s1436_s13 = smov 0   ;;  %s1596_s0 = inlined_call_operand.vmem [shape: f32[4,16,16], index: 0, kind: input, shape index: {}]   ;;  %s1597_s1 = inlined_call_operand.vmem [shape: f32[16,16], index: 1, kind: input, shape index: {}]   ;;  %s1598_s2 = inlined_call_operand.vmem [shape: f32[1,16], index: 2, kind: input, shape index: {}]   ;;  %s1599_s3 = inlined_call_operand.vmem [shape: f32[1,16], index: 3, kind: input, shape index: {}]   ;;  %s1600_s4 = inlined_call_operand.vmem [shape: bf16[16,48], index: 4, kind: input, shape index: {}]   ;;  %s1601_s5 = inlined_call_operand.vmem [shape: f32[1,48], index: 5, kind: input, shape index: {}]   ;;  %s1602_s6 = inlined_call_operand.vmem [shape: bf16[16,16], index: 6, kind: input, shape index: {}]   ;;  %s1603_s7 = inlined_call_operand.vmem [shape: f32[1,16], index: 7, kind: input, shape index: {}]   ;;  %s1604_s8 = inlined_call_operand.vmem [shape: f32[1,16], index: 8, kind: input, shape index: {}]   ;;  %s1605_s9 = inlined_call_operand.vmem [shape: f32[1,16], index: 9, kind: input, shape index: {}]   ;;  %s1606_s10 = inlined_call_operand.vmem [shape: f32[4,16,16], index: 10, kind: output, shape index: {}]  }
   0x1 LB: > { %s1165_s14 = sadd.s32 4294967295, %s1363_s13   ;;  %p1169_p0 = scmp.ge.s32.totalorder %s1363_s13, 1  ;;  %s1363_s13 = sphi %s1436_s13, %s20_s13  }
   0x2   : > { %p312_p1 = scmp.lt.s32.totalorder %s1363_s13, 5 }
   0x4   : > { %p313_p2 = pnand %p1169_p0, %p312_p1 }
   0x5   : > { %p350_p3 = scmp.lt.s32.totalorder (!%p313_p2), %s1165_s14, 3  ;;  %s1367_s11 = smov (!%p313_p2), 108  }
   0x6   : > { %316 = sbr.rel (%p313_p2) target bundleno = 2030 (0x7ee), region = 60  ;;  %s1368_s12 = smov (!%p313_p2), 112  }
   0x7   : > { %s1369_s16 = smov (!%p313_p2), 124   ;;  %s1370_s17 = smov (!%p313_p2), 120  }
   0x8   : > { %s1372_s19 = smov (!%p313_p2), 116   ;;  %s1373_s20 = smov (!%p313_p2), 100  }
   0x9   : > { %s1374_s21 = smov (!%p313_p2), 96   ;;  %s1375_s22 = smov (!%p313_p2), 88  }
   0xa   : > { %s1376_s23 = smov (!%p313_p2), 84   ;;  %s1377_s24 = smov (!%p313_p2), 92  }
   0xb   : > { %s1608_s14 = smov (!%p350_p3, %s1165_s14), 3  ;;  %vm365_vm0 = vcmask 130048   ;;  %v1315_v14 = vld [vmem:[%s1600_s4] sm:$0xff]   ;;  %v1365_v15 = vmov 0.0   ;;  %vm1366_vm1 = vmmov 0   ;;  %v412_v34 = vld [vmem:[%s1597_s1 + $0x8] sm:$0xff] }
   0xc   : > { %s1194_s15 = sshll.u32 %s1608_s14, 4  ;;  %1216 = vmatprep.subr.bf16.mxu0 %v1365_v15  ;;  %1218 = vmatprep.mubr.msk.bf16.mxu0 %vm1366_vm1, %v1365_v15  ;;  %v1174_v23 = vld [vmem:[%s1598_s2] ss:$0 sm:$0xff]  ;;  %vm479_vm2 = vcmask 31744   ;;  %s1378_s25 = smov 4   ;;  %vm994_vm3 = vcmask 64512  }
   0xd   : > { %s354_s18 = scalar_lea.vmem %s1596_s0, %s1194_s15  ;;  %1217 = vmatpush3.bf16.msra.mxu0 %v1315_v14  ;;  %1222 = vmatprep.subr.bf16.mxu1 %v1365_v15  ;;  %v1175_v25 = vld [vmem:[%s1599_s3] ss:$0 sm:$0xff]  ;;  %s1379_s28 = smov 8   ;;  %vm997_vm4 = vcmask 97280  }
   0xe   : > { %v1452_v0 = vld [vmem:[%s354_s18] sm:$0xff]  ;;  %v1454_v1 = vld [vmem:[%s354_s18 + $0x8] sm:$0xff]  ;;  %1224 = vmatprep.mubr.msk.bf16.mxu1 %vm1366_vm1, %v1365_v15  ;;  %1228 = vmatprep.subr.bf16.mxu0 %v1365_v15  ;;  %s1371_s18 = smov 104   ;;  %s1380_s29 = smov 12  }
   0xf   : > { %v366_v2 = vsel %vm365_vm0, %v1452_v0, 0.0  ;;  %v369_v3 = vsel %vm365_vm0, %v1454_v1, 0.0  ;;  %v411_v33 = vld [vmem:[%s1597_s1] sm:$0xff] }
  0x10   : > { %367 = vadd.xlane.f32.xlu0 %v366_v2  ;;  %v1176_v40 = vld [vmem:[%s1601_s5] ss:$0 sm:$0xff] }
  0x14   : > { %370 = vadd.xlane.f32.xlu0 %v369_v3 }
  0x99   : > { %v368_v4 = vpop.xlane.xlu0 %367 }
  0x9a   : > { %v373_v5 = vmul.f32 0.0625, %v368_v4 }
  0x9c   : > { %v375_v6 = vsub.f32 %v1452_v0, %v373_v5 }
  0x9d   : > { %v371_v7 = vpop.xlane.xlu0 %370 }
  0x9e   : > { %v374_v8 = vmul.f32 0.0625, %v371_v7  ;;  %v377_v9 = vmul.f32 %v375_v6, %v375_v6 }
  0xa0   : > { %v376_v10 = vsub.f32 %v1454_v1, %v374_v8  ;;  %v379_v11 = vsel %vm365_vm0, %v377_v9, 0.0 }
  0xa1   : > { %380 = vadd.xlane.f32.xlu1 %v379_v11 }
  0xa2   : > { %v378_v12 = vmul.f32 %v376_v10, %v376_v10 }
  0xa4   : > { %v382_v13 = vsel %vm365_vm0, %v378_v12, 0.0 }
  0xa5   : > { %383 = vadd.xlane.f32.xlu1 %v382_v13 }
 0x12a   : > { %v381_v16 = vpop.xlane.xlu1 %380 }
 0x12b   : > { %v385_v17 = vmul.f32 0.0625, %v381_v16 }
 0x12d   : > { %v387_v18 = vadd.f32 1e-05, %v385_v17 }
 0x12e   : > { %v384_v19 = vpop.xlane.xlu1 %383 }
 0x12f   : > { %1317 = vrsqrt.f32 %v387_v18  ;;  %v386_v20 = vmul.f32 0.0625, %v384_v19 }
 0x131   : > { %v388_v21 = vadd.f32 1e-05, %v386_v20 }
 0x133   : > { %1319 = vrsqrt.f32 %v388_v21 }
 0x13c   : > { %v1318_v22 = vpop.eup %1317 }
 0x13d   : > { %v391_v24 = vmul.f32 %v1318_v22, %v375_v6 }
 0x13f   : > { %v399_v26 = vmul.f32 %v1174_v23, %v391_v24 }
 0x140   : > { %v1320_v27 = vpop.eup %1319 }
 0x141   : > { %v392_v28 = vmul.f32 %v1320_v27, %v376_v10  ;;  %v407_v29 = vadd.f32 %v1175_v25, %v399_v26 }
 0x143   : > { %v400_v30 = vmul.f32 %v1174_v23, %v392_v28  ;;  %v409_v32 = vadd.f32 %v407_v29, %v1452_v0 }
 0x145   : > { %v408_v31 = vadd.f32 %v1175_v25, %v400_v30  ;;  %v1488_v36 = vadd.f32 %v411_v33, %v409_v32 }
 0x147   : > { %v410_v35 = vadd.f32 %v408_v31, %v1454_v1 }
 0x149   : > { %v1490_v37 = vadd.f32 %v412_v34, %v410_v35 }
 0x14b   : > { %v415_v38 = vpack.c.bf16 %v1490_v37, %v1488_v36 }
 0x14d   : > { %1219 = vmatmul.mubr.msk.bf16.vlgmr.msra.gmra.mxu0 %vm365_vm0, %v415_v38 }
 0x14e   : > { %1230 = vmatprep.mubr.msk.bf16.mxu0 %vm1366_vm1, %v1365_v15 }
 0x20d   : > { %v468_v39 = vpop.f32.mrf.mxu0 }
 0x20e   : > { %v469_v43 = vadd.f32 %v1176_v40, %v468_v39 }
 0x20f   : > { %v1220_v41 = vpop.f32.mrf.mxu0 }
 0x211   : > { %v471_v42 = vpop.f32.mrf.mxu0 }
 0x212   : > { %v472_v44 = vadd.f32 %v1176_v40, %v471_v42 }
 0x213   : > { %v1221_v45 = vpop.f32.mrf.mxu0 }
 0x214   : > { %v1500_v46 = vpack.c.bf16 %v472_v44, %v469_v43 }
 0x216   : > { %601 = vrot.lane.b32.xlu1 %v1500_v46, %s1367_s11  ;;  %477 = vrot.lane.b32.xlu0 %v1500_v46, %s1368_s12 }
 0x21a   : > { %599 = vrot.lane.b32.xlu1 %v1500_v46, %s1369_s16  ;;  %722 = vrot.lane.b32.xlu0 %v1500_v46, %s1370_s17 }
 0x21e   : > { %724 = vrot.lane.b32.xlu1 %v1500_v46, %s1371_s18  ;;  %845 = vrot.lane.b32.xlu0 %v1500_v46, %s1372_s19 }
 0x222   : > { %847 = vrot.lane.b32.xlu1 %v1500_v46, %s1373_s20 }
 0x288   : > { %v478_v47 = vpop.permute.xlu0 %477  ;;  %v602_v49 = vpop.permute.xlu1 %601 }
 0x289   : > { %v484_v48 = vsel %vm479_vm2, %v478_v47, 0  ;;  %v607_v51 = vsel %vm479_vm2, %v602_v49, 0 }
 0x28a   : > { %1223 = vmatpush3.bf16.xpose.msra.mxu1 %v484_v48 }
 0x28b   : > { %1234 = vmatprep.subr.bf16.mxu1 %v1365_v15 }
 0x28c   : > { %v600_v50 = vpop.permute.xlu1 %599  ;;  %v723_v55 = vpop.permute.xlu0 %722 }
 0x290   : > { %v725_v52 = vpop.permute.xlu1 %724  ;;  %v846_v57 = vpop.permute.xlu0 %845 }
 0x291   : > { %1225 = vmatmul.mubr.msk.bf16.vlgmr.msra.gmra.mxu1 %vm479_vm2, %v1500_v46  ;;  %v730_v53 = vsel %vm479_vm2, %v725_v52, 0 }
 0x292   : > { %1235 = vmatpush3.bf16.xpose.msra.mxu1 %v607_v51  ;;  %1236 = vmatprep.mubr.msk.bf16.mxu1 %vm1366_vm1, %v1365_v15 }
 0x293   : > { %1246 = vmatprep.subr.bf16.mxu1 %v1365_v15 }
 0x294   : > { %v848_v54 = vpop.permute.xlu1 %847 }
 0x295   : > { %v853_v56 = vsel %vm479_vm2, %v848_v54, 0 }
 0x299   : > { %1237 = vmatmul.mubr.msk.bf16.vlgmr.msra.gmra.mxu1 %vm479_vm2, %v600_v50 }
 0x29a   : > { %1247 = vmatpush3.bf16.xpose.msra.mxu1 %v730_v53  ;;  %1248 = vmatprep.mubr.msk.bf16.mxu1 %vm1366_vm1, %v1365_v15 }
 0x29b   : > { %1258 = vmatprep.subr.bf16.mxu1 %v1365_v15 }
 0x2a1   : > { %1249 = vmatmul.mubr.msk.bf16.vlgmr.msra.gmra.mxu1 %vm479_vm2, %v723_v55 }
 0x2a2   : > { %1259 = vmatpush3.bf16.xpose.msra.mxu1 %v853_v56  ;;  %1260 = vmatprep.mubr.msk.bf16.mxu1 %vm1366_vm1, %v1365_v15 }
 0x2a3   : > { %1270 = vmatprep.subr.bf16.mxu1 %v1365_v15 }
 0x2a9   : > { %1261 = vmatmul.mubr.msk.bf16.vlgmr.msra.gmra.mxu1 %vm479_vm2, %v846_v57 }
 0x2aa   : > { %1272 = vmatprep.mubr.msk.bf16.mxu1 %vm1366_vm1, %v1365_v15 }
 0x351   : > { %v520_v58 = vpop.f32.mrf.mxu1 }
 0x352   : > { %v527_v59 = vmul.f32 0.5, %v520_v58 }
 0x353   : > { %v1226_v60 = vpop.f32.mrf.mxu1 }
 0x354   : > { %v529_v61 = vsel %vm365_vm0, %v527_v59, -inf }
 0x355   : > { %530 = vmax.xlane.f32.xlu1 %v529_v61  ;;  %v523_v62 = vpop.f32.mrf.mxu1 }
 0x356   : > { %v528_v63 = vmul.f32 0.5, %v523_v62 }
 0x357   : > { %v1227_v2 = vpop.f32.mrf.mxu1 }
 0x358   : > { %v532_v3 = vsel %vm365_vm0, %v528_v63, -inf }
 0x359   : > { %533 = vmax.xlane.f32.xlu0 %v532_v3  ;;  %v643_v4 = vpop.f32.mrf.mxu1 }
 0x35a   : > { %v650_v5 = vmul.f32 0.5, %v643_v4 }
 0x35b   : > { %v1238_v6 = vpop.f32.mrf.mxu1 }
 0x35c   : > { %v652_v7 = vsel %vm365_vm0, %v650_v5, -inf }
 0x35d   : > { %653 = vmax.xlane.f32.xlu0 %v652_v7  ;;  %v646_v8 = vpop.f32.mrf.mxu1 }
 0x35e   : > { %v651_v9 = vmul.f32 0.5, %v646_v8 }
 0x35f   : > { %v1239_v10 = vpop.f32.mrf.mxu1 }
 0x360   : > { %v655_v11 = vsel %vm365_vm0, %v651_v9, -inf }
 0x361   : > { %656 = vmax.xlane.f32.xlu0 %v655_v11  ;;  %v766_v12 = vpop.f32.mrf.mxu1 }
 0x362   : > { %v773_v13 = vmul.f32 0.5, %v766_v12 }
 0x363   : > { %v1250_v14 = vpop.f32.mrf.mxu1 }
 0x364   : > { %v775_v16 = vsel %vm365_vm0, %v773_v13, -inf }
 0x365   : > { %776 = vmax.xlane.f32.xlu1 %v775_v16  ;;  %v769_v17 = vpop.f32.mrf.mxu1 }
 0x366   : > { %v774_v18 = vmul.f32 0.5, %v769_v17 }
 0x367   : > { %v1251_v19 = vpop.f32.mrf.mxu1 }
 0x368   : > { %v778_v20 = vsel %vm365_vm0, %v774_v18, -inf }
 0x369   : > { %779 = vmax.xlane.f32.xlu0 %v778_v20  ;;  %v889_v21 = vpop.f32.mrf.mxu1 }
 0x36a   : > { %v896_v22 = vmul.f32 0.5, %v889_v21 }
 0x36b   : > { %v1262_v23 = vpop.f32.mrf.mxu1 }
 0x36c   : > { %v898_v24 = vsel %vm365_vm0, %v896_v22, -inf }
 0x36d   : > { %899 = vmax.xlane.f32.xlu1 %v898_v24  ;;  %v892_v25 = vpop.f32.mrf.mxu1 }
 0x36e   : > { %v897_v26 = vmul.f32 0.5, %v892_v25 }
 0x36f   : > { %v1263_v27 = vpop.f32.mrf.mxu1 }
 0x370   : > { %v901_v28 = vsel %vm365_vm0, %v897_v26, -inf }
 0x371   : > { %902 = vmax.xlane.f32.xlu0 %v901_v28 }
 0x37e   : > { %552 = vrot.lane.b32.xlu1 %v1500_v46, %s1374_s21  ;;  %s359_s21 = scalar_lea.vmem %s1606_s10, %s1194_s15 }
 0x3de   : > { %v531_v29 = vpop.xlane.xlu1 %530 }
 0x3df   : > { %v535_v30 = vsub.f32 %v527_v59, %v531_v29 }
 0x3e1   : > { %v537_v31 = vmul.f32 1.442695, %v535_v30 }
 0x3e2   : > { %v534_v32 = vpop.xlane.xlu0 %533 }
 0x3e3   : > { %1321 = vpow2.f32 %v537_v31  ;;  %v536_v33 = vsub.f32 %v528_v63, %v534_v32 }
 0x3e5   : > { %v539_v34 = vmul.f32 1.442695, %v536_v33 }
 0x3e6   : > { %v654_v35 = vpop.xlane.xlu0 %653 }
 0x3e7   : > { %1323 = vpow2.f32 %v539_v34  ;;  %v658_v38 = vsub.f32 %v650_v5, %v654_v35 }
 0x3e9   : > { %v660_v39 = vmul.f32 1.442695, %v658_v38 }
 0x3ea   : > { %v657_v40 = vpop.xlane.xlu0 %656 }
 0x3eb   : > { %1325 = vpow2.f32 %v660_v39  ;;  %v659_v41 = vsub.f32 %v651_v9, %v657_v40 }
 0x3ed   : > { %v662_v42 = vmul.f32 1.442695, %v659_v41 }
 0x3ee   : > { %v777_v43 = vpop.xlane.xlu1 %776 }
 0x3ef   : > { %1327 = vpow2.f32 %v662_v42  ;;  %v781_v44 = vsub.f32 %v773_v13, %v777_v43 }
 0x3f0   : > { %v1322_v45 = vpop.eup %1321 }
 0x3f1   : > { %v783_v47 = vmul.f32 1.442695, %v781_v44  ;;  %v541_v48 = vsel %vm365_vm0, %v1322_v45, 0.0 }
 0x3f2   : > { %542 = vadd.xlane.f32.xlu1 %v541_v48  ;;  %v780_v49 = vpop.xlane.xlu0 %779 }
 0x3f3   : > { %1329 = vpow2.f32 %v783_v47  ;;  %v782_v50 = vsub.f32 %v774_v18, %v780_v49 }
 0x3f4   : > { %v1324_v51 = vpop.eup %1323 }
 0x3f5   : > { %v785_v52 = vmul.f32 1.442695, %v782_v50  ;;  %v544_v53 = vsel %vm365_vm0, %v1324_v51, 0.0 }
 0x3f6   : > { %v900_v54 = vpop.xlane.xlu1 %899  ;;  %545 = vadd.xlane.f32.xlu0 %v544_v53 }
 0x3f7   : > { %1331 = vpow2.f32 %v785_v52  ;;  %v904_v55 = vsub.f32 %v896_v22, %v900_v54 }
 0x3f8   : > { %v1326_v56 = vpop.eup %1325 }
 0x3f9   : > { %v906_v57 = vmul.f32 1.442695, %v904_v55  ;;  %v664_v58 = vsel %vm365_vm0, %v1326_v56, 0.0 }
 0x3fa   : > { %v553_v59 = vpop.permute.xlu1 %552  ;;  %665 = vadd.xlane.f32.xlu1 %v664_v58  ;;  %v903_v60 = vpop.xlane.xlu0 %902 }
 0x3fb   : > { %1333 = vpow2.f32 %v906_v57  ;;  %v905_v61 = vsub.f32 %v897_v26, %v903_v60  ;;  %1229 = vmatpush3.bf16.msra.mxu0 %v553_v59 }
 0x3fc   : > { %v1328_v62 = vpop.eup %1327  ;;  %1240 = vmatprep.subr.bf16.mxu0 %v1365_v15 }
 0x3fd   : > { %v908_v63 = vmul.f32 1.442695, %v905_v61  ;;  %v667_v2 = vsel %vm365_vm0, %v1328_v62, 0.0 }
 0x3fe   : > { %668 = vadd.xlane.f32.xlu0 %v667_v2 }
 0x3ff   : > { %1335 = vpow2.f32 %v908_v63 }
 0x400   : > { %v1330_v3 = vpop.eup %1329 }
 0x401   : > { %v787_v4 = vsel %vm365_vm0, %v1330_v3, 0.0 }
 0x402   : > { %788 = vadd.xlane.f32.xlu1 %v787_v4 }
 0x404   : > { %v1332_v5 = vpop.eup %1331 }
 0x405   : > { %v790_v6 = vsel %vm365_vm0, %v1332_v5, 0.0 }
 0x406   : > { %791 = vadd.xlane.f32.xlu0 %v790_v6 }
 0x408   : > { %v1334_v7 = vpop.eup %1333 }
 0x409   : > { %v910_v8 = vsel %vm365_vm0, %v1334_v7, 0.0 }
 0x40a   : > { %911 = vadd.xlane.f32.xlu1 %v910_v8 }
 0x40c   : > { %v1336_v9 = vpop.eup %1335 }
 0x40d   : > { %v913_v10 = vsel %vm365_vm0, %v1336_v9, 0.0 }
 0x40e   : > { %914 = vadd.xlane.f32.xlu0 %v913_v10 }
 0x41b   : > { %798 = vrot.lane.b32.xlu1 %v1500_v46, %s1375_s22 }
 0x41f   : > { %921 = vrot.lane.b32.xlu1 %v1500_v46, %s1376_s23 }
 0x424   : > { %675 = vrot.lane.b32.xlu0 %v1500_v46, %s1377_s24 }
 0x47b   : > { %v543_v11 = vpop.xlane.xlu1 %542 }
 0x47c   : > { %1337 = vrcp.f32 %v543_v11 }
 0x47f   : > { %v546_v12 = vpop.xlane.xlu0 %545 }
 0x480   : > { %1339 = vrcp.f32 %v546_v12 }
 0x483   : > { %v666_v14 = vpop.xlane.xlu1 %665 }
 0x487   : > { %v669_v13 = vpop.xlane.xlu0 %668 }
 0x488   : > { %1341 = vrcp.f32 %v669_v13 }
 0x489   : > { %v1338_v16 = vpop.eup %1337  ;;  %1343 = vrcp.f32 %v666_v14 }
 0x48a   : > { %v549_v18 = vmul.f32 %v1338_v16, %v1322_v45 }
 0x48b   : > { %v789_v21 = vpop.xlane.xlu1 %788 }
 0x48d   : > { %v1340_v17 = vpop.eup %1339 }
 0x48e   : > { %v550_v19 = vmul.f32 %v1340_v17, %v1324_v51 }
 0x48f   : > { %v792_v20 = vpop.xlane.xlu0 %791 }
 0x490   : > { %v551_v22 = vpack.c.bf16 %v550_v19, %v549_v18  ;;  %1345 = vrcp.f32 %v792_v20  ;;  %v1187_v19 = vld [vmem:[%s1603_s7] ss:$0 sm:$0xff] }
 0x491   : > { %1347 = vrcp.f32 %v789_v21 }
 0x492   : > { %1231 = vmatmul.mubr.msk.bf16.vlgmr.msra.gmra.mxu0 %vm365_vm0, %v551_v22 }
 0x493   : > { %1242 = vmatprep.mubr.msk.bf16.mxu0 %vm1366_vm1, %v1365_v15  ;;  %v912_v25 = vpop.xlane.xlu1 %911 }
 0x495   : > { %v1342_v46 = vpop.eup %1341 }
 0x496   : > { %v1344_v24 = vpop.eup %1343  ;;  %v673_v26 = vmul.f32 %v1342_v46, %v1328_v62 }
 0x497   : > { %v915_v23 = vpop.xlane.xlu0 %914  ;;  %v672_v28 = vmul.f32 %v1344_v24, %v1326_v56  ;;  %v799_v31 = vpop.permute.xlu1 %798 }
 0x498   : > { %1349 = vrcp.f32 %v915_v23 }
 0x499   : > { %1351 = vrcp.f32 %v912_v25  ;;  %v674_v29 = vpack.c.bf16 %v673_v26, %v672_v28 }
 0x49b   : > { %v676_v27 = vpop.permute.xlu0 %675  ;;  %v922_v39 = vpop.permute.xlu1 %921 }
 0x49c   : > { %1241 = vmatpush3.bf16.msra.mxu0 %v676_v27 }
 0x49d   : > { %1252 = vmatprep.subr.bf16.mxu0 %v1365_v15  ;;  %v1346_v30 = vpop.eup %1345 }
 0x49e   : > { %v1348_v32 = vpop.eup %1347  ;;  %v796_v33 = vmul.f32 %v1346_v30, %v1332_v5 }
 0x49f   : > { %1243 = vmatmul.mubr.msk.bf16.vlgmr.msra.gmra.mxu0 %vm365_vm0, %v674_v29  ;;  %v795_v34 = vmul.f32 %v1348_v32, %v1330_v3 }
 0x4a0   : > { %1253 = vmatpush3.bf16.msra.mxu0 %v799_v31  ;;  %1254 = vmatprep.mubr.msk.bf16.mxu0 %vm1366_vm1, %v1365_v15 }
 0x4a1   : > { %1264 = vmatprep.subr.bf16.mxu0 %v1365_v15  ;;  %v797_v35 = vpack.c.bf16 %v796_v33, %v795_v34 }
 0x4a5   : > { %v1350_v38 = vpop.eup %1349 }
 0x4a6   : > { %v1352_v40 = vpop.eup %1351  ;;  %v919_v41 = vmul.f32 %v1350_v38, %v1336_v9 }
 0x4a7   : > { %1255 = vmatmul.mubr.msk.bf16.vlgmr.msra.gmra.mxu0 %vm365_vm0, %v797_v35  ;;  %v918_v42 = vmul.f32 %v1352_v40, %v1334_v7 }
 0x4a8   : > { %1265 = vmatpush3.bf16.msra.mxu0 %v922_v39  ;;  %1266 = vmatprep.mubr.msk.bf16.mxu0 %vm1366_vm1, %v1365_v15  ;;  %v1316_v15 = vld [vmem:[%s1602_s6] sm:$0xff]  }
 0x4a9   : > { %v920_v43 = vpack.c.bf16 %v919_v41, %v918_v42  ;;  %1271 = vmatpush3.bf16.msra.mxu1 %v1316_v15 }
 0x4af   : > { %1267 = vmatmul.mubr.msk.bf16.vlgmr.msra.gmra.mxu0 %vm365_vm0, %v920_v43 }
 0x552   : > { %v592_v44 = vpop.f32.mrf.mxu0 }
 0x554   : > { %v1232_v45 = vpop.f32.mrf.mxu0 }
 0x556   : > { %v595_v47 = vpop.f32.mrf.mxu0 }
 0x558   : > { %v1233_v48 = vpop.f32.mrf.mxu0 }
 0x55f   : > { %v715_v49 = vpop.f32.mrf.mxu0 }
 0x561   : > { %v1244_v50 = vpop.f32.mrf.mxu0 }
 0x563   : > { %v718_v51 = vpop.f32.mrf.mxu0 }
 0x564   : > { %v1300_v52 = vpack.i.bf16 %v718_v51, %v715_v49  ;;  %v1191_v49 = vld [vmem:[%s1605_s9] ss:$0 sm:$0xff] }
 0x565   : > { %v1245_v53 = vpop.f32.mrf.mxu0 }
 0x566   : > { %1301 = vrot.lane.b32.xlu1 %v1300_v52, %s1378_s25 }
 0x567   : > { %v838_v54 = vpop.f32.mrf.mxu0 }
 0x569   : > { %v1256_v55 = vpop.f32.mrf.mxu0 }
 0x56b   : > { %v841_v56 = vpop.f32.mrf.mxu0 }
 0x56c   : > { %v1305_v57 = vpack.i.bf16 %v841_v56, %v838_v54 }
 0x56d   : > { %v1257_v58 = vpop.f32.mrf.mxu0 }
 0x56e   : > { %1306 = vrot.lane.b32.xlu0 %v1305_v57, %s1379_s28 }
 0x56f   : > { %v961_v59 = vpop.f32.mrf.mxu0 }
 0x571   : > { %v1268_v60 = vpop.f32.mrf.mxu0 }
 0x573   : > { %v964_v61 = vpop.f32.mrf.mxu0 }
 0x574   : > { %v1310_v62 = vpack.i.bf16 %v964_v61, %v961_v59 }
 0x575   : > { %v1269_v63 = vpop.f32.mrf.mxu0 }
 0x576   : > { %1311 = vrot.lane.b32.xlu1 %v1310_v62, %s1380_s29 }
 0x5d8   : > { %v1302_v2 = vpop.permute.xlu1 %1301 }
 0x5d9   : > { %v1304_v4 = vunpack.i.h.bf16 %v1302_v2  ;;  %v1303_v5 = vunpack.i.l.bf16 %v1302_v2 }
 0x5db   : > { %v993_v9 = vsel %vm479_vm2, %v595_v47, %v1304_v4  ;;  %v992_v10 = vsel %vm479_vm2, %v592_v44, %v1303_v5  ;;  %v1190_v47 = vld [vmem:[%s1604_s8] ss:$0 sm:$0xff] }
 0x5e0   : > { %v1307_v3 = vpop.permute.xlu0 %1306 }
 0x5e1   : > { %v1309_v6 = vunpack.i.h.bf16 %v1307_v3  ;;  %v1308_v7 = vunpack.i.l.bf16 %v1307_v3 }
 0x5e3   : > { %v996_v13 = vsel %vm994_vm3, %v993_v9, %v1309_v6  ;;  %v995_v14 = vsel %vm994_vm3, %v992_v10, %v1308_v7 }
 0x5e8   : > { %v1312_v8 = vpop.permute.xlu1 %1311 }
 0x5e9   : > { %v1314_v11 = vunpack.i.h.bf16 %v1312_v8  ;;  %v1313_v12 = vunpack.i.l.bf16 %v1312_v8 }
 0x5eb   : > { %v999_v16 = vsel %vm997_vm4, %v996_v13, %v1314_v11  ;;  %v998_v17 = vsel %vm997_vm4, %v995_v14, %v1313_v12 }
 0x5ec   : > { %v1000_v18 = vpack.c.bf16 %v999_v16, %v998_v17 }
 0x5ee   : > { %1273 = vmatmul.mubr.msk.bf16.vlgmr.msra.gmra.mxu1 %vm365_vm0, %v1000_v18 }
 0x6ae   : > { %v1053_v20 = vpop.f32.mrf.mxu1 }
 0x6af   : > { %v1054_v21 = vadd.f32 %v1187_v19, %v1053_v20 }
 0x6b0   : > { %v1274_v22 = vpop.f32.mrf.mxu1 }
 0x6b1   : > { %v1060_v46 = vadd.f32 %v1054_v21, %v1488_v36 }
 0x6b2   : > { %v1056_v23 = vpop.f32.mrf.mxu1 }
 0x6b3   : > { %v1057_v24 = vadd.f32 %v1187_v19, %v1056_v23  ;;  %v1064_v25 = vsel %vm365_vm0, %v1060_v46, 0.0 }
 0x6b4   : > { %1065 = vadd.xlane.f32.xlu0 %v1064_v25  ;;  %v1275_v26 = vpop.f32.mrf.mxu1 }
 0x6b5   : > { %v1061_v27 = vadd.f32 %v1057_v24, %v1490_v37 }
 0x6b7   : > { %v1067_v28 = vsel %vm365_vm0, %v1061_v27, 0.0 }
 0x6b8   : > { %1068 = vadd.xlane.f32.xlu1 %v1067_v28 }
 0x73d   : > { %v1066_v29 = vpop.xlane.xlu0 %1065 }
 0x73e   : > { %v1070_v30 = vmul.f32 0.0625, %v1066_v29 }
 0x740   : > { %v1072_v31 = vsub.f32 %v1060_v46, %v1070_v30 }
 0x741   : > { %v1069_v32 = vpop.xlane.xlu1 %1068 }
 0x742   : > { %v1071_v33 = vmul.f32 0.0625, %v1069_v32  ;;  %v1074_v34 = vmul.f32 %v1072_v31, %v1072_v31 }
 0x744   : > { %v1073_v35 = vsub.f32 %v1061_v27, %v1071_v33  ;;  %v1076_v36 = vsel %vm365_vm0, %v1074_v34, 0.0 }
 0x745   : > { %1077 = vadd.xlane.f32.xlu0 %v1076_v36 }
 0x746   : > { %v1075_v38 = vmul.f32 %v1073_v35, %v1073_v35 }
 0x748   : > { %v1079_v39 = vsel %vm365_vm0, %v1075_v38, 0.0 }
 0x749   : > { %1080 = vadd.xlane.f32.xlu0 %v1079_v39 }
 0x7ce   : > { %v1078_v40 = vpop.xlane.xlu0 %1077 }
 0x7cf   : > { %v1082_v37 = vmul.f32 0.0625, %v1078_v40 }
 0x7d1   : > { %v1084_v41 = vadd.f32 1e-05, %v1082_v37 }
 0x7d2   : > { %v1081_v42 = vpop.xlane.xlu0 %1080 }
 0x7d3   : > { %1353 = vrsqrt.f32 %v1084_v41  ;;  %v1083_v43 = vmul.f32 0.0625, %v1081_v42 }
 0x7d5   : > { %v1085_v44 = vadd.f32 1e-05, %v1083_v43 }
 0x7d7   : > { %1355 = vrsqrt.f32 %v1085_v44 }
 0x7e0   : > { %v1354_v45 = vpop.eup %1353 }
 0x7e1   : > { %v1088_v48 = vmul.f32 %v1354_v45, %v1072_v31 }
 0x7e3   : > { %v1096_v50 = vmul.f32 %v1190_v47, %v1088_v48 }
 0x7e4   : > { %v1356_v51 = vpop.eup %1355 }
 0x7e5   : > { %v1104_v52 = vadd.f32 %v1191_v49, %v1096_v50  ;;  %v1089_v53 = vmul.f32 %v1356_v51, %v1073_v35 }
 0x7e7   : > { %v1106_v54 = vadd.f32 %v1104_v52, %v1452_v0  ;;  %v1097_v55 = vmul.f32 %v1190_v47, %v1089_v53 }
 0x7e9   : > { %1108 = vst.msk [vmem:[%s359_s21] sm:$0xff] %vm365_vm0, %v1106_v54  ;;  %v1105_v15 = vadd.f32 %v1191_v49, %v1097_v55 }
 0x7eb   : > { %v1107_v56 = vadd.f32 %v1105_v15, %v1454_v1 }
 0x7ed   : > { %1109 = vst.msk [vmem:[%s359_s21 + $0x8] sm:$0xff] %vm365_vm0, %v1107_v56 }
 0x7ee PF: > { %s20_s13 = sadd.s32 1, %s1363_s13  }
 0x7ef   : > { %p17_p4 = scmp.ge.s32.totalorder %s20_s13, 6  }
 0x7f1   :  { %19 = sbr.rel (!%p17_p4) target bundleno = 1 (0x1), region = 90 }

// kernel: sandglasset_forward.41
= control target key start
LH: loop header
LB: loop body
LE: loop exit
PB: predicated region body
PF: predicated region fallthrough
CT: control target
= control target key end

     0   :  { %v99_v0 = vmov 0.0   ;;  %vm100_vm0 = vmmov 0   ;;  %vm33_vm1 = vcmask 130048   ;;  %vm78_vm2 = vcmask 523264   ;;  %s139_s1 = inlined_call_operand.vmem [shape: bf16[16,64], index: 1, kind: input, shape index: {}]   ;;  %s140_s0 = inlined_call_operand.vmem [shape: f32[16,16], index: 0, kind: input, shape index: {}]   ;;  %s141_s2 = inlined_call_operand.vmem [shape: f32[1,64], index: 2, kind: input, shape index: {}]   ;;  %s142_s3 = inlined_call_operand.vmem [shape: f32[16,64], index: 3, kind: output, shape index: {}]  }
   0x1   :  { %90 = vmatprep.subr.bf16.mxu0 %v99_v0  ;;  %v98_v1 = vld [vmem:[%s139_s1] sm:$0xff]   ;;  %92 = vmatprep.mubr.msk.bf16.mxu0 %vm100_vm0, %v99_v0  ;;  %v16_v3 = vld [vmem:[%s140_s0 + $0x8] sm:$0xff] }
   0x2   :  { %v15_v2 = vld [vmem:[%s140_s0] sm:$0xff]  ;;  %91 = vmatpush3.bf16.msra.mxu0 %v98_v1 }
   0x3   :  { %v17_v4 = vpack.c.bf16 %v16_v3, %v15_v2  ;;  %v85_v5 = vld [vmem:[%s141_s2] ss:$0 sm:$0xff] }
   0x5   :  { %93 = vmatmul.mubr.msk.bf16.vlgmr.msra.gmra.mxu0 %vm33_vm1, %v17_v4 }
  0xc5   :  { %v71_v6 = vpop.f32.mrf.mxu0 }
  0xc6   :  { %v72_v7 = vadd.f32 %v85_v5, %v71_v6 }
  0xc7   :  { %v94_v8 = vpop.f32.mrf.mxu0 }
  0xc8   :  { %79 = vst.msk [vmem:[%s142_s3] sm:$0xff] %vm78_vm2, %v72_v7 }
  0xc9   :  { %v74_v9 = vpop.f32.mrf.mxu0 }
  0xca   :  { %v75_v10 = vadd.f32 %v85_v5, %v74_v9 }
  0xcb   :  { %v95_v11 = vpop.f32.mrf.mxu0 }
  0xcc   :  { %80 = vst.msk [vmem:[%s142_s3 + $0x8] sm:$0xff] %vm78_vm2, %v75_v10 }

// kernel: sandglasset_forward.39
= control target key start
LH: loop header
LB: loop body
LE: loop exit
PB: predicated region body
PF: predicated region fallthrough
CT: control target
= control target key end

     0   :  { %v138_v0 = vmov 0.0   ;;  %vm139_vm0 = vmmov 0   ;;  %vm57_vm1 = vcmask 523264   ;;  %vm102_vm2 = vcmask 130048   ;;  %s187_s1 = inlined_call_operand.vmem [shape: bf16[64,16], index: 1, kind: input, shape index: {}]   ;;  %s188_s0 = inlined_call_operand.vmem [shape: f32[16,64], index: 0, kind: input, shape index: {}]   ;;  %s189_s2 = inlined_call_operand.vmem [shape: f32[1,16], index: 2, kind: input, shape index: {}]   ;;  %s190_s3 = inlined_call_operand.vmem [shape: f32[16,16], index: 3, kind: output, shape index: {}]  }
   0x1   :  { %120 = vmatprep.subr.bf16.mxu0 %v138_v0  ;;  %v134_v1 = vld [vmem:[%s187_s1 + $0x18] sm:$0xff]   ;;  %128 = vmatprep.mubr.msk.bf16.mxu0 %vm139_vm0, %v138_v0  ;;  %v135_v2 = vld [vmem:[%s187_s1 + $0x10] sm:$0xff]   ;;  %v136_v3 = vld [vmem:[%s187_s1 + $0x8] sm:$0xff]  }
   0x2   :  { %121 = vmatpush3.bf16.msra.mxu0 %v134_v1  ;;  %v137_v4 = vld [vmem:[%s187_s1] sm:$0xff]   ;;  %v16_v6 = vld [vmem:[%s188_s0 + $0x8] sm:$0xff] }
   0x3   :  { %122 = vmatprep.subr.bf16.mxu0 %v138_v0  ;;  %v15_v5 = vld [vmem:[%s188_s0] sm:$0xff] }
   0x4   :  { %v17_v7 = vpack.c.bf16 %v16_v6, %v15_v5  ;;  %v109_v8 = vld [vmem:[%s189_s2] ss:$0 sm:$0xff] }
   0x6   :  { %123 = vmatpush3.bf16.msra.mxu0 %v135_v2 }
   0x7   :  { %124 = vmatprep.subr.bf16.mxu0 %v138_v0 }
   0xa   :  { %125 = vmatpush3.bf16.msra.mxu0 %v136_v3 }
   0xb   :  { %126 = vmatprep.subr.bf16.mxu0 %v138_v0 }
   0xe   :  { %127 = vmatpush3.bf16.msra.mxu0 %v137_v4 }
  0x11   :  { %129 = vmatmul.mubr.msk.bf16.vlgmr.msra.gmra.mxu0 %vm57_vm1, %v17_v7 }
  0xd1   :  { %v95_v9 = vpop.f32.mrf.mxu0 }
  0xd2   :  { %v96_v10 = vadd.f32 %v109_v8, %v95_v9 }
  0xd3   :  { %v130_v11 = vpop.f32.mrf.mxu0 }
  0xd4   :  { %103 = vst.msk [vmem:[%s190_s3] sm:$0xff] %vm102_vm2, %v96_v10 }
  0xd5   :  { %v98_v12 = vpop.f32.mrf.mxu0 }
  0xd6   :  { %v99_v13 = vadd.f32 %v109_v8, %v98_v12 }
  0xd7   :  { %v131_v14 = vpop.f32.mrf.mxu0 }
  0xd8   :  { %104 = vst.msk [vmem:[%s190_s3 + $0x8] sm:$0xff] %vm102_vm2, %v99_v13 }

// kernel: sandglasset_forward.40
= control target key start
LH: loop header
LB: loop body
LE: loop exit
PB: predicated region body
PF: predicated region fallthrough
CT: control target
= control target key end

     0   :  { %s1291_s13 = smov 0   ;;  %s1429_s0 = inlined_call_operand.vmem [shape: f32[4,4,16], index: 0, kind: input, shape index: {}]   ;;  %s1430_s1 = inlined_call_operand.vmem [shape: f32[4,16], index: 1, kind: input, shape index: {}]   ;;  %s1431_s2 = inlined_call_operand.vmem [shape: f32[1,16], index: 2, kind: input, shape index: {}]   ;;  %s1432_s3 = inlined_call_operand.vmem [shape: f32[1,16], index: 3, kind: input, shape index: {}]   ;;  %s1433_s4 = inlined_call_operand.vmem [shape: bf16[16,48], index: 4, kind: input, shape index: {}]   ;;  %s1434_s5 = inlined_call_operand.vmem [shape: f32[1,48], index: 5, kind: input, shape index: {}]   ;;  %s1435_s6 = inlined_call_operand.vmem [shape: bf16[16,16], index: 6, kind: input, shape index: {}]   ;;  %s1436_s7 = inlined_call_operand.vmem [shape: f32[1,16], index: 7, kind: input, shape index: {}]   ;;  %s1437_s8 = inlined_call_operand.vmem [shape: f32[1,16], index: 8, kind: input, shape index: {}]   ;;  %s1438_s9 = inlined_call_operand.vmem [shape: f32[1,16], index: 9, kind: input, shape index: {}]   ;;  %s1439_s10 = inlined_call_operand.vmem [shape: f32[4,4,16], index: 10, kind: output, shape index: {}]  }
   0x1 LB: > { %s1059_s14 = sadd.s32 4294967295, %s1218_s13   ;;  %p1063_p0 = scmp.ge.s32.totalorder %s1218_s13, 1  ;;  %s1218_s13 = sphi %s1291_s13, %s20_s13  }
   0x2   : > { %p311_p1 = scmp.lt.s32.totalorder %s1218_s13, 5 }
   0x4   : > { %p312_p2 = pnand %p1063_p0, %p311_p1 }
   0x5   : > { %p347_p3 = scmp.lt.s32.totalorder (!%p312_p2), %s1059_s14, 3  ;;  %s1222_s29 = smov (!%p312_p2), 124  }
   0x6   : > { %315 = sbr.rel (%p312_p2) target bundleno = 2038 (0x7f6), region = 60  ;;  %s1223_s30 = smov (!%p312_p2), 112  }
   0x7   : > { %s1224_s11 = smov (!%p312_p2), 108   ;;  %s1225_s12 = smov (!%p312_p2), 104  }
   0x8   : > { %s1226_s16 = smov (!%p312_p2), 120   ;;  %s1227_s17 = smov (!%p312_p2), 100  }
   0x9   : > { %s1229_s19 = smov (!%p312_p2), 96   ;;  %s1230_s20 = smov (!%p312_p2), 92  }
   0xa   : > { %s1231_s21 = smov (!%p312_p2), 88   ;;  %s1232_s22 = smov (!%p312_p2), 84  }
   0xb   : > { %s1441_s14 = smov (!%p347_p3, %s1059_s14), 3  ;;  %vm359_vm0 = vcmask 125952   ;;  %v1190_v7 = vld [vmem:[%s1433_s4] sm:$0xff]   ;;  %v1220_v8 = vmov 0.0   ;;  %vm1221_vm1 = vmmov 0   ;;  %vm407_vm2 = vcmask 130048  }
   0xc   : > { %s1064_s15 = sshll.u32 %s1441_s14, 2  ;;  %1106 = vmatprep.subr.bf16.mxu0 %v1220_v8  ;;  %1108 = vmatprep.mubr.msk.bf16.mxu0 %vm1221_vm1, %v1220_v8  ;;  %v1066_v13 = vld [vmem:[%s1431_s2] ss:$0 sm:$0xff]  ;;  %vm455_vm3 = vcmask 31744   ;;  %vm503_vm4 = vcmask 27648   ;;  %vm521_vm5 = vcmask 1041408  }
   0xd   : > { %s350_s18 = scalar_lea.vmem %s1429_s0, %s1064_s15  ;;  %1107 = vmatpush3.bf16.msra.mxu0 %v1190_v7  ;;  %1112 = vmatprep.subr.bf16.mxu1 %v1220_v8  ;;  %v1067_v15 = vld [vmem:[%s1432_s3] ss:$0 sm:$0xff]  ;;  %s1233_s23 = smov 4   ;;  %vm911_vm6 = vcmask 64512   ;;  %vm913_vm7 = vcmask 97280  }
   0xe   : > { %v1307_v0 = vld [vmem:[%s350_s18] sm:$0xf]  ;;  %1114 = vmatprep.mubr.msk.bf16.mxu1 %vm1221_vm1, %v1220_v8  ;;  %1118 = vmatprep.subr.bf16.mxu0 %v1220_v8  ;;  %s1228_s18 = smov 116   ;;  %s1234_s26 = smov 8  }
   0xf   : > { %v360_v1 = vsel %vm359_vm0, %v1307_v0, 0.0  ;;  %v389_v18 = vld [vmem:[%s1430_s1] sm:$0xf]  ;;  %s1235_s27 = smov 12  }
  0x10   : > { %361 = vadd.xlane.f32.xlu0 %v360_v1  ;;  %v1068_v22 = vld [vmem:[%s1434_s5] ss:$0 sm:$0xff] }
  0x99   : > { %v362_v2 = vpop.xlane.xlu0 %361 }
  0x9a   : > { %v364_v3 = vmul.f32 0.0625, %v362_v2 }
  0x9c   : > { %v365_v4 = vsub.f32 %v1307_v0, %v364_v3 }
  0x9e   : > { %v366_v5 = vmul.f32 %v365_v4, %v365_v4 }
  0xa0   : > { %v367_v6 = vsel %vm359_vm0, %v366_v5, 0.0 }
  0xa1   : > { %368 = vadd.xlane.f32.xlu0 %v367_v6 }
 0x12a   : > { %v369_v9 = vpop.xlane.xlu0 %368 }
 0x12b   : > { %v370_v10 = vmul.f32 0.0625, %v369_v9 }
 0x12d   : > { %v371_v11 = vadd.f32 1e-05, %v370_v10 }
 0x12f   : > { %1192 = vrsqrt.f32 %v371_v11 }
 0x13c   : > { %v1193_v12 = vpop.eup %1192 }
 0x13d   : > { %v373_v14 = vmul.f32 %v1193_v12, %v365_v4 }
 0x13f   : > { %v380_v16 = vmul.f32 %v1066_v13, %v373_v14 }
 0x141   : > { %v387_v17 = vadd.f32 %v1067_v15, %v380_v16 }
 0x143   : > { %v388_v19 = vadd.f32 %v387_v17, %v1307_v0 }
 0x145   : > { %v1333_v20 = vadd.f32 %v389_v18, %v388_v19 }
 0x147   : > { %v391_v21 = vpack.c.bf16 %v1333_v20, %v1333_v20 }
 0x149   : > { %1109 = vmatmul.mubr.msk.bf16.vlgmr.msra.gmra.mxu0 %vm407_vm2, %v391_v21 }
 0x14a   : > { %1120 = vmatprep.mubr.msk.bf16.mxu0 %vm1221_vm1, %v1220_v8 }
 0x209   : > { %v445_v23 = vpop.f32.mrf.mxu0 }
 0x20a   : > { %v446_v24 = vadd.f32 %v1068_v22, %v445_v23 }
 0x20b   : > { %v1110_v25 = vpop.f32.mrf.mxu0 }
 0x20c   : > { %v1343_v26 = vpack.c.bf16 %v446_v24, %v446_v24 }
 0x20d   : > { %v448_v27 = vpop.f32.mrf.mxu0 }
 0x20e   : > { %565 = vrot.lane.b32.xlu0 %v1343_v26, %s1222_s29  ;;  %453 = vrot.lane.b32.xlu1 %v1343_v26, %s1223_s30 }
 0x20f   : > { %v1111_v28 = vpop.f32.mrf.mxu0 }
 0x212   : > { %567 = vrot.lane.b32.xlu1 %v1343_v26, %s1224_s11 }
 0x216   : > { %678 = vrot.lane.b32.xlu1 %v1343_v26, %s1225_s12 }
 0x21a   : > { %676 = vrot.lane.b32.xlu1 %v1343_v26, %s1226_s16 }
 0x21e   : > { %789 = vrot.lane.b32.xlu1 %v1343_v26, %s1227_s17 }
 0x222   : > { %787 = vrot.lane.b32.xlu1 %v1343_v26, %s1228_s18 }
 0x280   : > { %v454_v29 = vpop.permute.xlu1 %453  ;;  %v566_v34 = vpop.permute.xlu0 %565 }
 0x281   : > { %v460_v30 = vsel %vm455_vm3, %v454_v29, 0 }
 0x282   : > { %1113 = vmatpush3.bf16.xpose.msra.mxu1 %v460_v30 }
 0x283   : > { %1124 = vmatprep.subr.bf16.mxu1 %v1220_v8 }
 0x284   : > { %v568_v31 = vpop.permute.xlu1 %567 }
 0x285   : > { %v573_v32 = vsel %vm455_vm3, %v568_v31, 0 }
 0x288   : > { %v679_v33 = vpop.permute.xlu1 %678 }
 0x289   : > { %1115 = vmatmul.mubr.msk.bf16.vlgmr.msra.gmra.mxu1 %vm455_vm3, %v1343_v26  ;;  %v684_v36 = vsel %vm455_vm3, %v679_v33, 0 }
 0x28a   : > { %1125 = vmatpush3.bf16.xpose.msra.mxu1 %v573_v32  ;;  %1126 = vmatprep.mubr.msk.bf16.mxu1 %vm1221_vm1, %v1220_v8 }
 0x28b   : > { %1136 = vmatprep.subr.bf16.mxu1 %v1220_v8 }
 0x28c   : > { %v677_v35 = vpop.permute.xlu1 %676 }
 0x290   : > { %v790_v37 = vpop.permute.xlu1 %789 }
 0x291   : > { %1127 = vmatmul.mubr.msk.bf16.vlgmr.msra.gmra.mxu1 %vm455_vm3, %v566_v34  ;;  %v795_v38 = vsel %vm455_vm3, %v790_v37, 0 }
 0x292   : > { %1137 = vmatpush3.bf16.xpose.msra.mxu1 %v684_v36  ;;  %1138 = vmatprep.mubr.msk.bf16.mxu1 %vm1221_vm1, %v1220_v8 }
 0x293   : > { %1148 = vmatprep.subr.bf16.mxu1 %v1220_v8 }
 0x294   : > { %v788_v39 = vpop.permute.xlu1 %787 }
 0x299   : > { %1139 = vmatmul.mubr.msk.bf16.vlgmr.msra.gmra.mxu1 %vm455_vm3, %v677_v35 }
 0x29a   : > { %1149 = vmatpush3.bf16.xpose.msra.mxu1 %v795_v38  ;;  %1150 = vmatprep.mubr.msk.bf16.mxu1 %vm1221_vm1, %v1220_v8 }
 0x29b   : > { %1160 = vmatprep.subr.bf16.mxu1 %v1220_v8 }
 0x2a1   : > { %1151 = vmatmul.mubr.msk.bf16.vlgmr.msra.gmra.mxu1 %vm455_vm3, %v788_v39 }
 0x2a2   : > { %1162 = vmatprep.mubr.msk.bf16.mxu1 %vm1221_vm1, %v1220_v8 }
 0x349   : > { %v496_v40 = vpop.f32.mrf.mxu1 }
 0x34a   : > { %v502_v41 = vmul.f32 0.5, %v496_v40 }
 0x34b   : > { %v1116_v42 = vpop.f32.mrf.mxu1 }
 0x34c   : > { %v504_v43 = vsel %vm503_vm4, %v502_v41, -inf }
 0x34d   : > { %505 = vmax.xlane.f32.xlu1 %v504_v43  ;;  %v499_v44 = vpop.f32.mrf.mxu1 }
 0x34f   : > { %v1117_v45 = vpop.f32.mrf.mxu1 }
 0x351   : > { %v609_v46 = vpop.f32.mrf.mxu1 }
 0x352   : > { %v615_v47 = vmul.f32 0.5, %v609_v46 }
 0x353   : > { %v1128_v48 = vpop.f32.mrf.mxu1 }
 0x354   : > { %v616_v49 = vsel %vm503_vm4, %v615_v47, -inf }
 0x355   : > { %617 = vmax.xlane.f32.xlu0 %v616_v49  ;;  %v612_v50 = vpop.f32.mrf.mxu1 }
 0x357   : > { %v1129_v51 = vpop.f32.mrf.mxu1 }
 0x359   : > { %v720_v52 = vpop.f32.mrf.mxu1 }
 0x35a   : > { %v726_v53 = vmul.f32 0.5, %v720_v52 }
 0x35b   : > { %v1140_v54 = vpop.f32.mrf.mxu1 }
 0x35c   : > { %v727_v55 = vsel %vm503_vm4, %v726_v53, -inf }
 0x35d   : > { %728 = vmax.xlane.f32.xlu1 %v727_v55  ;;  %v723_v56 = vpop.f32.mrf.mxu1  ;;  %v1191_v55 = vld [vmem:[%s1435_s6] sm:$0xff]  }
 0x35e   : > { %1161 = vmatpush3.bf16.msra.mxu1 %v1191_v55 }
 0x35f   : > { %v1141_v57 = vpop.f32.mrf.mxu1 }
 0x361   : > { %v831_v58 = vpop.f32.mrf.mxu1 }
 0x362   : > { %v837_v59 = vmul.f32 0.5, %v831_v58 }
 0x363   : > { %v1152_v60 = vpop.f32.mrf.mxu1 }
 0x364   : > { %v838_v61 = vsel %vm503_vm4, %v837_v59, -inf }
 0x365   : > { %839 = vmax.xlane.f32.xlu0 %v838_v61  ;;  %v834_v62 = vpop.f32.mrf.mxu1 }
 0x367   : > { %v1153_v63 = vpop.f32.mrf.mxu1 }
 0x3d6   : > { %v506_v1 = vpop.xlane.xlu1 %505 }
 0x3d7   : > { %v507_v2 = vsub.f32 %v502_v41, %v506_v1 }
 0x3d9   : > { %v508_v3 = vmul.f32 1.442695, %v507_v2 }
 0x3db   : > { %1194 = vpow2.f32 %v508_v3 }
 0x3de   : > { %v618_v4 = vpop.xlane.xlu0 %617 }
 0x3df   : > { %v619_v5 = vsub.f32 %v615_v47, %v618_v4 }
 0x3e1   : > { %v620_v6 = vmul.f32 1.442695, %v619_v5 }
 0x3e3   : > { %1196 = vpow2.f32 %v620_v6 }
 0x3e6   : > { %v729_v17 = vpop.xlane.xlu1 %728 }
 0x3e7   : > { %v730_v18 = vsub.f32 %v726_v53, %v729_v17 }
 0x3e8   : > { %v1195_v7 = vpop.eup %1194 }
 0x3e9   : > { %v510_v9 = vsel %vm503_vm4, %v1195_v7, 0.0  ;;  %v731_v19 = vmul.f32 1.442695, %v730_v18 }
 0x3ea   : > { %511 = vadd.xlane.f32.xlu1 %v510_v9 }
 0x3ee   : > { %v840_v10 = vpop.xlane.xlu0 %839 }
 0x3ef   : > { %v841_v11 = vsub.f32 %v837_v59, %v840_v10 }
 0x3f0   : > { %v1197_v12 = vpop.eup %1196 }
 0x3f1   : > { %v842_v13 = vmul.f32 1.442695, %v841_v11  ;;  %v622_v14 = vsel %vm503_vm4, %v1197_v12, 0.0 }
 0x3f2   : > { %623 = vadd.xlane.f32.xlu0 %v622_v14 }
 0x3f3   : > { %1198 = vpow2.f32 %v842_v13 }
 0x3f4   : > { %1200 = vpow2.f32 %v731_v19 }
 0x3fb   : > { %516 = vrot.lane.b32.xlu1 %v1343_v26, %s1229_s19  ;;  %s354_s19 = scalar_lea.vmem %s1439_s10, %s1064_s15 }
 0x400   : > { %v1199_v15 = vpop.eup %1198 }
 0x401   : > { %v844_v16 = vsel %vm503_vm4, %v1199_v15, 0.0  ;;  %v1201_v21 = vpop.eup %1200 }
 0x402   : > { %845 = vadd.xlane.f32.xlu0 %v844_v16  ;;  %v733_v22 = vsel %vm503_vm4, %v1201_v21, 0.0 }
 0x418   : > { %628 = vrot.lane.b32.xlu0 %v1343_v26, %s1230_s20 }
 0x41f   : > { %734 = vadd.xlane.f32.xlu1 %v733_v22 }
 0x430   : > { %739 = vrot.lane.b32.xlu1 %v1343_v26, %s1231_s21 }
 0x434   : > { %850 = vrot.lane.b32.xlu1 %v1343_v26, %s1232_s22 }
 0x473   : > { %v512_v23 = vpop.xlane.xlu1 %511 }
 0x474   : > { %1202 = vrcp.f32 %v512_v23 }
 0x477   : > { %v517_v24 = vpop.permute.xlu1 %516 }
 0x478   : > { %v523_v25 = vsel %vm521_vm5, %v517_v24, 0 }
 0x479   : > { %1119 = vmatpush3.bf16.msra.mxu0 %v523_v25 }
 0x47a   : > { %1130 = vmatprep.subr.bf16.mxu0 %v1220_v8 }
 0x47b   : > { %v624_v27 = vpop.xlane.xlu0 %623 }
 0x47c   : > { %1204 = vrcp.f32 %v624_v27 }
 0x481   : > { %v1203_v28 = vpop.eup %1202 }
 0x482   : > { %v514_v29 = vmul.f32 %v1203_v28, %v1195_v7  ;;  %v1079_v7 = vld [vmem:[%s1436_s7] ss:$0 sm:$0xff] }
 0x483   : > { %v1083_v28 = vld [vmem:[%s1438_s9] ss:$0 sm:$0xff] }
 0x484   : > { %v515_v30 = vpack.c.bf16 %v514_v29, %v514_v29 }
 0x486   : > { %1121 = vmatmul.mubr.msk.bf16.vlgmr.msra.gmra.mxu0 %vm455_vm3, %v515_v30 }
 0x487   : > { %1132 = vmatprep.mubr.msk.bf16.mxu0 %vm1221_vm1, %v1220_v8 }
 0x489   : > { %v1205_v26 = vpop.eup %1204 }
 0x48a   : > { %v626_v32 = vmul.f32 %v1205_v26, %v1197_v12 }
 0x48b   : > { %v846_v31 = vpop.xlane.xlu0 %845 }
 0x48c   : > { %v627_v35 = vpack.c.bf16 %v626_v32, %v626_v32 }
 0x48f   : > { %v629_v33 = vpop.permute.xlu0 %628 }
 0x490   : > { %v634_v34 = vsel %vm521_vm5, %v629_v33, 0 }
 0x491   : > { %1131 = vmatpush3.bf16.msra.mxu0 %v634_v34 }
 0x492   : > { %1142 = vmatprep.subr.bf16.mxu0 %v1220_v8 }
 0x494   : > { %1133 = vmatmul.mubr.msk.bf16.vlgmr.msra.gmra.mxu0 %vm455_vm3, %v627_v35 }
 0x495   : > { %1144 = vmatprep.mubr.msk.bf16.mxu0 %vm1221_vm1, %v1220_v8 }
 0x4a8   : > { %v735_v36 = vpop.xlane.xlu1 %734 }
 0x4a9   : > { %1206 = vrcp.f32 %v735_v36 }
 0x4aa   : > { %1208 = vrcp.f32 %v846_v31 }
 0x4ac   : > { %v740_v37 = vpop.permute.xlu1 %739 }
 0x4ad   : > { %v745_v38 = vsel %vm521_vm5, %v740_v37, 0 }
 0x4ae   : > { %1143 = vmatpush3.bf16.msra.mxu0 %v745_v38 }
 0x4af   : > { %1154 = vmatprep.subr.bf16.mxu0 %v1220_v8 }
 0x4b0   : > { %v851_v41 = vpop.permute.xlu1 %850 }
 0x4b1   : > { %v856_v44 = vsel %vm521_vm5, %v851_v41, 0 }
 0x4b6   : > { %v1207_v39 = vpop.eup %1206 }
 0x4b7   : > { %v737_v40 = vmul.f32 %v1207_v39, %v1201_v21  ;;  %v1209_v43 = vpop.eup %1208 }
 0x4b8   : > { %v848_v45 = vmul.f32 %v1209_v43, %v1199_v15 }
 0x4b9   : > { %v738_v42 = vpack.c.bf16 %v737_v40, %v737_v40 }
 0x4ba   : > { %v849_v46 = vpack.c.bf16 %v848_v45, %v848_v45 }
 0x4bb   : > { %1145 = vmatmul.mubr.msk.bf16.vlgmr.msra.gmra.mxu0 %vm455_vm3, %v738_v42 }
 0x4bc   : > { %1155 = vmatpush3.bf16.msra.mxu0 %v856_v44  ;;  %1156 = vmatprep.mubr.msk.bf16.mxu0 %vm1221_vm1, %v1220_v8 }
 0x4c3   : > { %1157 = vmatmul.mubr.msk.bf16.vlgmr.msra.gmra.mxu0 %vm455_vm3, %v849_v46 }
 0x546   : > { %v559_v47 = vpop.f32.mrf.mxu0 }
 0x548   : > { %v1122_v48 = vpop.f32.mrf.mxu0 }
 0x54a   : > { %v562_v49 = vpop.f32.mrf.mxu0 }
 0x54c   : > { %v1123_v50 = vpop.f32.mrf.mxu0 }
 0x554   : > { %v670_v51 = vpop.f32.mrf.mxu0 }
 0x555   : > { %899 = vrot.lane.b32.xlu0 %v670_v51, %s1233_s23 }
 0x556   : > { %v1134_v52 = vpop.f32.mrf.mxu0 }
 0x558   : > { %v673_v53 = vpop.f32.mrf.mxu0 }
 0x55a   : > { %v1135_v54 = vpop.f32.mrf.mxu0 }
 0x57b   : > { %v781_v8 = vpop.f32.mrf.mxu0 }
 0x57c   : > { %903 = vrot.lane.b32.xlu1 %v781_v8, %s1234_s26 }
 0x57d   : > { %v1146_v56 = vpop.f32.mrf.mxu0 }
 0x57f   : > { %v784_v57 = vpop.f32.mrf.mxu0 }
 0x581   : > { %v1147_v58 = vpop.f32.mrf.mxu0 }
 0x583   : > { %v892_v59 = vpop.f32.mrf.mxu0 }
 0x584   : > { %907 = vrot.lane.b32.xlu0 %v892_v59, %s1235_s27 }
 0x585   : > { %v1158_v60 = vpop.f32.mrf.mxu0 }
 0x587   : > { %v895_v61 = vpop.f32.mrf.mxu0 }
 0x589   : > { %v1159_v62 = vpop.f32.mrf.mxu0 }
 0x5c7   : > { %v900_v63 = vpop.permute.xlu0 %899 }
 0x5c8   : > { %v910_v2 = vsel %vm455_vm3, %v559_v47, %v900_v63 }
 0x5ee   : > { %v904_v1 = vpop.permute.xlu1 %903 }
 0x5ef   : > { %v912_v3 = vsel %vm911_vm6, %v910_v2, %v904_v1 }
 0x5f6   : > { %v908_v4 = vpop.permute.xlu0 %907 }
 0x5f7   : > { %v914_v5 = vsel %vm913_vm7, %v912_v3, %v908_v4 }
 0x5f8   : > { %v915_v6 = vpack.c.bf16 %v914_v5, %v914_v5 }
 0x5fa   : > { %1163 = vmatmul.mubr.msk.bf16.vlgmr.msra.gmra.mxu1 %vm407_vm2, %v915_v6 }
 0x6ba   : > { %v968_v9 = vpop.f32.mrf.mxu1 }
 0x6bb   : > { %v969_v10 = vadd.f32 %v1079_v7, %v968_v9 }
 0x6bc   : > { %v1164_v11 = vpop.f32.mrf.mxu1 }
 0x6bd   : > { %v974_v12 = vadd.f32 %v969_v10, %v1333_v20  ;;  %v1082_v20 = vld [vmem:[%s1437_s8] ss:$0 sm:$0xff] }
 0x6be   : > { %v971_v13 = vpop.f32.mrf.mxu1 }
 0x6bf   : > { %v977_v14 = vsel %vm359_vm0, %v974_v12, 0.0 }
 0x6c0   : > { %978 = vadd.xlane.f32.xlu1 %v977_v14  ;;  %v1165_v15 = vpop.f32.mrf.mxu1 }
 0x749   : > { %v979_v16 = vpop.xlane.xlu1 %978 }
 0x74a   : > { %v980_v17 = vmul.f32 0.0625, %v979_v16 }
 0x74c   : > { %v981_v18 = vsub.f32 %v974_v12, %v980_v17 }
 0x74e   : > { %v982_v19 = vmul.f32 %v981_v18, %v981_v18 }
 0x750   : > { %v983_v21 = vsel %vm359_vm0, %v982_v19, 0.0 }
 0x751   : > { %984 = vadd.xlane.f32.xlu0 %v983_v21 }
 0x7da   : > { %v985_v22 = vpop.xlane.xlu0 %984 }
 0x7db   : > { %v986_v23 = vmul.f32 0.0625, %v985_v22 }
 0x7dd   : > { %v987_v24 = vadd.f32 1e-05, %v986_v23 }
 0x7df   : > { %1210 = vrsqrt.f32 %v987_v24 }
 0x7ec   : > { %v1211_v25 = vpop.eup %1210 }
 0x7ed   : > { %v989_v27 = vmul.f32 %v1211_v25, %v981_v18 }
 0x7ef   : > { %v996_v29 = vmul.f32 %v1082_v20, %v989_v27 }
 0x7f1   : > { %v1003_v30 = vadd.f32 %v1083_v28, %v996_v29 }
 0x7f3   : > { %v1004_v26 = vadd.f32 %v1003_v30, %v1307_v0 }
 0x7f5   : > { %1005 = vst.msk [vmem:[%s354_s19] sm:$0xf] %vm359_vm0, %v1004_v26 }
 0x7f6 PF: > { %s20_s13 = sadd.s32 1, %s1218_s13  }
 0x7f7   : > { %p17_p4 = scmp.ge.s32.totalorder %s20_s13, 6  }
 0x7f9   :  { %19 = sbr.rel (!%p17_p4) target bundleno = 1 (0x1), region = 90 }

// kernel: sandglasset_forward.54
= control target key start
LH: loop header
LB: loop body
LE: loop exit
PB: predicated region body
PF: predicated region fallthrough
CT: control target
= control target key end

     0   :  { %vm42_vm0 = vcmask 130048   ;;  %vm120_vm1 = vcmask 261120   ;;  %s243_s1 = inlined_call_operand.vmem [shape: bf16[16,32], index: 1, kind: input, shape index: {}]   ;;  %s244_s0 = inlined_call_operand.vmem [shape: f32[64,16], index: 0, kind: input, shape index: {}]   ;;  %s245_s2 = inlined_call_operand.vmem [shape: f32[1,32], index: 2, kind: input, shape index: {}]   ;;  %s246_s3 = inlined_call_operand.vmem [shape: f32[64,32], index: 3, kind: output, shape index: {}]  }
   0x1   :  { %v156_v0 = vld [vmem:[%s243_s1] sm:$0xff]   ;;  %v16_v2 = vld [vmem:[%s244_s0 + $0x8] sm:$0xff]  ;;  %v17_v6 = vld [vmem:[%s244_s0 + $0x10] sm:$0xff] }
   0x2   :  { %v15_v1 = vld [vmem:[%s244_s0] sm:$0xff]  ;;  %144 = vmatprep.subr.bf16.mxu0 %v156_v0  ;;  %154 = vmatprep.subr.bf16.mxu1 %v156_v0  ;;  %v20_v5 = vld [vmem:[%s244_s0 + $0x28] sm:$0xff]  ;;  %v18_v7 = vld [vmem:[%s244_s0 + $0x18] sm:$0xff] }
   0x3   :  { %v19_v3 = vld [vmem:[%s244_s0 + $0x20] sm:$0xff]  ;;  %v23_v4 = vpack.c.bf16 %v16_v2, %v15_v1  ;;  %145 = vmatpush3.bf16.msra.mxu0 %v156_v0  ;;  %155 = vmatpush3.bf16.msra.mxu1 %v156_v0  ;;  %v24_v9 = vpack.c.bf16 %v18_v7, %v17_v6  ;;  %v21_v10 = vld [vmem:[%s244_s0 + $0x30] sm:$0xff]  ;;  %v22_v11 = vld [vmem:[%s244_s0 + $0x38] sm:$0xff] }
   0x4   :  { %v25_v8 = vpack.c.bf16 %v20_v5, %v19_v3  ;;  %v26_v12 = vpack.c.bf16 %v22_v11, %v21_v10  ;;  %v133_v13 = vld [vmem:[%s245_s2] ss:$0 sm:$0xff] }
   0x5   :  { %146 = vmatprep.mubr.msk.bf16.mxu0 %vm42_vm0, %v23_v4 }
   0x6   :  { %150 = vmatprep.mubr.msk.bf16.mxu1 %vm42_vm0, %v25_v8  ;;  %147 = vmatmul.mubr.msk.bf16.vlgmr.msra.gmra.mxu0 %vm42_vm0, %v24_v9 }
   0x7   :  { %151 = vmatmul.mubr.msk.bf16.vlgmr.msra.gmra.mxu1 %vm42_vm0, %v26_v12 }
  0xc6   :  { %v148_v14 = vpop.f32.mrf.mxu0 }
  0xc7   :  { %v152_v15 = vpop.f32.mrf.mxu1  ;;  %v98_v16 = vadd.f32 %v148_v14, %v133_v13 }
  0xc8   :  { %v114_v17 = vadd.f32 %v152_v15, %v133_v13  ;;  %v89_v18 = vpop.f32.mrf.mxu0 }
  0xc9   :  { %v105_v19 = vpop.f32.mrf.mxu1  ;;  %123 = vst.msk [vmem:[%s246_s3 + $0x10] sm:$0xff] %vm120_vm1, %v98_v16  ;;  %v90_v20 = vadd.f32 %v133_v13, %v89_v18 }
  0xca   :  { %127 = vst.msk [vmem:[%s246_s3 + $0x30] sm:$0xff] %vm120_vm1, %v114_v17  ;;  %v106_v21 = vadd.f32 %v133_v13, %v105_v19  ;;  %v149_v22 = vpop.f32.mrf.mxu0 }
  0xcb   :  { %v153_v23 = vpop.f32.mrf.mxu1  ;;  %121 = vst.msk [vmem:[%s246_s3] sm:$0xff] %vm120_vm1, %v90_v20  ;;  %v101_v24 = vadd.f32 %v149_v22, %v133_v13 }
  0xcc   :  { %125 = vst.msk [vmem:[%s246_s3 + $0x20] sm:$0xff] %vm120_vm1, %v106_v21  ;;  %v117_v25 = vadd.f32 %v153_v23, %v133_v13  ;;  %v92_v26 = vpop.f32.mrf.mxu0 }
  0xcd   :  { %v108_v27 = vpop.f32.mrf.mxu1  ;;  %124 = vst.msk [vmem:[%s246_s3 + $0x18] sm:$0xff] %vm120_vm1, %v101_v24  ;;  %v93_v28 = vadd.f32 %v133_v13, %v92_v26 }
  0xce   :  { %128 = vst.msk [vmem:[%s246_s3 + $0x38] sm:$0xff] %vm120_vm1, %v117_v25  ;;  %v109_v29 = vadd.f32 %v133_v13, %v108_v27 }
  0xcf   :  { %122 = vst.msk [vmem:[%s246_s3 + $0x8] sm:$0xff] %vm120_vm1, %v93_v28 }
  0xd0   :  { %126 = vst.msk [vmem:[%s246_s3 + $0x28] sm:$0xff] %vm120_vm1, %v109_v29 }

// kernel: sandglasset_forward.55
= control target key start
LH: loop header
LB: loop body
LE: loop exit
PB: predicated region body
PF: predicated region fallthrough
CT: control target
= control target key end

     0   :  { %s494_s12 = smov 0   ;;  %s496_s13 = smov 0   ;;  %s536_s0 = inlined_call_operand.vmem [shape: f32[2,16,16], index: 0, kind: input, shape index: {}]   ;;  %s537_s1 = inlined_call_operand.vmem [shape: f32[16,16], index: 1, kind: input, shape index: {}]   ;;  %s538_s2 = inlined_call_operand.vmem [shape: bf16[16,16], index: 2, kind: input, shape index: {}]   ;;  %s539_s3 = inlined_call_operand.vmem [shape: f32[2,16,16], index: 3, kind: output, shape index: {}]  }
   0x1   :  { %s498_s14 = smov 0  }
   0x2 LB: > { %s25_s15 = sadd.s32 1, %s466_s13  ;;  %p402_p0 = scmp.ge.s32.totalorder %s470_s14, 1  ;;  %s470_s14 = sphi %s498_s14, %s13_s14   ;;  %s466_s13 = sphi %s496_s13, %s541_s13   ;;  %s462_s12 = sphi %s494_s12, %s540_s12  }
   0x3   : > { %p27_p1 = scmp.ge.s32.totalorder %s25_s15, 2  ;;  %p169_p2 = scmp.lt.s32.totalorder %s470_s14, 3 }
   0x5   : > { %s543_s15 = smov (%p27_p1, %s25_s15), 0  ;;  %p170_p3 = pnand %p402_p0, %p169_p2 }
   0x6   : > { %p207_p4 = scmp.lt.s32.totalorder (!%p170_p3), %s462_s12, 1 }
   0x7   : > { %173 = sbr.rel (%p170_p3) target bundleno = 219 (0xdb), region = 32 }
   0xc   : > { %v447_v0 = vld [vmem:[%s538_s2] sm:$0xff]   ;;  %v472_v1 = vmov 0.0   ;;  %vm473_vm0 = vmmov 0   ;;  %s545_s12 = smov (!%p207_p4, %s462_s12), 1  ;;  %v236_v3 = vld [vmem:[%s537_s1 + $0x8] sm:$0xff]  ;;  %vm248_vm1 = vcmask 130048  }
   0xd   : > { %415 = vmatprep.subr.bf16.mxu0 %v472_v1  ;;  %417 = vmatprep.mubr.msk.bf16.mxu0 %vm473_vm0, %v472_v1  ;;  %s411_s18 = sshll.u32 %s545_s12, 4  ;;  %v235_v2 = vld [vmem:[%s537_s1] sm:$0xff] }
   0xe   : > { %416 = vmatpush3.bf16.msra.mxu0 %v447_v0  ;;  %s214_s25 = scalar_lea.vmem %s536_s0, %s411_s18  ;;  %s230_s28 = scalar_lea.vmem %s539_s3, %s411_s18 }
   0xf   : > { %v233_v4 = vld [vmem:[%s214_s25] sm:$0xff]  ;;  %v234_v5 = vld [vmem:[%s214_s25 + $0x8] sm:$0xff] }
  0x10   : > { %v237_v6 = vmul.f32 %v235_v2, %v233_v4  ;;  %v238_v7 = vmul.f32 %v236_v3, %v234_v5 }
  0x12   : > { %v239_v8 = vpack.c.bf16 %v238_v7, %v237_v6 }
  0x14   : > { %418 = vmatmul.mubr.msk.bf16.vlgmr.msra.gmra.mxu0 %vm248_vm1, %v239_v8 }
  0xd4   : > { %v286_v9 = vpop.f32.mrf.mxu0 }
  0xd5   : > { %293 = vst.msk [vmem:[%s230_s28] sm:$0xff] %vm248_vm1, %v286_v9 }
  0xd6   : > { %v419_v10 = vpop.f32.mrf.mxu0 }
  0xd8   : > { %v289_v11 = vpop.f32.mrf.mxu0 }
  0xd9   : > { %294 = vst.msk [vmem:[%s230_s28 + $0x8] sm:$0xff] %vm248_vm1, %v289_v11 }
  0xda   : > { %v420_v12 = vpop.f32.mrf.mxu0 }
  0xdb PF: > { %s13_s14 = sadd.s32 1, %s470_s14   ;;  %s540_s12 = smov %s466_s13 }
  0xdc   : > { %p10_p5 = scmp.ge.s32.totalorder %s13_s14, 4   ;;  %s541_s13 = smov %s543_s15 }
  0xde   :  { %12 = sbr.rel (!%p10_p5) target bundleno = 2 (0x2), region = 65 }

</bundles_post_ra>
